<compile_context>
chip_gen: v7x
topology: tpu7x:2x2x1
jax: 0.10.0
libtpu: 0.0.40
codegen_flags: <defaults>
</compile_context>

<pallas_src>
import functools

import jax
import jax.numpy as jnp
from jax.experimental import pallas as pl
from jax.experimental.pallas import tpu as pltpu

VMEM_LIMIT = 48 * 1024 * 1024  # stays under v7x's 64 MiB physical VMEM per TensorCore


# ----------------------------------------------------------------------------
# Front-end kernel: fused [Conv1d + BN(eval) + ReLU] * n_conv + LSTM input
# projection, one batch element per grid step.
# ----------------------------------------------------------------------------
def _encoder_front_kernel(x_ref, w_ref, scale_ref, shift_ref,
                          wih_f_ref, b_f_ref, wih_b_ref, b_b_ref,
                          gf_ref, gb_ref,
                          buf, acc):
    # x_ref: (1, T, E) bf16          w_ref: (n_conv, K, E, E) bf16
    # scale/shift: (n_conv, 1, E) f32 (conv bias + eval BatchNorm folded)
    # wih_*: (E, 4H) bf16            b_*: (1, 4H) f32 (b_ih + b_hh)
    # gf/gb: (1, T, 4H) f32 outputs  buf: (T+2p, E) bf16  acc: (T, E) f32
    n_conv, K = w_ref.shape[0], w_ref.shape[1]
    T = x_ref.shape[1]
    pad = (K - 1) // 2

    # In-kernel 'same' padding: zero the halo rows and place the activation in the
    # middle of the padded scratch (no jnp.pad HBM copy per layer in the wrapper).
    buf[...] = jnp.zeros_like(buf)
    buf[pad:pad + T, :] = x_ref[0]

    for layer in range(n_conv):                     # static unroll over conv layers
        # Conv1d as K tall (T, E_in) @ (E_in, E_out) MXU matmuls, fp32 accumulation
        # into a VMEM scratch (no full-output register accumulator / spills).
        acc[...] = jnp.dot(buf[0:T, :], w_ref[layer, 0],
                           preferred_element_type=jnp.float32)
        for k in range(1, K):                       # static unroll over kernel taps
            acc[...] += jnp.dot(buf[k:k + T, :], w_ref[layer, k],
                                preferred_element_type=jnp.float32)
        y = acc[...] * scale_ref[layer] + shift_ref[layer]   # conv bias + BN folded
        buf[pad:pad + T, :] = jnp.maximum(y, 0.0).astype(buf.dtype)
        # F.dropout with p=0.0 is the identity; nothing to do.

    xf = buf[pad:pad + T, :]                        # (T, E) bf16 final conv output
    # LSTM input projection hoisted out of the recurrence: one big MXU matmul per
    # direction, bias folded in here (not re-broadcast every timestep).
    gf_ref[0] = (jnp.dot(xf, wih_f_ref[...], preferred_element_type=jnp.float32)
                 + b_f_ref[...])
    gb_ref[0] = (jnp.dot(xf, wih_b_ref[...], preferred_element_type=jnp.float32)
                 + b_b_ref[...])


def encoder_front(x_bf16, conv_w, conv_scale, conv_shift, wih_f, b_f, wih_b, b_b):
    B, T, E = x_bf16.shape
    K = conv_w.shape[1]
    H4 = wih_f.shape[1]
    pad = (K - 1) // 2

    def full(shape):
        return pl.BlockSpec(shape, lambda b, _n=len(shape): (0,) * _n)

    return pl.pallas_call(
        _encoder_front_kernel,
        out_shape=(jax.ShapeDtypeStruct((B, T, H4), jnp.float32),
                   jax.ShapeDtypeStruct((B, T, H4), jnp.float32)),
        grid=(B,),
        in_specs=[
            pl.BlockSpec((1, T, E), lambda b: (b, 0, 0)),
            full(conv_w.shape), full(conv_scale.shape), full(conv_shift.shape),
            full(wih_f.shape), full(b_f.shape), full(wih_b.shape), full(b_b.shape),
        ],
        out_specs=(pl.BlockSpec((1, T, H4), lambda b: (b, 0, 0)),
                   pl.BlockSpec((1, T, H4), lambda b: (b, 0, 0))),
        scratch_shapes=[pltpu.VMEM((T + 2 * pad, E), jnp.bfloat16),   # padded activation
                        pltpu.VMEM((T, E), jnp.float32)],             # conv accumulator
        compiler_params=pltpu.CompilerParams(
            dimension_semantics=("parallel",),       # batch is independent (megacore)
            vmem_limit_bytes=VMEM_LIMIT),
    )(x_bf16, conv_w, conv_scale, conv_shift, wih_f, b_f, wih_b, b_b)


# ----------------------------------------------------------------------------
# Bidirectional single-layer LSTM recurrence over precomputed input gates,
# with packed-sequence (length-mask) semantics.  Grid streams time-tiles.
# ----------------------------------------------------------------------------
def _bilstm_kernel(len_ref, gf_ref, gb_ref, whh_f_ref, whh_b_ref,
                   out_f_ref, out_b_ref,
                   h_f, c_f, h_b, c_b):
    # gf/gb: (B, TILE_T, 4H) f32 (already x@Wih + b)   whh: (H, 4H) bf16
    # out_*: (B, TILE_T, H) f32                        state scratch: (B, H) f32
    B, tile_t, G = gf_ref.shape
    H = G // 4
    tblk = pl.program_id(0)
    nblk = pl.num_programs(0)

    @pl.when(tblk == 0)
    def _init():
        h_f[...] = jnp.zeros_like(h_f)
        c_f[...] = jnp.zeros_like(c_f)
        h_b[...] = jnp.zeros_like(h_b)
        c_b[...] = jnp.zeros_like(c_b)

    lengths = len_ref[...]                       # (B, 1) int32

    def cell(gx, h, c, whh_ref):
        gates = gx + jnp.dot(h.astype(whh_ref.dtype), whh_ref[...],
                             preferred_element_type=jnp.float32)
        i = jax.nn.sigmoid(gates[:, 0 * H:1 * H])   # PyTorch gate order i,f,g,o
        f = jax.nn.sigmoid(gates[:, 1 * H:2 * H])
        g = jnp.tanh(gates[:, 2 * H:3 * H])
        o = jax.nn.sigmoid(gates[:, 3 * H:4 * H])
        c_new = f * c + i * g
        h_new = o * jnp.tanh(c_new)
        return h_new, c_new

    # Carry the state in registers inside the tile; read/write VMEM scratch once
    # per grid step (scratch persists across grid iterations).
    hf, cf = h_f[...], c_f[...]
    hb, cb = h_b[...], c_b[...]
    for s in range(tile_t):                      # static unroll within the tile
        # ---- forward direction ----
        t_f = tblk * tile_t + s
        hf_n, cf_n = cell(gf_ref[:, s, :], hf, cf, whh_f_ref)
        vf = t_f < lengths                       # (B, 1) bool
        hf = jnp.where(vf, hf_n, hf)
        cf = jnp.where(vf, cf_n, cf)
        out_f_ref[:, s, :] = jnp.where(vf, hf_n, 0.0).astype(out_f_ref.dtype)

        # ---- backward direction: pack_padded semantics => reverse state stays at
        #      its zero init until t == length[b]-1; output zero past length ----
        sb = tile_t - 1 - s
        t_b = (nblk - 1 - tblk) * tile_t + sb
        hb_n, cb_n = cell(gb_ref[:, sb, :], hb, cb, whh_b_ref)
        vb = t_b < lengths
        hb = jnp.where(vb, hb_n, hb)
        cb = jnp.where(vb, cb_n, cb)
        out_b_ref[:, sb, :] = jnp.where(vb, hb_n, 0.0).astype(out_b_ref.dtype)

    h_f[...] = hf
    c_f[...] = cf
    h_b[...] = hb
    c_b[...] = cb
    # TODO(synk): on v7x the two directions could be split across the two TensorCores
    # (direction as a "parallel" grid axis / pl.core_map); kept interleaved here, which
    # also hides EUP (sigmoid/tanh) latency behind the other direction's matmul on
    # single-TC v5e/v6e.


def bilstm(gates_f, gates_b, lengths_b1, whh_f, whh_b, tile_t):
    B, T, G = gates_f.shape
    H = G // 4
    assert T % tile_t == 0, "tile_t must divide T"
    assert tile_t == T or tile_t % 8 == 0, "tile_t must be 8-aligned or equal T"
    nblk = T // tile_t

    gate_fwd = pl.BlockSpec((B, tile_t, G), lambda t: (0, t, 0))
    gate_bwd = pl.BlockSpec((B, tile_t, G), lambda t: (0, nblk - 1 - t, 0))
    out_fwd = pl.BlockSpec((B, tile_t, H), lambda t: (0, t, 0))
    out_bwd = pl.BlockSpec((B, tile_t, H), lambda t: (0, nblk - 1 - t, 0))

    return pl.pallas_call(
        _bilstm_kernel,
        out_shape=(jax.ShapeDtypeStruct((B, T, H), jnp.float32),
                   jax.ShapeDtypeStruct((B, T, H), jnp.float32)),
        grid=(nblk,),
        in_specs=[
            pl.BlockSpec((B, 1), lambda t: (0, 0)),               # lengths (resident)
            gate_fwd, gate_bwd,                                   # streamed time-tiles
            pl.BlockSpec(whh_f.shape, lambda t: (0, 0)),          # resident weights
            pl.BlockSpec(whh_b.shape, lambda t: (0, 0)),
        ],
        out_specs=(out_fwd, out_bwd),
        scratch_shapes=[pltpu.VMEM((B, H), jnp.float32) for _ in range(4)],
        compiler_params=pltpu.CompilerParams(
            dimension_semantics=("arbitrary",),    # recurrence is sequential in time
            vmem_limit_bytes=VMEM_LIMIT),
    )(lengths_b1, gates_f, gates_b, whh_f, whh_b)


# ----------------------------------------------------------------------------
# Parameter init (deterministic, mirrors the shapes implied by Encoder.__init__)
# ----------------------------------------------------------------------------
def init_params(key, token_size, E, n_conv, K):
    H = E // 2
    eps = 1e-5
    k_emb, k_conv, k_lstm = jax.random.split(key, 3)

    params = {"embedding": jax.random.normal(k_emb, (token_size, E), jnp.float32)}

    ws, scales, shifts = [], [], []
    ck = jax.random.split(k_conv, n_conv)
    for i in range(n_conv):
        kw, kb = jax.random.split(ck[i], 2)
        w = jax.random.normal(kw, (K, E, E), jnp.float32) * (1.0 / (E * K) ** 0.5)
        bias = jax.random.normal(kb, (E,), jnp.float32) * 0.1
        # BatchNorm1d default params, eval-mode running stats.
        # TODO(synk): training-mode BatchNorm (batch statistics) not implemented;
        # eval-mode stats are folded into a per-channel scale/shift inside the kernel.
        gamma = jnp.ones((E,), jnp.float32)
        beta = jnp.zeros((E,), jnp.float32)
        rmean = jnp.zeros((E,), jnp.float32)
        rvar = jnp.ones((E,), jnp.float32)
        scale = gamma / jnp.sqrt(rvar + eps)
        shift = (bias - rmean) * scale + beta
        ws.append(w)
        scales.append(scale)
        shifts.append(shift)
    params["conv_w"] = jnp.stack(ws).astype(jnp.bfloat16)             # (n_conv, K, E, E)
    params["conv_scale"] = jnp.stack(scales).reshape(n_conv, 1, E)    # f32
    params["conv_shift"] = jnp.stack(shifts).reshape(n_conv, 1, E)    # f32

    lk = jax.random.split(k_lstm, 8)
    s = 1.0 / (H ** 0.5)
    u = lambda k, shape: jax.random.uniform(k, shape, jnp.float32, -s, s)
    params["lstm"] = {
        "wih_f": u(lk[0], (E, 4 * H)).astype(jnp.bfloat16),
        "whh_f": u(lk[1], (H, 4 * H)).astype(jnp.bfloat16),
        "b_f":   (u(lk[2], (4 * H,)) + u(lk[3], (4 * H,))).reshape(1, 4 * H),
        "wih_b": u(lk[4], (E, 4 * H)).astype(jnp.bfloat16),
        "whh_b": u(lk[5], (H, 4 * H)).astype(jnp.bfloat16),
        "b_b":   (u(lk[6], (4 * H,)) + u(lk[7], (4 * H,))).reshape(1, 4 * H),
    }
    return params


# ----------------------------------------------------------------------------
# Forward pass (mirrors Encoder.forward)
# ----------------------------------------------------------------------------
def encoder_forward(params, tokens, lengths, tile_t=8):
    # Embedding lookup (gather) — plain JAX glue; activations go to bf16 (matmuls
    # keep fp32 accumulation inside the kernels).
    x = params["embedding"][tokens].astype(jnp.bfloat16)          # (B, T, E)
    lstm = params["lstm"]
    gates_f, gates_b = encoder_front(
        x, params["conv_w"], params["conv_scale"], params["conv_shift"],
        lstm["wih_f"], lstm["b_f"], lstm["wih_b"], lstm["b_b"])
    B = tokens.shape[0]
    out_f, out_b = bilstm(gates_f, gates_b,
                          lengths.reshape(B, 1).astype(jnp.int32),
                          lstm["whh_f"], lstm["whh_b"], tile_t)
    # Kernels emit batch-first (B, T, H) halves directly -> only a lane-concat remains
    # (no transpose pass).  Zero past each sequence length, as pad_packed_sequence does.
    # TODO(synk): pad_packed_sequence truncates to max(lengths); we keep the full T
    # (identical whenever max(lengths) == T, the usual case).
    return jnp.concatenate([out_f, out_b], axis=-1)               # (B, T, E) float32


if __name__ == "__main__":
    token_size, embedding_dim, n_convolutions, kernel_size = 32, 32, 2, 5
    B, T = 2, 16

    key = jax.random.PRNGKey(0)
    k_par, k_tok = jax.random.split(key)
    params = init_params(k_par, token_size, embedding_dim, n_convolutions, kernel_size)

    tokens = jax.random.randint(k_tok, (B, T), 0, token_size, jnp.int32)
    lengths = jnp.array([16, 11], jnp.int32)   # max length == T, as pad_packed returns

    fwd = jax.jit(functools.partial(encoder_forward, tile_t=8))
    out = jax.block_until_ready(fwd(params, tokens, lengths))

    assert out.shape == (B, T, embedding_dim), out.shape
    assert out.dtype == jnp.float32
    print("KERNEL_OK")
</pallas_src>

<mosaic_0001>
module attributes {stable_mosaic.version = 11 : i64} {
  func.func @_bilstm_kernel(%arg0: i32, %arg1: memref<2x1xi32, #tpu.memory_space<vmem>>, %arg2: memref<2x8x64xf32, #tpu.memory_space<vmem>>, %arg3: memref<2x8x64xf32, #tpu.memory_space<vmem>>, %arg4: memref<16x64xbf16, #tpu.memory_space<vmem>>, %arg5: memref<16x64xbf16, #tpu.memory_space<vmem>>, %arg6: memref<2x8x16xf32, #tpu.memory_space<vmem>>, %arg7: memref<2x8x16xf32, #tpu.memory_space<vmem>>, %arg8: memref<2x16xf32, #tpu.memory_space<vmem>>, %arg9: memref<2x16xf32, #tpu.memory_space<vmem>>, %arg10: memref<2x16xf32, #tpu.memory_space<vmem>>, %arg11: memref<2x16xf32, #tpu.memory_space<vmem>>) attributes {dimension_semantics = [#tpu.dimension_semantics<arbitrary>], iteration_bounds = array<i64: 2>, scalar_prefetch = 0 : i64, scratch_operands = 4 : i64, tpu.core_type = #tpu.core_type<tc>, window_params = [{pipeline_mode = #tpu.pipeline_mode<synchronous>, transform_indices = @transform_0, window_bounds = array<i64: 2, 1>}, {transform_indices = @transform_1, window_bounds = array<i64: 2, 8, 64>}, {transform_indices = @transform_2, window_bounds = array<i64: 2, 8, 64>}, {pipeline_mode = #tpu.pipeline_mode<synchronous>, transform_indices = @transform_3, window_bounds = array<i64: 16, 64>}, {pipeline_mode = #tpu.pipeline_mode<synchronous>, transform_indices = @transform_4, window_bounds = array<i64: 16, 64>}, {transform_indices = @transform_5, window_bounds = array<i64: 2, 8, 16>}, {transform_indices = @transform_6, window_bounds = array<i64: 2, 8, 16>}]} {
    %c0_i32 = arith.constant 0 : i32
    %0 = arith.cmpi eq, %arg0, %c0_i32 : i32
    %1 = arith.extui %0 : i1 to i32
    %c0_i32_0 = arith.constant 0 : i32
    %2 = arith.cmpi ne, %1, %c0_i32_0 : i32
    scf.if %2 {
      %cst_250 = arith.constant 0.000000e+00 : f32
      %788 = vector.broadcast %cst_250 : f32 to vector<2x16xf32>
      %c0_251 = arith.constant 0 : index
      %c0_252 = arith.constant 0 : index
      %789 = vector.load %arg8[%c0_251, %c0_252] : memref<2x16xf32, #tpu.memory_space<vmem>>, vector<2x16xf32>
      tpu.vector_store %arg8[%c0_251, %c0_252], %788 {strides = array<i32>} : memref<2x16xf32, #tpu.memory_space<vmem>>, vector<2x16xf32>,
      %cst_253 = arith.constant 0.000000e+00 : f32
      %790 = vector.broadcast %cst_253 : f32 to vector<2x16xf32>
      %c0_254 = arith.constant 0 : index
      %c0_255 = arith.constant 0 : index
      %791 = vector.load %arg9[%c0_254, %c0_255] : memref<2x16xf32, #tpu.memory_space<vmem>>, vector<2x16xf32>
      tpu.vector_store %arg9[%c0_254, %c0_255], %790 {strides = array<i32>} : memref<2x16xf32, #tpu.memory_space<vmem>>, vector<2x16xf32>,
      %cst_256 = arith.constant 0.000000e+00 : f32
      %792 = vector.broadcast %cst_256 : f32 to vector<2x16xf32>
      %c0_257 = arith.constant 0 : index
      %c0_258 = arith.constant 0 : index
      %793 = vector.load %arg10[%c0_257, %c0_258] : memref<2x16xf32, #tpu.memory_space<vmem>>, vector<2x16xf32>
      tpu.vector_store %arg10[%c0_257, %c0_258], %792 {strides = array<i32>} : memref<2x16xf32, #tpu.memory_space<vmem>>, vector<2x16xf32>,
      %cst_259 = arith.constant 0.000000e+00 : f32
      %794 = vector.broadcast %cst_259 : f32 to vector<2x16xf32>
      %c0_260 = arith.constant 0 : index
      %c0_261 = arith.constant 0 : index
      %795 = vector.load %arg11[%c0_260, %c0_261] : memref<2x16xf32, #tpu.memory_space<vmem>>, vector<2x16xf32>
      tpu.vector_store %arg11[%c0_260, %c0_261], %794 {strides = array<i32>} : memref<2x16xf32, #tpu.memory_space<vmem>>, vector<2x16xf32>,
    } else {
    }
    %c0 = arith.constant 0 : index
    %c0_1 = arith.constant 0 : index
    %3 = vector.load %arg1[%c0, %c0_1] : memref<2x1xi32, #tpu.memory_space<vmem>>, vector<2x1xi32>
    %c0_2 = arith.constant 0 : index
    %c0_3 = arith.constant 0 : index
    %4 = vector.load %arg8[%c0_2, %c0_3] : memref<2x16xf32, #tpu.memory_space<vmem>>, vector<2x16xf32>
    %c0_4 = arith.constant 0 : index
    %c0_5 = arith.constant 0 : index
    %5 = vector.load %arg9[%c0_4, %c0_5] : memref<2x16xf32, #tpu.memory_space<vmem>>, vector<2x16xf32>
    %c0_6 = arith.constant 0 : index
    %c0_7 = arith.constant 0 : index
    %6 = vector.load %arg10[%c0_6, %c0_7] : memref<2x16xf32, #tpu.memory_space<vmem>>, vector<2x16xf32>
    %c0_8 = arith.constant 0 : index
    %c0_9 = arith.constant 0 : index
    %7 = vector.load %arg11[%c0_8, %c0_9] : memref<2x16xf32, #tpu.memory_space<vmem>>, vector<2x16xf32>
    %c8_i32 = arith.constant 8 : i32
    %8 = arith.muli %arg0, %c8_i32 : i32
    %c0_i32_10 = arith.constant 0 : i32
    %9 = arith.addi %8, %c0_i32_10 : i32
    %c0_11 = arith.constant 0 : index
    %c0_12 = arith.constant 0 : index
    %c0_13 = arith.constant 0 : index
    %10 = vector.load %arg2[%c0_11, %c0_12, %c0_13] : memref<2x8x64xf32, #tpu.memory_space<vmem>>, vector<2x1x64xf32>
    %11 = vector.shape_cast %10 : vector<2x1x64xf32> to vector<2x64xf32>
    %12 = arith.truncf %4 : vector<2x16xf32> to vector<2x16xbf16>
    %c0_14 = arith.constant 0 : index
    %c0_15 = arith.constant 0 : index
    %13 = vector.load %arg4[%c0_14, %c0_15] : memref<16x64xbf16, #tpu.memory_space<vmem>>, vector<16x64xbf16>
    %cst = arith.constant dense<0.000000e+00> : vector<2x64xf32>
    %14 = tpu.matmul %12, %13, %cst {dimension_numbers = #tpu.dot_dimension_numbers<[1], [0], [0], [1], [0, 0, 1, 1], [], []>} : vector<2x16xbf16>, vector<16x64xbf16>, vector<2x64xf32> -> vector<2x64xf32>
    %15 = arith.addf %11, %14 : vector<2x64xf32>
    %16 = vector.extract_strided_slice %15 {offsets = [0, 0], sizes = [2, 16], strides = [1, 1]} : vector<2x64xf32> to vector<2x16xf32>
    %17 = arith.negf %16 : vector<2x16xf32>
    %18 = math.exp %17 : vector<2x16xf32>
    %cst_16 = arith.constant 1.000000e+00 : f32
    %19 = vector.broadcast %cst_16 : f32 to vector<2x16xf32>
    %20 = arith.addf %19, %18 : vector<2x16xf32>
    %21 = arith.divf %19, %20 : vector<2x16xf32>
    %22 = vector.extract_strided_slice %15 {offsets = [0, 16], sizes = [2, 16], strides = [1, 1]} : vector<2x64xf32> to vector<2x16xf32>
    %23 = arith.negf %22 : vector<2x16xf32>
    %24 = math.exp %23 : vector<2x16xf32>
    %cst_17 = arith.constant 1.000000e+00 : f32
    %25 = vector.broadcast %cst_17 : f32 to vector<2x16xf32>
    %26 = arith.addf %25, %24 : vector<2x16xf32>
    %27 = arith.divf %25, %26 : vector<2x16xf32>
    %28 = vector.extract_strided_slice %15 {offsets = [0, 32], sizes = [2, 16], strides = [1, 1]} : vector<2x64xf32> to vector<2x16xf32>
    %29 = math.tanh %28 : vector<2x16xf32>
    %30 = vector.extract_strided_slice %15 {offsets = [0, 48], sizes = [2, 16], strides = [1, 1]} : vector<2x64xf32> to vector<2x16xf32>
    %31 = arith.negf %30 : vector<2x16xf32>
    %32 = math.exp %31 : vector<2x16xf32>
    %cst_18 = arith.constant 1.000000e+00 : f32
    %33 = vector.broadcast %cst_18 : f32 to vector<2x16xf32>
    %34 = arith.addf %33, %32 : vector<2x16xf32>
    %35 = arith.divf %33, %34 : vector<2x16xf32>
    %36 = arith.mulf %27, %5 : vector<2x16xf32>
    %37 = arith.mulf %21, %29 : vector<2x16xf32>
    %38 = arith.addf %36, %37 : vector<2x16xf32>
    %39 = math.tanh %38 : vector<2x16xf32>
    %40 = arith.mulf %35, %39 : vector<2x16xf32>
    %41 = vector.broadcast %9 : i32 to vector<2x1xi32>
    %42 = arith.cmpi slt, %41, %3 : vector<2x1xi32>
    %43 = vector.shape_cast %42 : vector<2x1xi1> to vector<2x1xi1>
    %44 = vector.broadcast %43 : vector<2x1xi1> to vector<2x16xi1>
    %45 = arith.select %44, %40, %4 : vector<2x16xi1>, vector<2x16xf32>
    %46 = vector.shape_cast %42 : vector<2x1xi1> to vector<2x1xi1>
    %47 = vector.broadcast %46 : vector<2x1xi1> to vector<2x16xi1>
    %48 = arith.select %47, %38, %5 : vector<2x16xi1>, vector<2x16xf32>
    %cst_19 = arith.constant 0.000000e+00 : f32
    %49 = vector.shape_cast %42 : vector<2x1xi1> to vector<2x1xi1>
    %50 = vector.broadcast %49 : vector<2x1xi1> to vector<2x16xi1>
    %51 = vector.broadcast %cst_19 : f32 to vector<2x16xf32>
    %52 = arith.select %50, %40, %51 : vector<2x16xi1>, vector<2x16xf32>
    %c0_20 = arith.constant 0 : index
    %c0_21 = arith.constant 0 : index
    %c0_22 = arith.constant 0 : index
    %53 = vector.load %arg6[%c0_20, %c0_21, %c0_22] : memref<2x8x16xf32, #tpu.memory_space<vmem>>, vector<2x1x16xf32>
    %54 = vector.shape_cast %53 : vector<2x1x16xf32> to vector<2x16xf32>
    %55 = vector.shape_cast %52 : vector<2x16xf32> to vector<2x1x16xf32>
    tpu.vector_store %arg6[%c0_20, %c0_21, %c0_22], %55 {strides = array<i32>} : memref<2x8x16xf32, #tpu.memory_space<vmem>>, vector<2x1x16xf32>,
    %c1_i32 = arith.constant 1 : i32
    %56 = arith.subi %c1_i32, %arg0 : i32
    %c8_i32_23 = arith.constant 8 : i32
    %57 = arith.muli %56, %c8_i32_23 : i32
    %c7_i32 = arith.constant 7 : i32
    %58 = arith.addi %57, %c7_i32 : i32
    %c0_24 = arith.constant 0 : index
    %c7 = arith.constant 7 : index
    %c0_25 = arith.constant 0 : index
    %59 = vector.load %arg3[%c0_24, %c7, %c0_25] : memref<2x8x64xf32, #tpu.memory_space<vmem>>, vector<2x1x64xf32>
    %60 = vector.shape_cast %59 : vector<2x1x64xf32> to vector<2x64xf32>
    %61 = arith.truncf %6 : vector<2x16xf32> to vector<2x16xbf16>
    %c0_26 = arith.constant 0 : index
    %c0_27 = arith.constant 0 : index
    %62 = vector.load %arg5[%c0_26, %c0_27] : memref<16x64xbf16, #tpu.memory_space<vmem>>, vector<16x64xbf16>
    %cst_28 = arith.constant dense<0.000000e+00> : vector<2x64xf32>
    %63 = tpu.matmul %61, %62, %cst_28 {dimension_numbers = #tpu.dot_dimension_numbers<[1], [0], [0], [1], [0, 0, 1, 1], [], []>} : vector<2x16xbf16>, vector<16x64xbf16>, vector<2x64xf32> -> vector<2x64xf32>
    %64 = arith.addf %60, %63 : vector<2x64xf32>
    %65 = vector.extract_strided_slice %64 {offsets = [0, 0], sizes = [2, 16], strides = [1, 1]} : vector<2x64xf32> to vector<2x16xf32>
    %66 = arith.negf %65 : vector<2x16xf32>
    %67 = math.exp %66 : vector<2x16xf32>
    %cst_29 = arith.constant 1.000000e+00 : f32
    %68 = vector.broadcast %cst_29 : f32 to vector<2x16xf32>
    %69 = arith.addf %68, %67 : vector<2x16xf32>
    %70 = arith.divf %68, %69 : vector<2x16xf32>
    %71 = vector.extract_strided_slice %64 {offsets = [0, 16], sizes = [2, 16], strides = [1, 1]} : vector<2x64xf32> to vector<2x16xf32>
    %72 = arith.negf %71 : vector<2x16xf32>
    %73 = math.exp %72 : vector<2x16xf32>
    %cst_30 = arith.constant 1.000000e+00 : f32
    %74 = vector.broadcast %cst_30 : f32 to vector<2x16xf32>
    %75 = arith.addf %74, %73 : vector<2x16xf32>
    %76 = arith.divf %74, %75 : vector<2x16xf32>
    %77 = vector.extract_strided_slice %64 {offsets = [0, 32], sizes = [2, 16], strides = [1, 1]} : vector<2x64xf32> to vector<2x16xf32>
    %78 = math.tanh %77 : vector<2x16xf32>
    %79 = vector.extract_strided_slice %64 {offsets = [0, 48], sizes = [2, 16], strides = [1, 1]} : vector<2x64xf32> to vector<2x16xf32>
    %80 = arith.negf %79 : vector<2x16xf32>
    %81 = math.exp %80 : vector<2x16xf32>
    %cst_31 = arith.constant 1.000000e+00 : f32
    %82 = vector.broadcast %cst_31 : f32 to vector<2x16xf32>
    %83 = arith.addf %82, %81 : vector<2x16xf32>
    %84 = arith.divf %82, %83 : vector<2x16xf32>
    %85 = arith.mulf %76, %7 : vector<2x16xf32>
    %86 = arith.mulf %70, %78 : vector<2x16xf32>
    %87 = arith.addf %85, %86 : vector<2x16xf32>
    %88 = math.tanh %87 : vector<2x16xf32>
    %89 = arith.mulf %84, %88 : vector<2x16xf32>
    %90 = vector.broadcast %58 : i32 to vector<2x1xi32>
    %91 = arith.cmpi slt, %90, %3 : vector<2x1xi32>
    %92 = vector.shape_cast %91 : vector<2x1xi1> to vector<2x1xi1>
    %93 = vector.broadcast %92 : vector<2x1xi1> to vector<2x16xi1>
    %94 = arith.select %93, %89, %6 : vector<2x16xi1>, vector<2x16xf32>
    %95 = vector.shape_cast %91 : vector<2x1xi1> to vector<2x1xi1>
    %96 = vector.broadcast %95 : vector<2x1xi1> to vector<2x16xi1>
    %97 = arith.select %96, %87, %7 : vector<2x16xi1>, vector<2x16xf32>
    %cst_32 = arith.constant 0.000000e+00 : f32
    %98 = vector.shape_cast %91 : vector<2x1xi1> to vector<2x1xi1>
    %99 = vector.broadcast %98 : vector<2x1xi1> to vector<2x16xi1>
    %100 = vector.broadcast %cst_32 : f32 to vector<2x16xf32>
    %101 = arith.select %99, %89, %100 : vector<2x16xi1>, vector<2x16xf32>
    %c0_33 = arith.constant 0 : index
    %c7_34 = arith.constant 7 : index
    %c0_35 = arith.constant 0 : index
    %102 = vector.load %arg7[%c0_33, %c7_34, %c0_35] : memref<2x8x16xf32, #tpu.memory_space<vmem>>, vector<2x1x16xf32>
    %103 = vector.shape_cast %102 : vector<2x1x16xf32> to vector<2x16xf32>
    %104 = vector.shape_cast %101 : vector<2x16xf32> to vector<2x1x16xf32>
    tpu.vector_store %arg7[%c0_33, %c7_34, %c0_35], %104 {strides = array<i32>} : memref<2x8x16xf32, #tpu.memory_space<vmem>>, vector<2x1x16xf32>,
    %c8_i32_36 = arith.constant 8 : i32
    %105 = arith.muli %arg0, %c8_i32_36 : i32
    %c1_i32_37 = arith.constant 1 : i32
    %106 = arith.addi %105, %c1_i32_37 : i32
    %c0_38 = arith.constant 0 : index
    %c1 = arith.constant 1 : index
    %c0_39 = arith.constant 0 : index
    %107 = vector.load %arg2[%c0_38, %c1, %c0_39] : memref<2x8x64xf32, #tpu.memory_space<vmem>>, vector<2x1x64xf32>
    %108 = vector.shape_cast %107 : vector<2x1x64xf32> to vector<2x64xf32>
    %109 = arith.truncf %45 : vector<2x16xf32> to vector<2x16xbf16>
    %c0_40 = arith.constant 0 : index
    %c0_41 = arith.constant 0 : index
    %110 = vector.load %arg4[%c0_40, %c0_41] : memref<16x64xbf16, #tpu.memory_space<vmem>>, vector<16x64xbf16>
    %cst_42 = arith.constant dense<0.000000e+00> : vector<2x64xf32>
    %111 = tpu.matmul %109, %110, %cst_42 {dimension_numbers = #tpu.dot_dimension_numbers<[1], [0], [0], [1], [0, 0, 1, 1], [], []>} : vector<2x16xbf16>, vector<16x64xbf16>, vector<2x64xf32> -> vector<2x64xf32>
    %112 = arith.addf %108, %111 : vector<2x64xf32>
    %113 = vector.extract_strided_slice %112 {offsets = [0, 0], sizes = [2, 16], strides = [1, 1]} : vector<2x64xf32> to vector<2x16xf32>
    %114 = arith.negf %113 : vector<2x16xf32>
    %115 = math.exp %114 : vector<2x16xf32>
    %cst_43 = arith.constant 1.000000e+00 : f32
    %116 = vector.broadcast %cst_43 : f32 to vector<2x16xf32>
    %117 = arith.addf %116, %115 : vector<2x16xf32>
    %118 = arith.divf %116, %117 : vector<2x16xf32>
    %119 = vector.extract_strided_slice %112 {offsets = [0, 16], sizes = [2, 16], strides = [1, 1]} : vector<2x64xf32> to vector<2x16xf32>
    %120 = arith.negf %119 : vector<2x16xf32>
    %121 = math.exp %120 : vector<2x16xf32>
    %cst_44 = arith.constant 1.000000e+00 : f32
    %122 = vector.broadcast %cst_44 : f32 to vector<2x16xf32>
    %123 = arith.addf %122, %121 : vector<2x16xf32>
    %124 = arith.divf %122, %123 : vector<2x16xf32>
    %125 = vector.extract_strided_slice %112 {offsets = [0, 32], sizes = [2, 16], strides = [1, 1]} : vector<2x64xf32> to vector<2x16xf32>
    %126 = math.tanh %125 : vector<2x16xf32>
    %127 = vector.extract_strided_slice %112 {offsets = [0, 48], sizes = [2, 16], strides = [1, 1]} : vector<2x64xf32> to vector<2x16xf32>
    %128 = arith.negf %127 : vector<2x16xf32>
    %129 = math.exp %128 : vector<2x16xf32>
    %cst_45 = arith.constant 1.000000e+00 : f32
    %130 = vector.broadcast %cst_45 : f32 to vector<2x16xf32>
    %131 = arith.addf %130, %129 : vector<2x16xf32>
    %132 = arith.divf %130, %131 : vector<2x16xf32>
    %133 = arith.mulf %124, %48 : vector<2x16xf32>
    %134 = arith.mulf %118, %126 : vector<2x16xf32>
    %135 = arith.addf %133, %134 : vector<2x16xf32>
    %136 = math.tanh %135 : vector<2x16xf32>
    %137 = arith.mulf %132, %136 : vector<2x16xf32>
    %138 = vector.broadcast %106 : i32 to vector<2x1xi32>
    %139 = arith.cmpi slt, %138, %3 : vector<2x1xi32>
    %140 = vector.shape_cast %139 : vector<2x1xi1> to vector<2x1xi1>
    %141 = vector.broadcast %140 : vector<2x1xi1> to vector<2x16xi1>
    %142 = arith.select %141, %137, %45 : vector<2x16xi1>, vector<2x16xf32>
    %143 = vector.shape_cast %139 : vector<2x1xi1> to vector<2x1xi1>
    %144 = vector.broadcast %143 : vector<2x1xi1> to vector<2x16xi1>
    %145 = arith.select %144, %135, %48 : vector<2x16xi1>, vector<2x16xf32>
    %cst_46 = arith.constant 0.000000e+00 : f32
    %146 = vector.shape_cast %139 : vector<2x1xi1> to vector<2x1xi1>
    %147 = vector.broadcast %146 : vector<2x1xi1> to vector<2x16xi1>
    %148 = vector.broadcast %cst_46 : f32 to vector<2x16xf32>
    %149 = arith.select %147, %137, %148 : vector<2x16xi1>, vector<2x16xf32>
    %c0_47 = arith.constant 0 : index
    %c1_48 = arith.constant 1 : index
    %c0_49 = arith.constant 0 : index
    %150 = vector.load %arg6[%c0_47, %c1_48, %c0_49] : memref<2x8x16xf32, #tpu.memory_space<vmem>>, vector<2x1x16xf32>
    %151 = vector.shape_cast %150 : vector<2x1x16xf32> to vector<2x16xf32>
    %152 = vector.shape_cast %149 : vector<2x16xf32> to vector<2x1x16xf32>
    tpu.vector_store %arg6[%c0_47, %c1_48, %c0_49], %152 {strides = array<i32>} : memref<2x8x16xf32, #tpu.memory_space<vmem>>, vector<2x1x16xf32>,
    %c1_i32_50 = arith.constant 1 : i32
    %153 = arith.subi %c1_i32_50, %arg0 : i32
    %c8_i32_51 = arith.constant 8 : i32
    %154 = arith.muli %153, %c8_i32_51 : i32
    %c6_i32 = arith.constant 6 : i32
    %155 = arith.addi %154, %c6_i32 : i32
    %c0_52 = arith.constant 0 : index
    %c6 = arith.constant 6 : index
    %c0_53 = arith.constant 0 : index
    %156 = vector.load %arg3[%c0_52, %c6, %c0_53] : memref<2x8x64xf32, #tpu.memory_space<vmem>>, vector<2x1x64xf32>
    %157 = vector.shape_cast %156 : vector<2x1x64xf32> to vector<2x64xf32>
    %158 = arith.truncf %94 : vector<2x16xf32> to vector<2x16xbf16>
    %c0_54 = arith.constant 0 : index
    %c0_55 = arith.constant 0 : index
    %159 = vector.load %arg5[%c0_54, %c0_55] : memref<16x64xbf16, #tpu.memory_space<vmem>>, vector<16x64xbf16>
    %cst_56 = arith.constant dense<0.000000e+00> : vector<2x64xf32>
    %160 = tpu.matmul %158, %159, %cst_56 {dimension_numbers = #tpu.dot_dimension_numbers<[1], [0], [0], [1], [0, 0, 1, 1], [], []>} : vector<2x16xbf16>, vector<16x64xbf16>, vector<2x64xf32> -> vector<2x64xf32>
    %161 = arith.addf %157, %160 : vector<2x64xf32>
    %162 = vector.extract_strided_slice %161 {offsets = [0, 0], sizes = [2, 16], strides = [1, 1]} : vector<2x64xf32> to vector<2x16xf32>
    %163 = arith.negf %162 : vector<2x16xf32>
    %164 = math.exp %163 : vector<2x16xf32>
    %cst_57 = arith.constant 1.000000e+00 : f32
    %165 = vector.broadcast %cst_57 : f32 to vector<2x16xf32>
    %166 = arith.addf %165, %164 : vector<2x16xf32>
    %167 = arith.divf %165, %166 : vector<2x16xf32>
    %168 = vector.extract_strided_slice %161 {offsets = [0, 16], sizes = [2, 16], strides = [1, 1]} : vector<2x64xf32> to vector<2x16xf32>
    %169 = arith.negf %168 : vector<2x16xf32>
    %170 = math.exp %169 : vector<2x16xf32>
    %cst_58 = arith.constant 1.000000e+00 : f32
    %171 = vector.broadcast %cst_58 : f32 to vector<2x16xf32>
    %172 = arith.addf %171, %170 : vector<2x16xf32>
    %173 = arith.divf %171, %172 : vector<2x16xf32>
    %174 = vector.extract_strided_slice %161 {offsets = [0, 32], sizes = [2, 16], strides = [1, 1]} : vector<2x64xf32> to vector<2x16xf32>
    %175 = math.tanh %174 : vector<2x16xf32>
    %176 = vector.extract_strided_slice %161 {offsets = [0, 48], sizes = [2, 16], strides = [1, 1]} : vector<2x64xf32> to vector<2x16xf32>
    %177 = arith.negf %176 : vector<2x16xf32>
    %178 = math.exp %177 : vector<2x16xf32>
    %cst_59 = arith.constant 1.000000e+00 : f32
    %179 = vector.broadcast %cst_59 : f32 to vector<2x16xf32>
    %180 = arith.addf %179, %178 : vector<2x16xf32>
    %181 = arith.divf %179, %180 : vector<2x16xf32>
    %182 = arith.mulf %173, %97 : vector<2x16xf32>
    %183 = arith.mulf %167, %175 : vector<2x16xf32>
    %184 = arith.addf %182, %183 : vector<2x16xf32>
    %185 = math.tanh %184 : vector<2x16xf32>
    %186 = arith.mulf %181, %185 : vector<2x16xf32>
    %187 = vector.broadcast %155 : i32 to vector<2x1xi32>
    %188 = arith.cmpi slt, %187, %3 : vector<2x1xi32>
    %189 = vector.shape_cast %188 : vector<2x1xi1> to vector<2x1xi1>
    %190 = vector.broadcast %189 : vector<2x1xi1> to vector<2x16xi1>
    %191 = arith.select %190, %186, %94 : vector<2x16xi1>, vector<2x16xf32>
    %192 = vector.shape_cast %188 : vector<2x1xi1> to vector<2x1xi1>
    %193 = vector.broadcast %192 : vector<2x1xi1> to vector<2x16xi1>
    %194 = arith.select %193, %184, %97 : vector<2x16xi1>, vector<2x16xf32>
    %cst_60 = arith.constant 0.000000e+00 : f32
    %195 = vector.shape_cast %188 : vector<2x1xi1> to vector<2x1xi1>
    %196 = vector.broadcast %195 : vector<2x1xi1> to vector<2x16xi1>
    %197 = vector.broadcast %cst_60 : f32 to vector<2x16xf32>
    %198 = arith.select %196, %186, %197 : vector<2x16xi1>, vector<2x16xf32>
    %c0_61 = arith.constant 0 : index
    %c6_62 = arith.constant 6 : index
    %c0_63 = arith.constant 0 : index
    %199 = vector.load %arg7[%c0_61, %c6_62, %c0_63] : memref<2x8x16xf32, #tpu.memory_space<vmem>>, vector<2x1x16xf32>
    %200 = vector.shape_cast %199 : vector<2x1x16xf32> to vector<2x16xf32>
    %201 = vector.shape_cast %198 : vector<2x16xf32> to vector<2x1x16xf32>
    tpu.vector_store %arg7[%c0_61, %c6_62, %c0_63], %201 {strides = array<i32>} : memref<2x8x16xf32, #tpu.memory_space<vmem>>, vector<2x1x16xf32>,
    %c8_i32_64 = arith.constant 8 : i32
    %202 = arith.muli %arg0, %c8_i32_64 : i32
    %c2_i32 = arith.constant 2 : i32
    %203 = arith.addi %202, %c2_i32 : i32
    %c0_65 = arith.constant 0 : index
    %c2 = arith.constant 2 : index
    %c0_66 = arith.constant 0 : index
    %204 = vector.load %arg2[%c0_65, %c2, %c0_66] : memref<2x8x64xf32, #tpu.memory_space<vmem>>, vector<2x1x64xf32>
    %205 = vector.shape_cast %204 : vector<2x1x64xf32> to vector<2x64xf32>
    %206 = arith.truncf %142 : vector<2x16xf32> to vector<2x16xbf16>
    %c0_67 = arith.constant 0 : index
    %c0_68 = arith.constant 0 : index
    %207 = vector.load %arg4[%c0_67, %c0_68] : memref<16x64xbf16, #tpu.memory_space<vmem>>, vector<16x64xbf16>
    %cst_69 = arith.constant dense<0.000000e+00> : vector<2x64xf32>
    %208 = tpu.matmul %206, %207, %cst_69 {dimension_numbers = #tpu.dot_dimension_numbers<[1], [0], [0], [1], [0, 0, 1, 1], [], []>} : vector<2x16xbf16>, vector<16x64xbf16>, vector<2x64xf32> -> vector<2x64xf32>
    %209 = arith.addf %205, %208 : vector<2x64xf32>
    %210 = vector.extract_strided_slice %209 {offsets = [0, 0], sizes = [2, 16], strides = [1, 1]} : vector<2x64xf32> to vector<2x16xf32>
    %211 = arith.negf %210 : vector<2x16xf32>
    %212 = math.exp %211 : vector<2x16xf32>
    %cst_70 = arith.constant 1.000000e+00 : f32
    %213 = vector.broadcast %cst_70 : f32 to vector<2x16xf32>
    %214 = arith.addf %213, %212 : vector<2x16xf32>
    %215 = arith.divf %213, %214 : vector<2x16xf32>
    %216 = vector.extract_strided_slice %209 {offsets = [0, 16], sizes = [2, 16], strides = [1, 1]} : vector<2x64xf32> to vector<2x16xf32>
    %217 = arith.negf %216 : vector<2x16xf32>
    %218 = math.exp %217 : vector<2x16xf32>
    %cst_71 = arith.constant 1.000000e+00 : f32
    %219 = vector.broadcast %cst_71 : f32 to vector<2x16xf32>
    %220 = arith.addf %219, %218 : vector<2x16xf32>
    %221 = arith.divf %219, %220 : vector<2x16xf32>
    %222 = vector.extract_strided_slice %209 {offsets = [0, 32], sizes = [2, 16], strides = [1, 1]} : vector<2x64xf32> to vector<2x16xf32>
    %223 = math.tanh %222 : vector<2x16xf32>
    %224 = vector.extract_strided_slice %209 {offsets = [0, 48], sizes = [2, 16], strides = [1, 1]} : vector<2x64xf32> to vector<2x16xf32>
    %225 = arith.negf %224 : vector<2x16xf32>
    %226 = math.exp %225 : vector<2x16xf32>
    %cst_72 = arith.constant 1.000000e+00 : f32
    %227 = vector.broadcast %cst_72 : f32 to vector<2x16xf32>
    %228 = arith.addf %227, %226 : vector<2x16xf32>
    %229 = arith.divf %227, %228 : vector<2x16xf32>
    %230 = arith.mulf %221, %145 : vector<2x16xf32>
    %231 = arith.mulf %215, %223 : vector<2x16xf32>
    %232 = arith.addf %230, %231 : vector<2x16xf32>
    %233 = math.tanh %232 : vector<2x16xf32>
    %234 = arith.mulf %229, %233 : vector<2x16xf32>
    %235 = vector.broadcast %203 : i32 to vector<2x1xi32>
    %236 = arith.cmpi slt, %235, %3 : vector<2x1xi32>
    %237 = vector.shape_cast %236 : vector<2x1xi1> to vector<2x1xi1>
    %238 = vector.broadcast %237 : vector<2x1xi1> to vector<2x16xi1>
    %239 = arith.select %238, %234, %142 : vector<2x16xi1>, vector<2x16xf32>
    %240 = vector.shape_cast %236 : vector<2x1xi1> to vector<2x1xi1>
    %241 = vector.broadcast %240 : vector<2x1xi1> to vector<2x16xi1>
    %242 = arith.select %241, %232, %145 : vector<2x16xi1>, vector<2x16xf32>
    %cst_73 = arith.constant 0.000000e+00 : f32
    %243 = vector.shape_cast %236 : vector<2x1xi1> to vector<2x1xi1>
    %244 = vector.broadcast %243 : vector<2x1xi1> to vector<2x16xi1>
    %245 = vector.broadcast %cst_73 : f32 to vector<2x16xf32>
    %246 = arith.select %244, %234, %245 : vector<2x16xi1>, vector<2x16xf32>
    %c0_74 = arith.constant 0 : index
    %c2_75 = arith.constant 2 : index
    %c0_76 = arith.constant 0 : index
    %247 = vector.load %arg6[%c0_74, %c2_75, %c0_76] : memref<2x8x16xf32, #tpu.memory_space<vmem>>, vector<2x1x16xf32>
    %248 = vector.shape_cast %247 : vector<2x1x16xf32> to vector<2x16xf32>
    %249 = vector.shape_cast %246 : vector<2x16xf32> to vector<2x1x16xf32>
    tpu.vector_store %arg6[%c0_74, %c2_75, %c0_76], %249 {strides = array<i32>} : memref<2x8x16xf32, #tpu.memory_space<vmem>>, vector<2x1x16xf32>,
    %c1_i32_77 = arith.constant 1 : i32
    %250 = arith.subi %c1_i32_77, %arg0 : i32
    %c8_i32_78 = arith.constant 8 : i32
    %251 = arith.muli %250, %c8_i32_78 : i32
    %c5_i32 = arith.constant 5 : i32
    %252 = arith.addi %251, %c5_i32 : i32
    %c0_79 = arith.constant 0 : index
    %c5 = arith.constant 5 : index
    %c0_80 = arith.constant 0 : index
    %253 = vector.load %arg3[%c0_79, %c5, %c0_80] : memref<2x8x64xf32, #tpu.memory_space<vmem>>, vector<2x1x64xf32>
    %254 = vector.shape_cast %253 : vector<2x1x64xf32> to vector<2x64xf32>
    %255 = arith.truncf %191 : vector<2x16xf32> to vector<2x16xbf16>
    %c0_81 = arith.constant 0 : index
    %c0_82 = arith.constant 0 : index
    %256 = vector.load %arg5[%c0_81, %c0_82] : memref<16x64xbf16, #tpu.memory_space<vmem>>, vector<16x64xbf16>
    %cst_83 = arith.constant dense<0.000000e+00> : vector<2x64xf32>
    %257 = tpu.matmul %255, %256, %cst_83 {dimension_numbers = #tpu.dot_dimension_numbers<[1], [0], [0], [1], [0, 0, 1, 1], [], []>} : vector<2x16xbf16>, vector<16x64xbf16>, vector<2x64xf32> -> vector<2x64xf32>
    %258 = arith.addf %254, %257 : vector<2x64xf32>
    %259 = vector.extract_strided_slice %258 {offsets = [0, 0], sizes = [2, 16], strides = [1, 1]} : vector<2x64xf32> to vector<2x16xf32>
    %260 = arith.negf %259 : vector<2x16xf32>
    %261 = math.exp %260 : vector<2x16xf32>
    %cst_84 = arith.constant 1.000000e+00 : f32
    %262 = vector.broadcast %cst_84 : f32 to vector<2x16xf32>
    %263 = arith.addf %262, %261 : vector<2x16xf32>
    %264 = arith.divf %262, %263 : vector<2x16xf32>
    %265 = vector.extract_strided_slice %258 {offsets = [0, 16], sizes = [2, 16], strides = [1, 1]} : vector<2x64xf32> to vector<2x16xf32>
    %266 = arith.negf %265 : vector<2x16xf32>
    %267 = math.exp %266 : vector<2x16xf32>
    %cst_85 = arith.constant 1.000000e+00 : f32
    %268 = vector.broadcast %cst_85 : f32 to vector<2x16xf32>
    %269 = arith.addf %268, %267 : vector<2x16xf32>
    %270 = arith.divf %268, %269 : vector<2x16xf32>
    %271 = vector.extract_strided_slice %258 {offsets = [0, 32], sizes = [2, 16], strides = [1, 1]} : vector<2x64xf32> to vector<2x16xf32>
    %272 = math.tanh %271 : vector<2x16xf32>
    %273 = vector.extract_strided_slice %258 {offsets = [0, 48], sizes = [2, 16], strides = [1, 1]} : vector<2x64xf32> to vector<2x16xf32>
    %274 = arith.negf %273 : vector<2x16xf32>
    %275 = math.exp %274 : vector<2x16xf32>
    %cst_86 = arith.constant 1.000000e+00 : f32
    %276 = vector.broadcast %cst_86 : f32 to vector<2x16xf32>
    %277 = arith.addf %276, %275 : vector<2x16xf32>
    %278 = arith.divf %276, %277 : vector<2x16xf32>
    %279 = arith.mulf %270, %194 : vector<2x16xf32>
    %280 = arith.mulf %264, %272 : vector<2x16xf32>
    %281 = arith.addf %279, %280 : vector<2x16xf32>
    %282 = math.tanh %281 : vector<2x16xf32>
    %283 = arith.mulf %278, %282 : vector<2x16xf32>
    %284 = vector.broadcast %252 : i32 to vector<2x1xi32>
    %285 = arith.cmpi slt, %284, %3 : vector<2x1xi32>
    %286 = vector.shape_cast %285 : vector<2x1xi1> to vector<2x1xi1>
    %287 = vector.broadcast %286 : vector<2x1xi1> to vector<2x16xi1>
    %288 = arith.select %287, %283, %191 : vector<2x16xi1>, vector<2x16xf32>
    %289 = vector.shape_cast %285 : vector<2x1xi1> to vector<2x1xi1>
    %290 = vector.broadcast %289 : vector<2x1xi1> to vector<2x16xi1>
    %291 = arith.select %290, %281, %194 : vector<2x16xi1>, vector<2x16xf32>
    %cst_87 = arith.constant 0.000000e+00 : f32
    %292 = vector.shape_cast %285 : vector<2x1xi1> to vector<2x1xi1>
    %293 = vector.broadcast %292 : vector<2x1xi1> to vector<2x16xi1>
    %294 = vector.broadcast %cst_87 : f32 to vector<2x16xf32>
    %295 = arith.select %293, %283, %294 : vector<2x16xi1>, vector<2x16xf32>
    %c0_88 = arith.constant 0 : index
    %c5_89 = arith.constant 5 : index
    %c0_90 = arith.constant 0 : index
    %296 = vector.load %arg7[%c0_88, %c5_89, %c0_90] : memref<2x8x16xf32, #tpu.memory_space<vmem>>, vector<2x1x16xf32>
    %297 = vector.shape_cast %296 : vector<2x1x16xf32> to vector<2x16xf32>
    %298 = vector.shape_cast %295 : vector<2x16xf32> to vector<2x1x16xf32>
    tpu.vector_store %arg7[%c0_88, %c5_89, %c0_90], %298 {strides = array<i32>} : memref<2x8x16xf32, #tpu.memory_space<vmem>>, vector<2x1x16xf32>,
    %c8_i32_91 = arith.constant 8 : i32
    %299 = arith.muli %arg0, %c8_i32_91 : i32
    %c3_i32 = arith.constant 3 : i32
    %300 = arith.addi %299, %c3_i32 : i32
    %c0_92 = arith.constant 0 : index
    %c3 = arith.constant 3 : index
    %c0_93 = arith.constant 0 : index
    %301 = vector.load %arg2[%c0_92, %c3, %c0_93] : memref<2x8x64xf32, #tpu.memory_space<vmem>>, vector<2x1x64xf32>
    %302 = vector.shape_cast %301 : vector<2x1x64xf32> to vector<2x64xf32>
    %303 = arith.truncf %239 : vector<2x16xf32> to vector<2x16xbf16>
    %c0_94 = arith.constant 0 : index
    %c0_95 = arith.constant 0 : index
    %304 = vector.load %arg4[%c0_94, %c0_95] : memref<16x64xbf16, #tpu.memory_space<vmem>>, vector<16x64xbf16>
    %cst_96 = arith.constant dense<0.000000e+00> : vector<2x64xf32>
    %305 = tpu.matmul %303, %304, %cst_96 {dimension_numbers = #tpu.dot_dimension_numbers<[1], [0], [0], [1], [0, 0, 1, 1], [], []>} : vector<2x16xbf16>, vector<16x64xbf16>, vector<2x64xf32> -> vector<2x64xf32>
    %306 = arith.addf %302, %305 : vector<2x64xf32>
    %307 = vector.extract_strided_slice %306 {offsets = [0, 0], sizes = [2, 16], strides = [1, 1]} : vector<2x64xf32> to vector<2x16xf32>
    %308 = arith.negf %307 : vector<2x16xf32>
    %309 = math.exp %308 : vector<2x16xf32>
    %cst_97 = arith.constant 1.000000e+00 : f32
    %310 = vector.broadcast %cst_97 : f32 to vector<2x16xf32>
    %311 = arith.addf %310, %309 : vector<2x16xf32>
    %312 = arith.divf %310, %311 : vector<2x16xf32>
    %313 = vector.extract_strided_slice %306 {offsets = [0, 16], sizes = [2, 16], strides = [1, 1]} : vector<2x64xf32> to vector<2x16xf32>
    %314 = arith.negf %313 : vector<2x16xf32>
    %315 = math.exp %314 : vector<2x16xf32>
    %cst_98 = arith.constant 1.000000e+00 : f32
    %316 = vector.broadcast %cst_98 : f32 to vector<2x16xf32>
    %317 = arith.addf %316, %315 : vector<2x16xf32>
    %318 = arith.divf %316, %317 : vector<2x16xf32>
    %319 = vector.extract_strided_slice %306 {offsets = [0, 32], sizes = [2, 16], strides = [1, 1]} : vector<2x64xf32> to vector<2x16xf32>
    %320 = math.tanh %319 : vector<2x16xf32>
    %321 = vector.extract_strided_slice %306 {offsets = [0, 48], sizes = [2, 16], strides = [1, 1]} : vector<2x64xf32> to vector<2x16xf32>
    %322 = arith.negf %321 : vector<2x16xf32>
    %323 = math.exp %322 : vector<2x16xf32>
    %cst_99 = arith.constant 1.000000e+00 : f32
    %324 = vector.broadcast %cst_99 : f32 to vector<2x16xf32>
    %325 = arith.addf %324, %323 : vector<2x16xf32>
    %326 = arith.divf %324, %325 : vector<2x16xf32>
    %327 = arith.mulf %318, %242 : vector<2x16xf32>
    %328 = arith.mulf %312, %320 : vector<2x16xf32>
    %329 = arith.addf %327, %328 : vector<2x16xf32>
    %330 = math.tanh %329 : vector<2x16xf32>
    %331 = arith.mulf %326, %330 : vector<2x16xf32>
    %332 = vector.broadcast %300 : i32 to vector<2x1xi32>
    %333 = arith.cmpi slt, %332, %3 : vector<2x1xi32>
    %334 = vector.shape_cast %333 : vector<2x1xi1> to vector<2x1xi1>
    %335 = vector.broadcast %334 : vector<2x1xi1> to vector<2x16xi1>
    %336 = arith.select %335, %331, %239 : vector<2x16xi1>, vector<2x16xf32>
    %337 = vector.shape_cast %333 : vector<2x1xi1> to vector<2x1xi1>
    %338 = vector.broadcast %337 : vector<2x1xi1> to vector<2x16xi1>
    %339 = arith.select %338, %329, %242 : vector<2x16xi1>, vector<2x16xf32>
    %cst_100 = arith.constant 0.000000e+00 : f32
    %340 = vector.shape_cast %333 : vector<2x1xi1> to vector<2x1xi1>
    %341 = vector.broadcast %340 : vector<2x1xi1> to vector<2x16xi1>
    %342 = vector.broadcast %cst_100 : f32 to vector<2x16xf32>
    %343 = arith.select %341, %331, %342 : vector<2x16xi1>, vector<2x16xf32>
    %c0_101 = arith.constant 0 : index
    %c3_102 = arith.constant 3 : index
    %c0_103 = arith.constant 0 : index
    %344 = vector.load %arg6[%c0_101, %c3_102, %c0_103] : memref<2x8x16xf32, #tpu.memory_space<vmem>>, vector<2x1x16xf32>
    %345 = vector.shape_cast %344 : vector<2x1x16xf32> to vector<2x16xf32>
    %346 = vector.shape_cast %343 : vector<2x16xf32> to vector<2x1x16xf32>
    tpu.vector_store %arg6[%c0_101, %c3_102, %c0_103], %346 {strides = array<i32>} : memref<2x8x16xf32, #tpu.memory_space<vmem>>, vector<2x1x16xf32>,
    %c1_i32_104 = arith.constant 1 : i32
    %347 = arith.subi %c1_i32_104, %arg0 : i32
    %c8_i32_105 = arith.constant 8 : i32
    %348 = arith.muli %347, %c8_i32_105 : i32
    %c4_i32 = arith.constant 4 : i32
    %349 = arith.addi %348, %c4_i32 : i32
    %c0_106 = arith.constant 0 : index
    %c4 = arith.constant 4 : index
    %c0_107 = arith.constant 0 : index
    %350 = vector.load %arg3[%c0_106, %c4, %c0_107] : memref<2x8x64xf32, #tpu.memory_space<vmem>>, vector<2x1x64xf32>
    %351 = vector.shape_cast %350 : vector<2x1x64xf32> to vector<2x64xf32>
    %352 = arith.truncf %288 : vector<2x16xf32> to vector<2x16xbf16>
    %c0_108 = arith.constant 0 : index
    %c0_109 = arith.constant 0 : index
    %353 = vector.load %arg5[%c0_108, %c0_109] : memref<16x64xbf16, #tpu.memory_space<vmem>>, vector<16x64xbf16>
    %cst_110 = arith.constant dense<0.000000e+00> : vector<2x64xf32>
    %354 = tpu.matmul %352, %353, %cst_110 {dimension_numbers = #tpu.dot_dimension_numbers<[1], [0], [0], [1], [0, 0, 1, 1], [], []>} : vector<2x16xbf16>, vector<16x64xbf16>, vector<2x64xf32> -> vector<2x64xf32>
    %355 = arith.addf %351, %354 : vector<2x64xf32>
    %356 = vector.extract_strided_slice %355 {offsets = [0, 0], sizes = [2, 16], strides = [1, 1]} : vector<2x64xf32> to vector<2x16xf32>
    %357 = arith.negf %356 : vector<2x16xf32>
    %358 = math.exp %357 : vector<2x16xf32>
    %cst_111 = arith.constant 1.000000e+00 : f32
    %359 = vector.broadcast %cst_111 : f32 to vector<2x16xf32>
    %360 = arith.addf %359, %358 : vector<2x16xf32>
    %361 = arith.divf %359, %360 : vector<2x16xf32>
    %362 = vector.extract_strided_slice %355 {offsets = [0, 16], sizes = [2, 16], strides = [1, 1]} : vector<2x64xf32> to vector<2x16xf32>
    %363 = arith.negf %362 : vector<2x16xf32>
    %364 = math.exp %363 : vector<2x16xf32>
    %cst_112 = arith.constant 1.000000e+00 : f32
    %365 = vector.broadcast %cst_112 : f32 to vector<2x16xf32>
    %366 = arith.addf %365, %364 : vector<2x16xf32>
    %367 = arith.divf %365, %366 : vector<2x16xf32>
    %368 = vector.extract_strided_slice %355 {offsets = [0, 32], sizes = [2, 16], strides = [1, 1]} : vector<2x64xf32> to vector<2x16xf32>
    %369 = math.tanh %368 : vector<2x16xf32>
    %370 = vector.extract_strided_slice %355 {offsets = [0, 48], sizes = [2, 16], strides = [1, 1]} : vector<2x64xf32> to vector<2x16xf32>
    %371 = arith.negf %370 : vector<2x16xf32>
    %372 = math.exp %371 : vector<2x16xf32>
    %cst_113 = arith.constant 1.000000e+00 : f32
    %373 = vector.broadcast %cst_113 : f32 to vector<2x16xf32>
    %374 = arith.addf %373, %372 : vector<2x16xf32>
    %375 = arith.divf %373, %374 : vector<2x16xf32>
    %376 = arith.mulf %367, %291 : vector<2x16xf32>
    %377 = arith.mulf %361, %369 : vector<2x16xf32>
    %378 = arith.addf %376, %377 : vector<2x16xf32>
    %379 = math.tanh %378 : vector<2x16xf32>
    %380 = arith.mulf %375, %379 : vector<2x16xf32>
    %381 = vector.broadcast %349 : i32 to vector<2x1xi32>
    %382 = arith.cmpi slt, %381, %3 : vector<2x1xi32>
    %383 = vector.shape_cast %382 : vector<2x1xi1> to vector<2x1xi1>
    %384 = vector.broadcast %383 : vector<2x1xi1> to vector<2x16xi1>
    %385 = arith.select %384, %380, %288 : vector<2x16xi1>, vector<2x16xf32>
    %386 = vector.shape_cast %382 : vector<2x1xi1> to vector<2x1xi1>
    %387 = vector.broadcast %386 : vector<2x1xi1> to vector<2x16xi1>
    %388 = arith.select %387, %378, %291 : vector<2x16xi1>, vector<2x16xf32>
    %cst_114 = arith.constant 0.000000e+00 : f32
    %389 = vector.shape_cast %382 : vector<2x1xi1> to vector<2x1xi1>
    %390 = vector.broadcast %389 : vector<2x1xi1> to vector<2x16xi1>
    %391 = vector.broadcast %cst_114 : f32 to vector<2x16xf32>
    %392 = arith.select %390, %380, %391 : vector<2x16xi1>, vector<2x16xf32>
    %c0_115 = arith.constant 0 : index
    %c4_116 = arith.constant 4 : index
    %c0_117 = arith.constant 0 : index
    %393 = vector.load %arg7[%c0_115, %c4_116, %c0_117] : memref<2x8x16xf32, #tpu.memory_space<vmem>>, vector<2x1x16xf32>
    %394 = vector.shape_cast %393 : vector<2x1x16xf32> to vector<2x16xf32>
    %395 = vector.shape_cast %392 : vector<2x16xf32> to vector<2x1x16xf32>
    tpu.vector_store %arg7[%c0_115, %c4_116, %c0_117], %395 {strides = array<i32>} : memref<2x8x16xf32, #tpu.memory_space<vmem>>, vector<2x1x16xf32>,
    %c8_i32_118 = arith.constant 8 : i32
    %396 = arith.muli %arg0, %c8_i32_118 : i32
    %c4_i32_119 = arith.constant 4 : i32
    %397 = arith.addi %396, %c4_i32_119 : i32
    %c0_120 = arith.constant 0 : index
    %c4_121 = arith.constant 4 : index
    %c0_122 = arith.constant 0 : index
    %398 = vector.load %arg2[%c0_120, %c4_121, %c0_122] : memref<2x8x64xf32, #tpu.memory_space<vmem>>, vector<2x1x64xf32>
    %399 = vector.shape_cast %398 : vector<2x1x64xf32> to vector<2x64xf32>
    %400 = arith.truncf %336 : vector<2x16xf32> to vector<2x16xbf16>
    %c0_123 = arith.constant 0 : index
    %c0_124 = arith.constant 0 : index
    %401 = vector.load %arg4[%c0_123, %c0_124] : memref<16x64xbf16, #tpu.memory_space<vmem>>, vector<16x64xbf16>
    %cst_125 = arith.constant dense<0.000000e+00> : vector<2x64xf32>
    %402 = tpu.matmul %400, %401, %cst_125 {dimension_numbers = #tpu.dot_dimension_numbers<[1], [0], [0], [1], [0, 0, 1, 1], [], []>} : vector<2x16xbf16>, vector<16x64xbf16>, vector<2x64xf32> -> vector<2x64xf32>
    %403 = arith.addf %399, %402 : vector<2x64xf32>
    %404 = vector.extract_strided_slice %403 {offsets = [0, 0], sizes = [2, 16], strides = [1, 1]} : vector<2x64xf32> to vector<2x16xf32>
    %405 = arith.negf %404 : vector<2x16xf32>
    %406 = math.exp %405 : vector<2x16xf32>
    %cst_126 = arith.constant 1.000000e+00 : f32
    %407 = vector.broadcast %cst_126 : f32 to vector<2x16xf32>
    %408 = arith.addf %407, %406 : vector<2x16xf32>
    %409 = arith.divf %407, %408 : vector<2x16xf32>
    %410 = vector.extract_strided_slice %403 {offsets = [0, 16], sizes = [2, 16], strides = [1, 1]} : vector<2x64xf32> to vector<2x16xf32>
    %411 = arith.negf %410 : vector<2x16xf32>
    %412 = math.exp %411 : vector<2x16xf32>
    %cst_127 = arith.constant 1.000000e+00 : f32
    %413 = vector.broadcast %cst_127 : f32 to vector<2x16xf32>
    %414 = arith.addf %413, %412 : vector<2x16xf32>
    %415 = arith.divf %413, %414 : vector<2x16xf32>
    %416 = vector.extract_strided_slice %403 {offsets = [0, 32], sizes = [2, 16], strides = [1, 1]} : vector<2x64xf32> to vector<2x16xf32>
    %417 = math.tanh %416 : vector<2x16xf32>
    %418 = vector.extract_strided_slice %403 {offsets = [0, 48], sizes = [2, 16], strides = [1, 1]} : vector<2x64xf32> to vector<2x16xf32>
    %419 = arith.negf %418 : vector<2x16xf32>
    %420 = math.exp %419 : vector<2x16xf32>
    %cst_128 = arith.constant 1.000000e+00 : f32
    %421 = vector.broadcast %cst_128 : f32 to vector<2x16xf32>
    %422 = arith.addf %421, %420 : vector<2x16xf32>
    %423 = arith.divf %421, %422 : vector<2x16xf32>
    %424 = arith.mulf %415, %339 : vector<2x16xf32>
    %425 = arith.mulf %409, %417 : vector<2x16xf32>
    %426 = arith.addf %424, %425 : vector<2x16xf32>
    %427 = math.tanh %426 : vector<2x16xf32>
    %428 = arith.mulf %423, %427 : vector<2x16xf32>
    %429 = vector.broadcast %397 : i32 to vector<2x1xi32>
    %430 = arith.cmpi slt, %429, %3 : vector<2x1xi32>
    %431 = vector.shape_cast %430 : vector<2x1xi1> to vector<2x1xi1>
    %432 = vector.broadcast %431 : vector<2x1xi1> to vector<2x16xi1>
    %433 = arith.select %432, %428, %336 : vector<2x16xi1>, vector<2x16xf32>
    %434 = vector.shape_cast %430 : vector<2x1xi1> to vector<2x1xi1>
    %435 = vector.broadcast %434 : vector<2x1xi1> to vector<2x16xi1>
    %436 = arith.select %435, %426, %339 : vector<2x16xi1>, vector<2x16xf32>
    %cst_129 = arith.constant 0.000000e+00 : f32
    %437 = vector.shape_cast %430 : vector<2x1xi1> to vector<2x1xi1>
    %438 = vector.broadcast %437 : vector<2x1xi1> to vector<2x16xi1>
    %439 = vector.broadcast %cst_129 : f32 to vector<2x16xf32>
    %440 = arith.select %438, %428, %439 : vector<2x16xi1>, vector<2x16xf32>
    %c0_130 = arith.constant 0 : index
    %c4_131 = arith.constant 4 : index
    %c0_132 = arith.constant 0 : index
    %441 = vector.load %arg6[%c0_130, %c4_131, %c0_132] : memref<2x8x16xf32, #tpu.memory_space<vmem>>, vector<2x1x16xf32>
    %442 = vector.shape_cast %441 : vector<2x1x16xf32> to vector<2x16xf32>
    %443 = vector.shape_cast %440 : vector<2x16xf32> to vector<2x1x16xf32>
    tpu.vector_store %arg6[%c0_130, %c4_131, %c0_132], %443 {strides = array<i32>} : memref<2x8x16xf32, #tpu.memory_space<vmem>>, vector<2x1x16xf32>,
    %c1_i32_133 = arith.constant 1 : i32
    %444 = arith.subi %c1_i32_133, %arg0 : i32
    %c8_i32_134 = arith.constant 8 : i32
    %445 = arith.muli %444, %c8_i32_134 : i32
    %c3_i32_135 = arith.constant 3 : i32
    %446 = arith.addi %445, %c3_i32_135 : i32
    %c0_136 = arith.constant 0 : index
    %c3_137 = arith.constant 3 : index
    %c0_138 = arith.constant 0 : index
    %447 = vector.load %arg3[%c0_136, %c3_137, %c0_138] : memref<2x8x64xf32, #tpu.memory_space<vmem>>, vector<2x1x64xf32>
    %448 = vector.shape_cast %447 : vector<2x1x64xf32> to vector<2x64xf32>
    %449 = arith.truncf %385 : vector<2x16xf32> to vector<2x16xbf16>
    %c0_139 = arith.constant 0 : index
    %c0_140 = arith.constant 0 : index
    %450 = vector.load %arg5[%c0_139, %c0_140] : memref<16x64xbf16, #tpu.memory_space<vmem>>, vector<16x64xbf16>
    %cst_141 = arith.constant dense<0.000000e+00> : vector<2x64xf32>
    %451 = tpu.matmul %449, %450, %cst_141 {dimension_numbers = #tpu.dot_dimension_numbers<[1], [0], [0], [1], [0, 0, 1, 1], [], []>} : vector<2x16xbf16>, vector<16x64xbf16>, vector<2x64xf32> -> vector<2x64xf32>
    %452 = arith.addf %448, %451 : vector<2x64xf32>
    %453 = vector.extract_strided_slice %452 {offsets = [0, 0], sizes = [2, 16], strides = [1, 1]} : vector<2x64xf32> to vector<2x16xf32>
    %454 = arith.negf %453 : vector<2x16xf32>
    %455 = math.exp %454 : vector<2x16xf32>
    %cst_142 = arith.constant 1.000000e+00 : f32
    %456 = vector.broadcast %cst_142 : f32 to vector<2x16xf32>
    %457 = arith.addf %456, %455 : vector<2x16xf32>
    %458 = arith.divf %456, %457 : vector<2x16xf32>
    %459 = vector.extract_strided_slice %452 {offsets = [0, 16], sizes = [2, 16], strides = [1, 1]} : vector<2x64xf32> to vector<2x16xf32>
    %460 = arith.negf %459 : vector<2x16xf32>
    %461 = math.exp %460 : vector<2x16xf32>
    %cst_143 = arith.constant 1.000000e+00 : f32
    %462 = vector.broadcast %cst_143 : f32 to vector<2x16xf32>
    %463 = arith.addf %462, %461 : vector<2x16xf32>
    %464 = arith.divf %462, %463 : vector<2x16xf32>
    %465 = vector.extract_strided_slice %452 {offsets = [0, 32], sizes = [2, 16], strides = [1, 1]} : vector<2x64xf32> to vector<2x16xf32>
    %466 = math.tanh %465 : vector<2x16xf32>
    %467 = vector.extract_strided_slice %452 {offsets = [0, 48], sizes = [2, 16], strides = [1, 1]} : vector<2x64xf32> to vector<2x16xf32>
    %468 = arith.negf %467 : vector<2x16xf32>
    %469 = math.exp %468 : vector<2x16xf32>
    %cst_144 = arith.constant 1.000000e+00 : f32
    %470 = vector.broadcast %cst_144 : f32 to vector<2x16xf32>
    %471 = arith.addf %470, %469 : vector<2x16xf32>
    %472 = arith.divf %470, %471 : vector<2x16xf32>
    %473 = arith.mulf %464, %388 : vector<2x16xf32>
    %474 = arith.mulf %458, %466 : vector<2x16xf32>
    %475 = arith.addf %473, %474 : vector<2x16xf32>
    %476 = math.tanh %475 : vector<2x16xf32>
    %477 = arith.mulf %472, %476 : vector<2x16xf32>
    %478 = vector.broadcast %446 : i32 to vector<2x1xi32>
    %479 = arith.cmpi slt, %478, %3 : vector<2x1xi32>
    %480 = vector.shape_cast %479 : vector<2x1xi1> to vector<2x1xi1>
    %481 = vector.broadcast %480 : vector<2x1xi1> to vector<2x16xi1>
    %482 = arith.select %481, %477, %385 : vector<2x16xi1>, vector<2x16xf32>
    %483 = vector.shape_cast %479 : vector<2x1xi1> to vector<2x1xi1>
    %484 = vector.broadcast %483 : vector<2x1xi1> to vector<2x16xi1>
    %485 = arith.select %484, %475, %388 : vector<2x16xi1>, vector<2x16xf32>
    %cst_145 = arith.constant 0.000000e+00 : f32
    %486 = vector.shape_cast %479 : vector<2x1xi1> to vector<2x1xi1>
    %487 = vector.broadcast %486 : vector<2x1xi1> to vector<2x16xi1>
    %488 = vector.broadcast %cst_145 : f32 to vector<2x16xf32>
    %489 = arith.select %487, %477, %488 : vector<2x16xi1>, vector<2x16xf32>
    %c0_146 = arith.constant 0 : index
    %c3_147 = arith.constant 3 : index
    %c0_148 = arith.constant 0 : index
    %490 = vector.load %arg7[%c0_146, %c3_147, %c0_148] : memref<2x8x16xf32, #tpu.memory_space<vmem>>, vector<2x1x16xf32>
    %491 = vector.shape_cast %490 : vector<2x1x16xf32> to vector<2x16xf32>
    %492 = vector.shape_cast %489 : vector<2x16xf32> to vector<2x1x16xf32>
    tpu.vector_store %arg7[%c0_146, %c3_147, %c0_148], %492 {strides = array<i32>} : memref<2x8x16xf32, #tpu.memory_space<vmem>>, vector<2x1x16xf32>,
    %c8_i32_149 = arith.constant 8 : i32
    %493 = arith.muli %arg0, %c8_i32_149 : i32
    %c5_i32_150 = arith.constant 5 : i32
    %494 = arith.addi %493, %c5_i32_150 : i32
    %c0_151 = arith.constant 0 : index
    %c5_152 = arith.constant 5 : index
    %c0_153 = arith.constant 0 : index
    %495 = vector.load %arg2[%c0_151, %c5_152, %c0_153] : memref<2x8x64xf32, #tpu.memory_space<vmem>>, vector<2x1x64xf32>
    %496 = vector.shape_cast %495 : vector<2x1x64xf32> to vector<2x64xf32>
    %497 = arith.truncf %433 : vector<2x16xf32> to vector<2x16xbf16>
    %c0_154 = arith.constant 0 : index
    %c0_155 = arith.constant 0 : index
    %498 = vector.load %arg4[%c0_154, %c0_155] : memref<16x64xbf16, #tpu.memory_space<vmem>>, vector<16x64xbf16>
    %cst_156 = arith.constant dense<0.000000e+00> : vector<2x64xf32>
    %499 = tpu.matmul %497, %498, %cst_156 {dimension_numbers = #tpu.dot_dimension_numbers<[1], [0], [0], [1], [0, 0, 1, 1], [], []>} : vector<2x16xbf16>, vector<16x64xbf16>, vector<2x64xf32> -> vector<2x64xf32>
    %500 = arith.addf %496, %499 : vector<2x64xf32>
    %501 = vector.extract_strided_slice %500 {offsets = [0, 0], sizes = [2, 16], strides = [1, 1]} : vector<2x64xf32> to vector<2x16xf32>
    %502 = arith.negf %501 : vector<2x16xf32>
    %503 = math.exp %502 : vector<2x16xf32>
    %cst_157 = arith.constant 1.000000e+00 : f32
    %504 = vector.broadcast %cst_157 : f32 to vector<2x16xf32>
    %505 = arith.addf %504, %503 : vector<2x16xf32>
    %506 = arith.divf %504, %505 : vector<2x16xf32>
    %507 = vector.extract_strided_slice %500 {offsets = [0, 16], sizes = [2, 16], strides = [1, 1]} : vector<2x64xf32> to vector<2x16xf32>
    %508 = arith.negf %507 : vector<2x16xf32>
    %509 = math.exp %508 : vector<2x16xf32>
    %cst_158 = arith.constant 1.000000e+00 : f32
    %510 = vector.broadcast %cst_158 : f32 to vector<2x16xf32>
    %511 = arith.addf %510, %509 : vector<2x16xf32>
    %512 = arith.divf %510, %511 : vector<2x16xf32>
    %513 = vector.extract_strided_slice %500 {offsets = [0, 32], sizes = [2, 16], strides = [1, 1]} : vector<2x64xf32> to vector<2x16xf32>
    %514 = math.tanh %513 : vector<2x16xf32>
    %515 = vector.extract_strided_slice %500 {offsets = [0, 48], sizes = [2, 16], strides = [1, 1]} : vector<2x64xf32> to vector<2x16xf32>
    %516 = arith.negf %515 : vector<2x16xf32>
    %517 = math.exp %516 : vector<2x16xf32>
    %cst_159 = arith.constant 1.000000e+00 : f32
    %518 = vector.broadcast %cst_159 : f32 to vector<2x16xf32>
    %519 = arith.addf %518, %517 : vector<2x16xf32>
    %520 = arith.divf %518, %519 : vector<2x16xf32>
    %521 = arith.mulf %512, %436 : vector<2x16xf32>
    %522 = arith.mulf %506, %514 : vector<2x16xf32>
    %523 = arith.addf %521, %522 : vector<2x16xf32>
    %524 = math.tanh %523 : vector<2x16xf32>
    %525 = arith.mulf %520, %524 : vector<2x16xf32>
    %526 = vector.broadcast %494 : i32 to vector<2x1xi32>
    %527 = arith.cmpi slt, %526, %3 : vector<2x1xi32>
    %528 = vector.shape_cast %527 : vector<2x1xi1> to vector<2x1xi1>
    %529 = vector.broadcast %528 : vector<2x1xi1> to vector<2x16xi1>
    %530 = arith.select %529, %525, %433 : vector<2x16xi1>, vector<2x16xf32>
    %531 = vector.shape_cast %527 : vector<2x1xi1> to vector<2x1xi1>
    %532 = vector.broadcast %531 : vector<2x1xi1> to vector<2x16xi1>
    %533 = arith.select %532, %523, %436 : vector<2x16xi1>, vector<2x16xf32>
    %cst_160 = arith.constant 0.000000e+00 : f32
    %534 = vector.shape_cast %527 : vector<2x1xi1> to vector<2x1xi1>
    %535 = vector.broadcast %534 : vector<2x1xi1> to vector<2x16xi1>
    %536 = vector.broadcast %cst_160 : f32 to vector<2x16xf32>
    %537 = arith.select %535, %525, %536 : vector<2x16xi1>, vector<2x16xf32>
    %c0_161 = arith.constant 0 : index
    %c5_162 = arith.constant 5 : index
    %c0_163 = arith.constant 0 : index
    %538 = vector.load %arg6[%c0_161, %c5_162, %c0_163] : memref<2x8x16xf32, #tpu.memory_space<vmem>>, vector<2x1x16xf32>
    %539 = vector.shape_cast %538 : vector<2x1x16xf32> to vector<2x16xf32>
    %540 = vector.shape_cast %537 : vector<2x16xf32> to vector<2x1x16xf32>
    tpu.vector_store %arg6[%c0_161, %c5_162, %c0_163], %540 {strides = array<i32>} : memref<2x8x16xf32, #tpu.memory_space<vmem>>, vector<2x1x16xf32>,
    %c1_i32_164 = arith.constant 1 : i32
    %541 = arith.subi %c1_i32_164, %arg0 : i32
    %c8_i32_165 = arith.constant 8 : i32
    %542 = arith.muli %541, %c8_i32_165 : i32
    %c2_i32_166 = arith.constant 2 : i32
    %543 = arith.addi %542, %c2_i32_166 : i32
    %c0_167 = arith.constant 0 : index
    %c2_168 = arith.constant 2 : index
    %c0_169 = arith.constant 0 : index
    %544 = vector.load %arg3[%c0_167, %c2_168, %c0_169] : memref<2x8x64xf32, #tpu.memory_space<vmem>>, vector<2x1x64xf32>
    %545 = vector.shape_cast %544 : vector<2x1x64xf32> to vector<2x64xf32>
    %546 = arith.truncf %482 : vector<2x16xf32> to vector<2x16xbf16>
    %c0_170 = arith.constant 0 : index
    %c0_171 = arith.constant 0 : index
    %547 = vector.load %arg5[%c0_170, %c0_171] : memref<16x64xbf16, #tpu.memory_space<vmem>>, vector<16x64xbf16>
    %cst_172 = arith.constant dense<0.000000e+00> : vector<2x64xf32>
    %548 = tpu.matmul %546, %547, %cst_172 {dimension_numbers = #tpu.dot_dimension_numbers<[1], [0], [0], [1], [0, 0, 1, 1], [], []>} : vector<2x16xbf16>, vector<16x64xbf16>, vector<2x64xf32> -> vector<2x64xf32>
    %549 = arith.addf %545, %548 : vector<2x64xf32>
    %550 = vector.extract_strided_slice %549 {offsets = [0, 0], sizes = [2, 16], strides = [1, 1]} : vector<2x64xf32> to vector<2x16xf32>
    %551 = arith.negf %550 : vector<2x16xf32>
    %552 = math.exp %551 : vector<2x16xf32>
    %cst_173 = arith.constant 1.000000e+00 : f32
    %553 = vector.broadcast %cst_173 : f32 to vector<2x16xf32>
    %554 = arith.addf %553, %552 : vector<2x16xf32>
    %555 = arith.divf %553, %554 : vector<2x16xf32>
    %556 = vector.extract_strided_slice %549 {offsets = [0, 16], sizes = [2, 16], strides = [1, 1]} : vector<2x64xf32> to vector<2x16xf32>
    %557 = arith.negf %556 : vector<2x16xf32>
    %558 = math.exp %557 : vector<2x16xf32>
    %cst_174 = arith.constant 1.000000e+00 : f32
    %559 = vector.broadcast %cst_174 : f32 to vector<2x16xf32>
    %560 = arith.addf %559, %558 : vector<2x16xf32>
    %561 = arith.divf %559, %560 : vector<2x16xf32>
    %562 = vector.extract_strided_slice %549 {offsets = [0, 32], sizes = [2, 16], strides = [1, 1]} : vector<2x64xf32> to vector<2x16xf32>
    %563 = math.tanh %562 : vector<2x16xf32>
    %564 = vector.extract_strided_slice %549 {offsets = [0, 48], sizes = [2, 16], strides = [1, 1]} : vector<2x64xf32> to vector<2x16xf32>
    %565 = arith.negf %564 : vector<2x16xf32>
    %566 = math.exp %565 : vector<2x16xf32>
    %cst_175 = arith.constant 1.000000e+00 : f32
    %567 = vector.broadcast %cst_175 : f32 to vector<2x16xf32>
    %568 = arith.addf %567, %566 : vector<2x16xf32>
    %569 = arith.divf %567, %568 : vector<2x16xf32>
    %570 = arith.mulf %561, %485 : vector<2x16xf32>
    %571 = arith.mulf %555, %563 : vector<2x16xf32>
    %572 = arith.addf %570, %571 : vector<2x16xf32>
    %573 = math.tanh %572 : vector<2x16xf32>
    %574 = arith.mulf %569, %573 : vector<2x16xf32>
    %575 = vector.broadcast %543 : i32 to vector<2x1xi32>
    %576 = arith.cmpi slt, %575, %3 : vector<2x1xi32>
    %577 = vector.shape_cast %576 : vector<2x1xi1> to vector<2x1xi1>
    %578 = vector.broadcast %577 : vector<2x1xi1> to vector<2x16xi1>
    %579 = arith.select %578, %574, %482 : vector<2x16xi1>, vector<2x16xf32>
    %580 = vector.shape_cast %576 : vector<2x1xi1> to vector<2x1xi1>
    %581 = vector.broadcast %580 : vector<2x1xi1> to vector<2x16xi1>
    %582 = arith.select %581, %572, %485 : vector<2x16xi1>, vector<2x16xf32>
    %cst_176 = arith.constant 0.000000e+00 : f32
    %583 = vector.shape_cast %576 : vector<2x1xi1> to vector<2x1xi1>
    %584 = vector.broadcast %583 : vector<2x1xi1> to vector<2x16xi1>
    %585 = vector.broadcast %cst_176 : f32 to vector<2x16xf32>
    %586 = arith.select %584, %574, %585 : vector<2x16xi1>, vector<2x16xf32>
    %c0_177 = arith.constant 0 : index
    %c2_178 = arith.constant 2 : index
    %c0_179 = arith.constant 0 : index
    %587 = vector.load %arg7[%c0_177, %c2_178, %c0_179] : memref<2x8x16xf32, #tpu.memory_space<vmem>>, vector<2x1x16xf32>
    %588 = vector.shape_cast %587 : vector<2x1x16xf32> to vector<2x16xf32>
    %589 = vector.shape_cast %586 : vector<2x16xf32> to vector<2x1x16xf32>
    tpu.vector_store %arg7[%c0_177, %c2_178, %c0_179], %589 {strides = array<i32>} : memref<2x8x16xf32, #tpu.memory_space<vmem>>, vector<2x1x16xf32>,
    %c8_i32_180 = arith.constant 8 : i32
    %590 = arith.muli %arg0, %c8_i32_180 : i32
    %c6_i32_181 = arith.constant 6 : i32
    %591 = arith.addi %590, %c6_i32_181 : i32
    %c0_182 = arith.constant 0 : index
    %c6_183 = arith.constant 6 : index
    %c0_184 = arith.constant 0 : index
    %592 = vector.load %arg2[%c0_182, %c6_183, %c0_184] : memref<2x8x64xf32, #tpu.memory_space<vmem>>, vector<2x1x64xf32>
    %593 = vector.shape_cast %592 : vector<2x1x64xf32> to vector<2x64xf32>
    %594 = arith.truncf %530 : vector<2x16xf32> to vector<2x16xbf16>
    %c0_185 = arith.constant 0 : index
    %c0_186 = arith.constant 0 : index
    %595 = vector.load %arg4[%c0_185, %c0_186] : memref<16x64xbf16, #tpu.memory_space<vmem>>, vector<16x64xbf16>
    %cst_187 = arith.constant dense<0.000000e+00> : vector<2x64xf32>
    %596 = tpu.matmul %594, %595, %cst_187 {dimension_numbers = #tpu.dot_dimension_numbers<[1], [0], [0], [1], [0, 0, 1, 1], [], []>} : vector<2x16xbf16>, vector<16x64xbf16>, vector<2x64xf32> -> vector<2x64xf32>
    %597 = arith.addf %593, %596 : vector<2x64xf32>
    %598 = vector.extract_strided_slice %597 {offsets = [0, 0], sizes = [2, 16], strides = [1, 1]} : vector<2x64xf32> to vector<2x16xf32>
    %599 = arith.negf %598 : vector<2x16xf32>
    %600 = math.exp %599 : vector<2x16xf32>
    %cst_188 = arith.constant 1.000000e+00 : f32
    %601 = vector.broadcast %cst_188 : f32 to vector<2x16xf32>
    %602 = arith.addf %601, %600 : vector<2x16xf32>
    %603 = arith.divf %601, %602 : vector<2x16xf32>
    %604 = vector.extract_strided_slice %597 {offsets = [0, 16], sizes = [2, 16], strides = [1, 1]} : vector<2x64xf32> to vector<2x16xf32>
    %605 = arith.negf %604 : vector<2x16xf32>
    %606 = math.exp %605 : vector<2x16xf32>
    %cst_189 = arith.constant 1.000000e+00 : f32
    %607 = vector.broadcast %cst_189 : f32 to vector<2x16xf32>
    %608 = arith.addf %607, %606 : vector<2x16xf32>
    %609 = arith.divf %607, %608 : vector<2x16xf32>
    %610 = vector.extract_strided_slice %597 {offsets = [0, 32], sizes = [2, 16], strides = [1, 1]} : vector<2x64xf32> to vector<2x16xf32>
    %611 = math.tanh %610 : vector<2x16xf32>
    %612 = vector.extract_strided_slice %597 {offsets = [0, 48], sizes = [2, 16], strides = [1, 1]} : vector<2x64xf32> to vector<2x16xf32>
    %613 = arith.negf %612 : vector<2x16xf32>
    %614 = math.exp %613 : vector<2x16xf32>
    %cst_190 = arith.constant 1.000000e+00 : f32
    %615 = vector.broadcast %cst_190 : f32 to vector<2x16xf32>
    %616 = arith.addf %615, %614 : vector<2x16xf32>
    %617 = arith.divf %615, %616 : vector<2x16xf32>
    %618 = arith.mulf %609, %533 : vector<2x16xf32>
    %619 = arith.mulf %603, %611 : vector<2x16xf32>
    %620 = arith.addf %618, %619 : vector<2x16xf32>
    %621 = math.tanh %620 : vector<2x16xf32>
    %622 = arith.mulf %617, %621 : vector<2x16xf32>
    %623 = vector.broadcast %591 : i32 to vector<2x1xi32>
    %624 = arith.cmpi slt, %623, %3 : vector<2x1xi32>
    %625 = vector.shape_cast %624 : vector<2x1xi1> to vector<2x1xi1>
    %626 = vector.broadcast %625 : vector<2x1xi1> to vector<2x16xi1>
    %627 = arith.select %626, %622, %530 : vector<2x16xi1>, vector<2x16xf32>
    %628 = vector.shape_cast %624 : vector<2x1xi1> to vector<2x1xi1>
    %629 = vector.broadcast %628 : vector<2x1xi1> to vector<2x16xi1>
    %630 = arith.select %629, %620, %533 : vector<2x16xi1>, vector<2x16xf32>
    %cst_191 = arith.constant 0.000000e+00 : f32
    %631 = vector.shape_cast %624 : vector<2x1xi1> to vector<2x1xi1>
    %632 = vector.broadcast %631 : vector<2x1xi1> to vector<2x16xi1>
    %633 = vector.broadcast %cst_191 : f32 to vector<2x16xf32>
    %634 = arith.select %632, %622, %633 : vector<2x16xi1>, vector<2x16xf32>
    %c0_192 = arith.constant 0 : index
    %c6_193 = arith.constant 6 : index
    %c0_194 = arith.constant 0 : index
    %635 = vector.load %arg6[%c0_192, %c6_193, %c0_194] : memref<2x8x16xf32, #tpu.memory_space<vmem>>, vector<2x1x16xf32>
    %636 = vector.shape_cast %635 : vector<2x1x16xf32> to vector<2x16xf32>
    %637 = vector.shape_cast %634 : vector<2x16xf32> to vector<2x1x16xf32>
    tpu.vector_store %arg6[%c0_192, %c6_193, %c0_194], %637 {strides = array<i32>} : memref<2x8x16xf32, #tpu.memory_space<vmem>>, vector<2x1x16xf32>,
    %c1_i32_195 = arith.constant 1 : i32
    %638 = arith.subi %c1_i32_195, %arg0 : i32
    %c8_i32_196 = arith.constant 8 : i32
    %639 = arith.muli %638, %c8_i32_196 : i32
    %c1_i32_197 = arith.constant 1 : i32
    %640 = arith.addi %639, %c1_i32_197 : i32
    %c0_198 = arith.constant 0 : index
    %c1_199 = arith.constant 1 : index
    %c0_200 = arith.constant 0 : index
    %641 = vector.load %arg3[%c0_198, %c1_199, %c0_200] : memref<2x8x64xf32, #tpu.memory_space<vmem>>, vector<2x1x64xf32>
    %642 = vector.shape_cast %641 : vector<2x1x64xf32> to vector<2x64xf32>
    %643 = arith.truncf %579 : vector<2x16xf32> to vector<2x16xbf16>
    %c0_201 = arith.constant 0 : index
    %c0_202 = arith.constant 0 : index
    %644 = vector.load %arg5[%c0_201, %c0_202] : memref<16x64xbf16, #tpu.memory_space<vmem>>, vector<16x64xbf16>
    %cst_203 = arith.constant dense<0.000000e+00> : vector<2x64xf32>
    %645 = tpu.matmul %643, %644, %cst_203 {dimension_numbers = #tpu.dot_dimension_numbers<[1], [0], [0], [1], [0, 0, 1, 1], [], []>} : vector<2x16xbf16>, vector<16x64xbf16>, vector<2x64xf32> -> vector<2x64xf32>
    %646 = arith.addf %642, %645 : vector<2x64xf32>
    %647 = vector.extract_strided_slice %646 {offsets = [0, 0], sizes = [2, 16], strides = [1, 1]} : vector<2x64xf32> to vector<2x16xf32>
    %648 = arith.negf %647 : vector<2x16xf32>
    %649 = math.exp %648 : vector<2x16xf32>
    %cst_204 = arith.constant 1.000000e+00 : f32
    %650 = vector.broadcast %cst_204 : f32 to vector<2x16xf32>
    %651 = arith.addf %650, %649 : vector<2x16xf32>
    %652 = arith.divf %650, %651 : vector<2x16xf32>
    %653 = vector.extract_strided_slice %646 {offsets = [0, 16], sizes = [2, 16], strides = [1, 1]} : vector<2x64xf32> to vector<2x16xf32>
    %654 = arith.negf %653 : vector<2x16xf32>
    %655 = math.exp %654 : vector<2x16xf32>
    %cst_205 = arith.constant 1.000000e+00 : f32
    %656 = vector.broadcast %cst_205 : f32 to vector<2x16xf32>
    %657 = arith.addf %656, %655 : vector<2x16xf32>
    %658 = arith.divf %656, %657 : vector<2x16xf32>
    %659 = vector.extract_strided_slice %646 {offsets = [0, 32], sizes = [2, 16], strides = [1, 1]} : vector<2x64xf32> to vector<2x16xf32>
    %660 = math.tanh %659 : vector<2x16xf32>
    %661 = vector.extract_strided_slice %646 {offsets = [0, 48], sizes = [2, 16], strides = [1, 1]} : vector<2x64xf32> to vector<2x16xf32>
    %662 = arith.negf %661 : vector<2x16xf32>
    %663 = math.exp %662 : vector<2x16xf32>
    %cst_206 = arith.constant 1.000000e+00 : f32
    %664 = vector.broadcast %cst_206 : f32 to vector<2x16xf32>
    %665 = arith.addf %664, %663 : vector<2x16xf32>
    %666 = arith.divf %664, %665 : vector<2x16xf32>
    %667 = arith.mulf %658, %582 : vector<2x16xf32>
    %668 = arith.mulf %652, %660 : vector<2x16xf32>
    %669 = arith.addf %667, %668 : vector<2x16xf32>
    %670 = math.tanh %669 : vector<2x16xf32>
    %671 = arith.mulf %666, %670 : vector<2x16xf32>
    %672 = vector.broadcast %640 : i32 to vector<2x1xi32>
    %673 = arith.cmpi slt, %672, %3 : vector<2x1xi32>
    %674 = vector.shape_cast %673 : vector<2x1xi1> to vector<2x1xi1>
    %675 = vector.broadcast %674 : vector<2x1xi1> to vector<2x16xi1>
    %676 = arith.select %675, %671, %579 : vector<2x16xi1>, vector<2x16xf32>
    %677 = vector.shape_cast %673 : vector<2x1xi1> to vector<2x1xi1>
    %678 = vector.broadcast %677 : vector<2x1xi1> to vector<2x16xi1>
    %679 = arith.select %678, %669, %582 : vector<2x16xi1>, vector<2x16xf32>
    %cst_207 = arith.constant 0.000000e+00 : f32
    %680 = vector.shape_cast %673 : vector<2x1xi1> to vector<2x1xi1>
    %681 = vector.broadcast %680 : vector<2x1xi1> to vector<2x16xi1>
    %682 = vector.broadcast %cst_207 : f32 to vector<2x16xf32>
    %683 = arith.select %681, %671, %682 : vector<2x16xi1>, vector<2x16xf32>
    %c0_208 = arith.constant 0 : index
    %c1_209 = arith.constant 1 : index
    %c0_210 = arith.constant 0 : index
    %684 = vector.load %arg7[%c0_208, %c1_209, %c0_210] : memref<2x8x16xf32, #tpu.memory_space<vmem>>, vector<2x1x16xf32>
    %685 = vector.shape_cast %684 : vector<2x1x16xf32> to vector<2x16xf32>
    %686 = vector.shape_cast %683 : vector<2x16xf32> to vector<2x1x16xf32>
    tpu.vector_store %arg7[%c0_208, %c1_209, %c0_210], %686 {strides = array<i32>} : memref<2x8x16xf32, #tpu.memory_space<vmem>>, vector<2x1x16xf32>,
    %c8_i32_211 = arith.constant 8 : i32
    %687 = arith.muli %arg0, %c8_i32_211 : i32
    %c7_i32_212 = arith.constant 7 : i32
    %688 = arith.addi %687, %c7_i32_212 : i32
    %c0_213 = arith.constant 0 : index
    %c7_214 = arith.constant 7 : index
    %c0_215 = arith.constant 0 : index
    %689 = vector.load %arg2[%c0_213, %c7_214, %c0_215] : memref<2x8x64xf32, #tpu.memory_space<vmem>>, vector<2x1x64xf32>
    %690 = vector.shape_cast %689 : vector<2x1x64xf32> to vector<2x64xf32>
    %691 = arith.truncf %627 : vector<2x16xf32> to vector<2x16xbf16>
    %c0_216 = arith.constant 0 : index
    %c0_217 = arith.constant 0 : index
    %692 = vector.load %arg4[%c0_216, %c0_217] : memref<16x64xbf16, #tpu.memory_space<vmem>>, vector<16x64xbf16>
    %cst_218 = arith.constant dense<0.000000e+00> : vector<2x64xf32>
    %693 = tpu.matmul %691, %692, %cst_218 {dimension_numbers = #tpu.dot_dimension_numbers<[1], [0], [0], [1], [0, 0, 1, 1], [], []>} : vector<2x16xbf16>, vector<16x64xbf16>, vector<2x64xf32> -> vector<2x64xf32>
    %694 = arith.addf %690, %693 : vector<2x64xf32>
    %695 = vector.extract_strided_slice %694 {offsets = [0, 0], sizes = [2, 16], strides = [1, 1]} : vector<2x64xf32> to vector<2x16xf32>
    %696 = arith.negf %695 : vector<2x16xf32>
    %697 = math.exp %696 : vector<2x16xf32>
    %cst_219 = arith.constant 1.000000e+00 : f32
    %698 = vector.broadcast %cst_219 : f32 to vector<2x16xf32>
    %699 = arith.addf %698, %697 : vector<2x16xf32>
    %700 = arith.divf %698, %699 : vector<2x16xf32>
    %701 = vector.extract_strided_slice %694 {offsets = [0, 16], sizes = [2, 16], strides = [1, 1]} : vector<2x64xf32> to vector<2x16xf32>
    %702 = arith.negf %701 : vector<2x16xf32>
    %703 = math.exp %702 : vector<2x16xf32>
    %cst_220 = arith.constant 1.000000e+00 : f32
    %704 = vector.broadcast %cst_220 : f32 to vector<2x16xf32>
    %705 = arith.addf %704, %703 : vector<2x16xf32>
    %706 = arith.divf %704, %705 : vector<2x16xf32>
    %707 = vector.extract_strided_slice %694 {offsets = [0, 32], sizes = [2, 16], strides = [1, 1]} : vector<2x64xf32> to vector<2x16xf32>
    %708 = math.tanh %707 : vector<2x16xf32>
    %709 = vector.extract_strided_slice %694 {offsets = [0, 48], sizes = [2, 16], strides = [1, 1]} : vector<2x64xf32> to vector<2x16xf32>
    %710 = arith.negf %709 : vector<2x16xf32>
    %711 = math.exp %710 : vector<2x16xf32>
    %cst_221 = arith.constant 1.000000e+00 : f32
    %712 = vector.broadcast %cst_221 : f32 to vector<2x16xf32>
    %713 = arith.addf %712, %711 : vector<2x16xf32>
    %714 = arith.divf %712, %713 : vector<2x16xf32>
    %715 = arith.mulf %706, %630 : vector<2x16xf32>
    %716 = arith.mulf %700, %708 : vector<2x16xf32>
    %717 = arith.addf %715, %716 : vector<2x16xf32>
    %718 = math.tanh %717 : vector<2x16xf32>
    %719 = arith.mulf %714, %718 : vector<2x16xf32>
    %720 = vector.broadcast %688 : i32 to vector<2x1xi32>
    %721 = arith.cmpi slt, %720, %3 : vector<2x1xi32>
    %722 = vector.shape_cast %721 : vector<2x1xi1> to vector<2x1xi1>
    %723 = vector.broadcast %722 : vector<2x1xi1> to vector<2x16xi1>
    %724 = arith.select %723, %719, %627 : vector<2x16xi1>, vector<2x16xf32>
    %725 = vector.shape_cast %721 : vector<2x1xi1> to vector<2x1xi1>
    %726 = vector.broadcast %725 : vector<2x1xi1> to vector<2x16xi1>
    %727 = arith.select %726, %717, %630 : vector<2x16xi1>, vector<2x16xf32>
    %cst_222 = arith.constant 0.000000e+00 : f32
    %728 = vector.shape_cast %721 : vector<2x1xi1> to vector<2x1xi1>
    %729 = vector.broadcast %728 : vector<2x1xi1> to vector<2x16xi1>
    %730 = vector.broadcast %cst_222 : f32 to vector<2x16xf32>
    %731 = arith.select %729, %719, %730 : vector<2x16xi1>, vector<2x16xf32>
    %c0_223 = arith.constant 0 : index
    %c7_224 = arith.constant 7 : index
    %c0_225 = arith.constant 0 : index
    %732 = vector.load %arg6[%c0_223, %c7_224, %c0_225] : memref<2x8x16xf32, #tpu.memory_space<vmem>>, vector<2x1x16xf32>
    %733 = vector.shape_cast %732 : vector<2x1x16xf32> to vector<2x16xf32>
    %734 = vector.shape_cast %731 : vector<2x16xf32> to vector<2x1x16xf32>
    tpu.vector_store %arg6[%c0_223, %c7_224, %c0_225], %734 {strides = array<i32>} : memref<2x8x16xf32, #tpu.memory_space<vmem>>, vector<2x1x16xf32>,
    %c1_i32_226 = arith.constant 1 : i32
    %735 = arith.subi %c1_i32_226, %arg0 : i32
    %c8_i32_227 = arith.constant 8 : i32
    %736 = arith.muli %735, %c8_i32_227 : i32
    %c0_i32_228 = arith.constant 0 : i32
    %737 = arith.addi %736, %c0_i32_228 : i32
    %c0_229 = arith.constant 0 : index
    %c0_230 = arith.constant 0 : index
    %c0_231 = arith.constant 0 : index
    %738 = vector.load %arg3[%c0_229, %c0_230, %c0_231] : memref<2x8x64xf32, #tpu.memory_space<vmem>>, vector<2x1x64xf32>
    %739 = vector.shape_cast %738 : vector<2x1x64xf32> to vector<2x64xf32>
    %740 = arith.truncf %676 : vector<2x16xf32> to vector<2x16xbf16>
    %c0_232 = arith.constant 0 : index
    %c0_233 = arith.constant 0 : index
    %741 = vector.load %arg5[%c0_232, %c0_233] : memref<16x64xbf16, #tpu.memory_space<vmem>>, vector<16x64xbf16>
    %cst_234 = arith.constant dense<0.000000e+00> : vector<2x64xf32>
    %742 = tpu.matmul %740, %741, %cst_234 {dimension_numbers = #tpu.dot_dimension_numbers<[1], [0], [0], [1], [0, 0, 1, 1], [], []>} : vector<2x16xbf16>, vector<16x64xbf16>, vector<2x64xf32> -> vector<2x64xf32>
    %743 = arith.addf %739, %742 : vector<2x64xf32>
    %744 = vector.extract_strided_slice %743 {offsets = [0, 0], sizes = [2, 16], strides = [1, 1]} : vector<2x64xf32> to vector<2x16xf32>
    %745 = arith.negf %744 : vector<2x16xf32>
    %746 = math.exp %745 : vector<2x16xf32>
    %cst_235 = arith.constant 1.000000e+00 : f32
    %747 = vector.broadcast %cst_235 : f32 to vector<2x16xf32>
    %748 = arith.addf %747, %746 : vector<2x16xf32>
    %749 = arith.divf %747, %748 : vector<2x16xf32>
    %750 = vector.extract_strided_slice %743 {offsets = [0, 16], sizes = [2, 16], strides = [1, 1]} : vector<2x64xf32> to vector<2x16xf32>
    %751 = arith.negf %750 : vector<2x16xf32>
    %752 = math.exp %751 : vector<2x16xf32>
    %cst_236 = arith.constant 1.000000e+00 : f32
    %753 = vector.broadcast %cst_236 : f32 to vector<2x16xf32>
    %754 = arith.addf %753, %752 : vector<2x16xf32>
    %755 = arith.divf %753, %754 : vector<2x16xf32>
    %756 = vector.extract_strided_slice %743 {offsets = [0, 32], sizes = [2, 16], strides = [1, 1]} : vector<2x64xf32> to vector<2x16xf32>
    %757 = math.tanh %756 : vector<2x16xf32>
    %758 = vector.extract_strided_slice %743 {offsets = [0, 48], sizes = [2, 16], strides = [1, 1]} : vector<2x64xf32> to vector<2x16xf32>
    %759 = arith.negf %758 : vector<2x16xf32>
    %760 = math.exp %759 : vector<2x16xf32>
    %cst_237 = arith.constant 1.000000e+00 : f32
    %761 = vector.broadcast %cst_237 : f32 to vector<2x16xf32>
    %762 = arith.addf %761, %760 : vector<2x16xf32>
    %763 = arith.divf %761, %762 : vector<2x16xf32>
    %764 = arith.mulf %755, %679 : vector<2x16xf32>
    %765 = arith.mulf %749, %757 : vector<2x16xf32>
    %766 = arith.addf %764, %765 : vector<2x16xf32>
    %767 = math.tanh %766 : vector<2x16xf32>
    %768 = arith.mulf %763, %767 : vector<2x16xf32>
    %769 = vector.broadcast %737 : i32 to vector<2x1xi32>
    %770 = arith.cmpi slt, %769, %3 : vector<2x1xi32>
    %771 = vector.shape_cast %770 : vector<2x1xi1> to vector<2x1xi1>
    %772 = vector.broadcast %771 : vector<2x1xi1> to vector<2x16xi1>
    %773 = arith.select %772, %768, %676 : vector<2x16xi1>, vector<2x16xf32>
    %774 = vector.shape_cast %770 : vector<2x1xi1> to vector<2x1xi1>
    %775 = vector.broadcast %774 : vector<2x1xi1> to vector<2x16xi1>
    %776 = arith.select %775, %766, %679 : vector<2x16xi1>, vector<2x16xf32>
    %cst_238 = arith.constant 0.000000e+00 : f32
    %777 = vector.shape_cast %770 : vector<2x1xi1> to vector<2x1xi1>
    %778 = vector.broadcast %777 : vector<2x1xi1> to vector<2x16xi1>
    %779 = vector.broadcast %cst_238 : f32 to vector<2x16xf32>
    %780 = arith.select %778, %768, %779 : vector<2x16xi1>, vector<2x16xf32>
    %c0_239 = arith.constant 0 : index
    %c0_240 = arith.constant 0 : index
    %c0_241 = arith.constant 0 : index
    %781 = vector.load %arg7[%c0_239, %c0_240, %c0_241] : memref<2x8x16xf32, #tpu.memory_space<vmem>>, vector<2x1x16xf32>
    %782 = vector.shape_cast %781 : vector<2x1x16xf32> to vector<2x16xf32>
    %783 = vector.shape_cast %780 : vector<2x16xf32> to vector<2x1x16xf32>
    tpu.vector_store %arg7[%c0_239, %c0_240, %c0_241], %783 {strides = array<i32>} : memref<2x8x16xf32, #tpu.memory_space<vmem>>, vector<2x1x16xf32>,
    %c0_242 = arith.constant 0 : index
    %c0_243 = arith.constant 0 : index
    %784 = vector.load %arg8[%c0_242, %c0_243] : memref<2x16xf32, #tpu.memory_space<vmem>>, vector<2x16xf32>
    tpu.vector_store %arg8[%c0_242, %c0_243], %724 {strides = array<i32>} : memref<2x16xf32, #tpu.memory_space<vmem>>, vector<2x16xf32>,
    %c0_244 = arith.constant 0 : index
    %c0_245 = arith.constant 0 : index
    %785 = vector.load %arg9[%c0_244, %c0_245] : memref<2x16xf32, #tpu.memory_space<vmem>>, vector<2x16xf32>
    tpu.vector_store %arg9[%c0_244, %c0_245], %727 {strides = array<i32>} : memref<2x16xf32, #tpu.memory_space<vmem>>, vector<2x16xf32>,
    %c0_246 = arith.constant 0 : index
    %c0_247 = arith.constant 0 : index
    %786 = vector.load %arg10[%c0_246, %c0_247] : memref<2x16xf32, #tpu.memory_space<vmem>>, vector<2x16xf32>
    tpu.vector_store %arg10[%c0_246, %c0_247], %773 {strides = array<i32>} : memref<2x16xf32, #tpu.memory_space<vmem>>, vector<2x16xf32>,
    %c0_248 = arith.constant 0 : index
    %c0_249 = arith.constant 0 : index
    %787 = vector.load %arg11[%c0_248, %c0_249] : memref<2x16xf32, #tpu.memory_space<vmem>>, vector<2x16xf32>
    tpu.vector_store %arg11[%c0_248, %c0_249], %776 {strides = array<i32>} : memref<2x16xf32, #tpu.memory_space<vmem>>, vector<2x16xf32>,
    return
  }
  func.func @transform_0(%arg0: i32) -> (i32, i32) {
    %c0_i32 = arith.constant 0 : i32
    %c0_i32_0 = arith.constant 0 : i32
    %c0_i32_1 = arith.constant 0 : i32
    return %c0_i32, %c0_i32_0 : i32, i32
  }
  func.func @transform_1(%arg0: i32) -> (i32, i32, i32) {
    %c0_i32 = arith.constant 0 : i32
    %c0_i32_0 = arith.constant 0 : i32
    %c0_i32_1 = arith.constant 0 : i32
    return %c0_i32, %arg0, %c0_i32_0 : i32, i32, i32
  }
  func.func @transform_2(%arg0: i32) -> (i32, i32, i32) {
    %c1_i32 = arith.constant 1 : i32
    %0 = arith.subi %c1_i32, %arg0 : i32
    %c0_i32 = arith.constant 0 : i32
    %c0_i32_0 = arith.constant 0 : i32
    %c0_i32_1 = arith.constant 0 : i32
    return %c0_i32, %0, %c0_i32_0 : i32, i32, i32
  }
  func.func @transform_3(%arg0: i32) -> (i32, i32) {
    %c0_i32 = arith.constant 0 : i32
    %c0_i32_0 = arith.constant 0 : i32
    %c0_i32_1 = arith.constant 0 : i32
    return %c0_i32, %c0_i32_0 : i32, i32
  }
  func.func @transform_4(%arg0: i32) -> (i32, i32) {
    %c0_i32 = arith.constant 0 : i32
    %c0_i32_0 = arith.constant 0 : i32
    %c0_i32_1 = arith.constant 0 : i32
    return %c0_i32, %c0_i32_0 : i32, i32
  }
  func.func @transform_5(%arg0: i32) -> (i32, i32, i32) {
    %c0_i32 = arith.constant 0 : i32
    %c0_i32_0 = arith.constant 0 : i32
    %c0_i32_1 = arith.constant 0 : i32
    return %c0_i32, %arg0, %c0_i32_0 : i32, i32, i32
  }
  func.func @transform_6(%arg0: i32) -> (i32, i32, i32) {
    %c1_i32 = arith.constant 1 : i32
    %0 = arith.subi %c1_i32, %arg0 : i32
    %c0_i32 = arith.constant 0 : i32
    %c0_i32_0 = arith.constant 0 : i32
    %c0_i32_1 = arith.constant 0 : i32
    return %c0_i32, %0, %c0_i32_0 : i32, i32, i32
  }
}

module attributes {stable_mosaic.version = 11 : i64} {
  func.func @_encoder_front_kernel(%arg0: i32, %arg1: memref<1x16x32xbf16, #tpu.memory_space<vmem>>, %arg2: memref<2x5x32x32xbf16, #tpu.memory_space<vmem>>, %arg3: memref<2x1x32xf32, #tpu.memory_space<vmem>>, %arg4: memref<2x1x32xf32, #tpu.memory_space<vmem>>, %arg5: memref<32x64xbf16, #tpu.memory_space<vmem>>, %arg6: memref<1x64xf32, #tpu.memory_space<vmem>>, %arg7: memref<32x64xbf16, #tpu.memory_space<vmem>>, %arg8: memref<1x64xf32, #tpu.memory_space<vmem>>, %arg9: memref<1x16x64xf32, #tpu.memory_space<vmem>>, %arg10: memref<1x16x64xf32, #tpu.memory_space<vmem>>, %arg11: memref<20x32xbf16, #tpu.memory_space<vmem>>, %arg12: memref<16x32xf32, #tpu.memory_space<vmem>>) attributes {dimension_semantics = [#tpu.dimension_semantics<parallel>], iteration_bounds = array<i64: 2>, scalar_prefetch = 0 : i64, scratch_operands = 2 : i64, tpu.core_type = #tpu.core_type<tc>, window_params = [{transform_indices = @transform_0, window_bounds = array<i64: 1, 16, 32>}, {pipeline_mode = #tpu.pipeline_mode<synchronous>, transform_indices = @transform_1, window_bounds = array<i64: 2, 5, 32, 32>}, {pipeline_mode = #tpu.pipeline_mode<synchronous>, transform_indices = @transform_2, window_bounds = array<i64: 2, 1, 32>}, {pipeline_mode = #tpu.pipeline_mode<synchronous>, transform_indices = @transform_3, window_bounds = array<i64: 2, 1, 32>}, {pipeline_mode = #tpu.pipeline_mode<synchronous>, transform_indices = @transform_4, window_bounds = array<i64: 32, 64>}, {pipeline_mode = #tpu.pipeline_mode<synchronous>, transform_indices = @transform_5, window_bounds = array<i64: 1, 64>}, {pipeline_mode = #tpu.pipeline_mode<synchronous>, transform_indices = @transform_6, window_bounds = array<i64: 32, 64>}, {pipeline_mode = #tpu.pipeline_mode<synchronous>, transform_indices = @transform_7, window_bounds = array<i64: 1, 64>}, {transform_indices = @transform_8, window_bounds = array<i64: 1, 16, 64>}, {transform_indices = @transform_9, window_bounds = array<i64: 1, 16, 64>}]} {
    %cst = arith.constant 0.000000e+00 : bf16
    %0 = vector.broadcast %cst : bf16 to vector<20x32xbf16>
    %c0 = arith.constant 0 : index
    %c0_0 = arith.constant 0 : index
    %1 = vector.load %arg11[%c0, %c0_0] : memref<20x32xbf16, #tpu.memory_space<vmem>>, vector<20x32xbf16>
    tpu.vector_store %arg11[%c0, %c0_0], %0 {strides = array<i32>} : memref<20x32xbf16, #tpu.memory_space<vmem>>, vector<20x32xbf16>,
    %c0_1 = arith.constant 0 : index
    %c0_2 = arith.constant 0 : index
    %c0_3 = arith.constant 0 : index
    %2 = vector.load %arg1[%c0_1, %c0_2, %c0_3] : memref<1x16x32xbf16, #tpu.memory_space<vmem>>, vector<1x16x32xbf16>
    %3 = vector.shape_cast %2 : vector<1x16x32xbf16> to vector<16x32xbf16>
    %c2 = arith.constant 2 : index
    %c0_4 = arith.constant 0 : index
    %4 = vector.load %arg11[%c2, %c0_4] : memref<20x32xbf16, #tpu.memory_space<vmem>>, vector<16x32xbf16>
    tpu.vector_store %arg11[%c2, %c0_4], %3 {strides = array<i32>} : memref<20x32xbf16, #tpu.memory_space<vmem>>, vector<16x32xbf16>,
    %c0_5 = arith.constant 0 : index
    %c0_6 = arith.constant 0 : index
    %5 = vector.load %arg11[%c0_5, %c0_6] : memref<20x32xbf16, #tpu.memory_space<vmem>>, vector<16x32xbf16>
    %c0_7 = arith.constant 0 : index
    %c0_8 = arith.constant 0 : index
    %c0_9 = arith.constant 0 : index
    %c0_10 = arith.constant 0 : index
    %6 = vector.load %arg2[%c0_7, %c0_8, %c0_9, %c0_10] : memref<2x5x32x32xbf16, #tpu.memory_space<vmem>>, vector<1x1x32x32xbf16>
    %7 = vector.shape_cast %6 : vector<1x1x32x32xbf16> to vector<32x32xbf16>
    %cst_11 = arith.constant dense<0.000000e+00> : vector<16x32xf32>
    %8 = tpu.matmul %5, %7, %cst_11 {dimension_numbers = #tpu.dot_dimension_numbers<[1], [0], [0], [1], [0, 0, 1, 1], [], []>} : vector<16x32xbf16>, vector<32x32xbf16>, vector<16x32xf32> -> vector<16x32xf32>
    %c0_12 = arith.constant 0 : index
    %c0_13 = arith.constant 0 : index
    %9 = vector.load %arg12[%c0_12, %c0_13] : memref<16x32xf32, #tpu.memory_space<vmem>>, vector<16x32xf32>
    tpu.vector_store %arg12[%c0_12, %c0_13], %8 {strides = array<i32>} : memref<16x32xf32, #tpu.memory_space<vmem>>, vector<16x32xf32>,
    %c0_14 = arith.constant 0 : index
    %c0_15 = arith.constant 0 : index
    %10 = vector.load %arg12[%c0_14, %c0_15] : memref<16x32xf32, #tpu.memory_space<vmem>>, vector<16x32xf32>
    %c1 = arith.constant 1 : index
    %c0_16 = arith.constant 0 : index
    %11 = vector.load %arg11[%c1, %c0_16] : memref<20x32xbf16, #tpu.memory_space<vmem>>, vector<16x32xbf16>
    %c0_17 = arith.constant 0 : index
    %c1_18 = arith.constant 1 : index
    %c0_19 = arith.constant 0 : index
    %c0_20 = arith.constant 0 : index
    %12 = vector.load %arg2[%c0_17, %c1_18, %c0_19, %c0_20] : memref<2x5x32x32xbf16, #tpu.memory_space<vmem>>, vector<1x1x32x32xbf16>
    %13 = vector.shape_cast %12 : vector<1x1x32x32xbf16> to vector<32x32xbf16>
    %cst_21 = arith.constant dense<0.000000e+00> : vector<16x32xf32>
    %14 = tpu.matmul %11, %13, %cst_21 {dimension_numbers = #tpu.dot_dimension_numbers<[1], [0], [0], [1], [0, 0, 1, 1], [], []>} : vector<16x32xbf16>, vector<32x32xbf16>, vector<16x32xf32> -> vector<16x32xf32>
    %15 = arith.addf %10, %14 : vector<16x32xf32>
    %c0_22 = arith.constant 0 : index
    %c0_23 = arith.constant 0 : index
    %16 = vector.load %arg12[%c0_22, %c0_23] : memref<16x32xf32, #tpu.memory_space<vmem>>, vector<16x32xf32>
    tpu.vector_store %arg12[%c0_22, %c0_23], %15 {strides = array<i32>} : memref<16x32xf32, #tpu.memory_space<vmem>>, vector<16x32xf32>,
    %c0_24 = arith.constant 0 : index
    %c0_25 = arith.constant 0 : index
    %17 = vector.load %arg12[%c0_24, %c0_25] : memref<16x32xf32, #tpu.memory_space<vmem>>, vector<16x32xf32>
    %c2_26 = arith.constant 2 : index
    %c0_27 = arith.constant 0 : index
    %18 = vector.load %arg11[%c2_26, %c0_27] : memref<20x32xbf16, #tpu.memory_space<vmem>>, vector<16x32xbf16>
    %c0_28 = arith.constant 0 : index
    %c2_29 = arith.constant 2 : index
    %c0_30 = arith.constant 0 : index
    %c0_31 = arith.constant 0 : index
    %19 = vector.load %arg2[%c0_28, %c2_29, %c0_30, %c0_31] : memref<2x5x32x32xbf16, #tpu.memory_space<vmem>>, vector<1x1x32x32xbf16>
    %20 = vector.shape_cast %19 : vector<1x1x32x32xbf16> to vector<32x32xbf16>
    %cst_32 = arith.constant dense<0.000000e+00> : vector<16x32xf32>
    %21 = tpu.matmul %18, %20, %cst_32 {dimension_numbers = #tpu.dot_dimension_numbers<[1], [0], [0], [1], [0, 0, 1, 1], [], []>} : vector<16x32xbf16>, vector<32x32xbf16>, vector<16x32xf32> -> vector<16x32xf32>
    %22 = arith.addf %17, %21 : vector<16x32xf32>
    %c0_33 = arith.constant 0 : index
    %c0_34 = arith.constant 0 : index
    %23 = vector.load %arg12[%c0_33, %c0_34] : memref<16x32xf32, #tpu.memory_space<vmem>>, vector<16x32xf32>
    tpu.vector_store %arg12[%c0_33, %c0_34], %22 {strides = array<i32>} : memref<16x32xf32, #tpu.memory_space<vmem>>, vector<16x32xf32>,
    %c0_35 = arith.constant 0 : index
    %c0_36 = arith.constant 0 : index
    %24 = vector.load %arg12[%c0_35, %c0_36] : memref<16x32xf32, #tpu.memory_space<vmem>>, vector<16x32xf32>
    %c3 = arith.constant 3 : index
    %c0_37 = arith.constant 0 : index
    %25 = vector.load %arg11[%c3, %c0_37] : memref<20x32xbf16, #tpu.memory_space<vmem>>, vector<16x32xbf16>
    %c0_38 = arith.constant 0 : index
    %c3_39 = arith.constant 3 : index
    %c0_40 = arith.constant 0 : index
    %c0_41 = arith.constant 0 : index
    %26 = vector.load %arg2[%c0_38, %c3_39, %c0_40, %c0_41] : memref<2x5x32x32xbf16, #tpu.memory_space<vmem>>, vector<1x1x32x32xbf16>
    %27 = vector.shape_cast %26 : vector<1x1x32x32xbf16> to vector<32x32xbf16>
    %cst_42 = arith.constant dense<0.000000e+00> : vector<16x32xf32>
    %28 = tpu.matmul %25, %27, %cst_42 {dimension_numbers = #tpu.dot_dimension_numbers<[1], [0], [0], [1], [0, 0, 1, 1], [], []>} : vector<16x32xbf16>, vector<32x32xbf16>, vector<16x32xf32> -> vector<16x32xf32>
    %29 = arith.addf %24, %28 : vector<16x32xf32>
    %c0_43 = arith.constant 0 : index
    %c0_44 = arith.constant 0 : index
    %30 = vector.load %arg12[%c0_43, %c0_44] : memref<16x32xf32, #tpu.memory_space<vmem>>, vector<16x32xf32>
    tpu.vector_store %arg12[%c0_43, %c0_44], %29 {strides = array<i32>} : memref<16x32xf32, #tpu.memory_space<vmem>>, vector<16x32xf32>,
    %c0_45 = arith.constant 0 : index
    %c0_46 = arith.constant 0 : index
    %31 = vector.load %arg12[%c0_45, %c0_46] : memref<16x32xf32, #tpu.memory_space<vmem>>, vector<16x32xf32>
    %c4 = arith.constant 4 : index
    %c0_47 = arith.constant 0 : index
    %32 = vector.load %arg11[%c4, %c0_47] : memref<20x32xbf16, #tpu.memory_space<vmem>>, vector<16x32xbf16>
    %c0_48 = arith.constant 0 : index
    %c4_49 = arith.constant 4 : index
    %c0_50 = arith.constant 0 : index
    %c0_51 = arith.constant 0 : index
    %33 = vector.load %arg2[%c0_48, %c4_49, %c0_50, %c0_51] : memref<2x5x32x32xbf16, #tpu.memory_space<vmem>>, vector<1x1x32x32xbf16>
    %34 = vector.shape_cast %33 : vector<1x1x32x32xbf16> to vector<32x32xbf16>
    %cst_52 = arith.constant dense<0.000000e+00> : vector<16x32xf32>
    %35 = tpu.matmul %32, %34, %cst_52 {dimension_numbers = #tpu.dot_dimension_numbers<[1], [0], [0], [1], [0, 0, 1, 1], [], []>} : vector<16x32xbf16>, vector<32x32xbf16>, vector<16x32xf32> -> vector<16x32xf32>
    %36 = arith.addf %31, %35 : vector<16x32xf32>
    %c0_53 = arith.constant 0 : index
    %c0_54 = arith.constant 0 : index
    %37 = vector.load %arg12[%c0_53, %c0_54] : memref<16x32xf32, #tpu.memory_space<vmem>>, vector<16x32xf32>
    tpu.vector_store %arg12[%c0_53, %c0_54], %36 {strides = array<i32>} : memref<16x32xf32, #tpu.memory_space<vmem>>, vector<16x32xf32>,
    %c0_55 = arith.constant 0 : index
    %c0_56 = arith.constant 0 : index
    %38 = vector.load %arg12[%c0_55, %c0_56] : memref<16x32xf32, #tpu.memory_space<vmem>>, vector<16x32xf32>
    %c0_57 = arith.constant 0 : index
    %c0_58 = arith.constant 0 : index
    %c0_59 = arith.constant 0 : index
    %39 = vector.load %arg3[%c0_57, %c0_58, %c0_59] : memref<2x1x32xf32, #tpu.memory_space<vmem>>, vector<1x1x32xf32>
    %40 = vector.shape_cast %39 : vector<1x1x32xf32> to vector<1x32xf32>
    %41 = vector.broadcast %40 : vector<1x32xf32> to vector<16x32xf32>
    %42 = arith.mulf %38, %41 : vector<16x32xf32>
    %c0_60 = arith.constant 0 : index
    %c0_61 = arith.constant 0 : index
    %c0_62 = arith.constant 0 : index
    %43 = vector.load %arg4[%c0_60, %c0_61, %c0_62] : memref<2x1x32xf32, #tpu.memory_space<vmem>>, vector<1x1x32xf32>
    %44 = vector.shape_cast %43 : vector<1x1x32xf32> to vector<1x32xf32>
    %45 = vector.broadcast %44 : vector<1x32xf32> to vector<16x32xf32>
    %46 = arith.addf %42, %45 : vector<16x32xf32>
    %cst_63 = arith.constant 0.000000e+00 : f32
    %47 = vector.broadcast %cst_63 : f32 to vector<16x32xf32>
    %48 = arith.maximumf %46, %47 : vector<16x32xf32>
    %49 = arith.truncf %48 : vector<16x32xf32> to vector<16x32xbf16>
    %c2_64 = arith.constant 2 : index
    %c0_65 = arith.constant 0 : index
    %50 = vector.load %arg11[%c2_64, %c0_65] : memref<20x32xbf16, #tpu.memory_space<vmem>>, vector<16x32xbf16>
    tpu.vector_store %arg11[%c2_64, %c0_65], %49 {strides = array<i32>} : memref<20x32xbf16, #tpu.memory_space<vmem>>, vector<16x32xbf16>,
    %c0_66 = arith.constant 0 : index
    %c0_67 = arith.constant 0 : index
    %51 = vector.load %arg11[%c0_66, %c0_67] : memref<20x32xbf16, #tpu.memory_space<vmem>>, vector<16x32xbf16>
    %c1_68 = arith.constant 1 : index
    %c0_69 = arith.constant 0 : index
    %c0_70 = arith.constant 0 : index
    %c0_71 = arith.constant 0 : index
    %52 = vector.load %arg2[%c1_68, %c0_69, %c0_70, %c0_71] : memref<2x5x32x32xbf16, #tpu.memory_space<vmem>>, vector<1x1x32x32xbf16>
    %53 = vector.shape_cast %52 : vector<1x1x32x32xbf16> to vector<32x32xbf16>
    %cst_72 = arith.constant dense<0.000000e+00> : vector<16x32xf32>
    %54 = tpu.matmul %51, %53, %cst_72 {dimension_numbers = #tpu.dot_dimension_numbers<[1], [0], [0], [1], [0, 0, 1, 1], [], []>} : vector<16x32xbf16>, vector<32x32xbf16>, vector<16x32xf32> -> vector<16x32xf32>
    %c0_73 = arith.constant 0 : index
    %c0_74 = arith.constant 0 : index
    %55 = vector.load %arg12[%c0_73, %c0_74] : memref<16x32xf32, #tpu.memory_space<vmem>>, vector<16x32xf32>
    tpu.vector_store %arg12[%c0_73, %c0_74], %54 {strides = array<i32>} : memref<16x32xf32, #tpu.memory_space<vmem>>, vector<16x32xf32>,
    %c0_75 = arith.constant 0 : index
    %c0_76 = arith.constant 0 : index
    %56 = vector.load %arg12[%c0_75, %c0_76] : memref<16x32xf32, #tpu.memory_space<vmem>>, vector<16x32xf32>
    %c1_77 = arith.constant 1 : index
    %c0_78 = arith.constant 0 : index
    %57 = vector.load %arg11[%c1_77, %c0_78] : memref<20x32xbf16, #tpu.memory_space<vmem>>, vector<16x32xbf16>
    %c1_79 = arith.constant 1 : index
    %c1_80 = arith.constant 1 : index
    %c0_81 = arith.constant 0 : index
    %c0_82 = arith.constant 0 : index
    %58 = vector.load %arg2[%c1_79, %c1_80, %c0_81, %c0_82] : memref<2x5x32x32xbf16, #tpu.memory_space<vmem>>, vector<1x1x32x32xbf16>
    %59 = vector.shape_cast %58 : vector<1x1x32x32xbf16> to vector<32x32xbf16>
    %cst_83 = arith.constant dense<0.000000e+00> : vector<16x32xf32>
    %60 = tpu.matmul %57, %59, %cst_83 {dimension_numbers = #tpu.dot_dimension_numbers<[1], [0], [0], [1], [0, 0, 1, 1], [], []>} : vector<16x32xbf16>, vector<32x32xbf16>, vector<16x32xf32> -> vector<16x32xf32>
    %61 = arith.addf %56, %60 : vector<16x32xf32>
    %c0_84 = arith.constant 0 : index
    %c0_85 = arith.constant 0 : index
    %62 = vector.load %arg12[%c0_84, %c0_85] : memref<16x32xf32, #tpu.memory_space<vmem>>, vector<16x32xf32>
    tpu.vector_store %arg12[%c0_84, %c0_85], %61 {strides = array<i32>} : memref<16x32xf32, #tpu.memory_space<vmem>>, vector<16x32xf32>,
    %c0_86 = arith.constant 0 : index
    %c0_87 = arith.constant 0 : index
    %63 = vector.load %arg12[%c0_86, %c0_87] : memref<16x32xf32, #tpu.memory_space<vmem>>, vector<16x32xf32>
    %c2_88 = arith.constant 2 : index
    %c0_89 = arith.constant 0 : index
    %64 = vector.load %arg11[%c2_88, %c0_89] : memref<20x32xbf16, #tpu.memory_space<vmem>>, vector<16x32xbf16>
    %c1_90 = arith.constant 1 : index
    %c2_91 = arith.constant 2 : index
    %c0_92 = arith.constant 0 : index
    %c0_93 = arith.constant 0 : index
    %65 = vector.load %arg2[%c1_90, %c2_91, %c0_92, %c0_93] : memref<2x5x32x32xbf16, #tpu.memory_space<vmem>>, vector<1x1x32x32xbf16>
    %66 = vector.shape_cast %65 : vector<1x1x32x32xbf16> to vector<32x32xbf16>
    %cst_94 = arith.constant dense<0.000000e+00> : vector<16x32xf32>
    %67 = tpu.matmul %64, %66, %cst_94 {dimension_numbers = #tpu.dot_dimension_numbers<[1], [0], [0], [1], [0, 0, 1, 1], [], []>} : vector<16x32xbf16>, vector<32x32xbf16>, vector<16x32xf32> -> vector<16x32xf32>
    %68 = arith.addf %63, %67 : vector<16x32xf32>
    %c0_95 = arith.constant 0 : index
    %c0_96 = arith.constant 0 : index
    %69 = vector.load %arg12[%c0_95, %c0_96] : memref<16x32xf32, #tpu.memory_space<vmem>>, vector<16x32xf32>
    tpu.vector_store %arg12[%c0_95, %c0_96], %68 {strides = array<i32>} : memref<16x32xf32, #tpu.memory_space<vmem>>, vector<16x32xf32>,
    %c0_97 = arith.constant 0 : index
    %c0_98 = arith.constant 0 : index
    %70 = vector.load %arg12[%c0_97, %c0_98] : memref<16x32xf32, #tpu.memory_space<vmem>>, vector<16x32xf32>
    %c3_99 = arith.constant 3 : index
    %c0_100 = arith.constant 0 : index
    %71 = vector.load %arg11[%c3_99, %c0_100] : memref<20x32xbf16, #tpu.memory_space<vmem>>, vector<16x32xbf16>
    %c1_101 = arith.constant 1 : index
    %c3_102 = arith.constant 3 : index
    %c0_103 = arith.constant 0 : index
    %c0_104 = arith.constant 0 : index
    %72 = vector.load %arg2[%c1_101, %c3_102, %c0_103, %c0_104] : memref<2x5x32x32xbf16, #tpu.memory_space<vmem>>, vector<1x1x32x32xbf16>
    %73 = vector.shape_cast %72 : vector<1x1x32x32xbf16> to vector<32x32xbf16>
    %cst_105 = arith.constant dense<0.000000e+00> : vector<16x32xf32>
    %74 = tpu.matmul %71, %73, %cst_105 {dimension_numbers = #tpu.dot_dimension_numbers<[1], [0], [0], [1], [0, 0, 1, 1], [], []>} : vector<16x32xbf16>, vector<32x32xbf16>, vector<16x32xf32> -> vector<16x32xf32>
    %75 = arith.addf %70, %74 : vector<16x32xf32>
    %c0_106 = arith.constant 0 : index
    %c0_107 = arith.constant 0 : index
    %76 = vector.load %arg12[%c0_106, %c0_107] : memref<16x32xf32, #tpu.memory_space<vmem>>, vector<16x32xf32>
    tpu.vector_store %arg12[%c0_106, %c0_107], %75 {strides = array<i32>} : memref<16x32xf32, #tpu.memory_space<vmem>>, vector<16x32xf32>,
    %c0_108 = arith.constant 0 : index
    %c0_109 = arith.constant 0 : index
    %77 = vector.load %arg12[%c0_108, %c0_109] : memref<16x32xf32, #tpu.memory_space<vmem>>, vector<16x32xf32>
    %c4_110 = arith.constant 4 : index
    %c0_111 = arith.constant 0 : index
    %78 = vector.load %arg11[%c4_110, %c0_111] : memref<20x32xbf16, #tpu.memory_space<vmem>>, vector<16x32xbf16>
    %c1_112 = arith.constant 1 : index
    %c4_113 = arith.constant 4 : index
    %c0_114 = arith.constant 0 : index
    %c0_115 = arith.constant 0 : index
    %79 = vector.load %arg2[%c1_112, %c4_113, %c0_114, %c0_115] : memref<2x5x32x32xbf16, #tpu.memory_space<vmem>>, vector<1x1x32x32xbf16>
    %80 = vector.shape_cast %79 : vector<1x1x32x32xbf16> to vector<32x32xbf16>
    %cst_116 = arith.constant dense<0.000000e+00> : vector<16x32xf32>
    %81 = tpu.matmul %78, %80, %cst_116 {dimension_numbers = #tpu.dot_dimension_numbers<[1], [0], [0], [1], [0, 0, 1, 1], [], []>} : vector<16x32xbf16>, vector<32x32xbf16>, vector<16x32xf32> -> vector<16x32xf32>
    %82 = arith.addf %77, %81 : vector<16x32xf32>
    %c0_117 = arith.constant 0 : index
    %c0_118 = arith.constant 0 : index
    %83 = vector.load %arg12[%c0_117, %c0_118] : memref<16x32xf32, #tpu.memory_space<vmem>>, vector<16x32xf32>
    tpu.vector_store %arg12[%c0_117, %c0_118], %82 {strides = array<i32>} : memref<16x32xf32, #tpu.memory_space<vmem>>, vector<16x32xf32>,
    %c0_119 = arith.constant 0 : index
    %c0_120 = arith.constant 0 : index
    %84 = vector.load %arg12[%c0_119, %c0_120] : memref<16x32xf32, #tpu.memory_space<vmem>>, vector<16x32xf32>
    %c1_121 = arith.constant 1 : index
    %c0_122 = arith.constant 0 : index
    %c0_123 = arith.constant 0 : index
    %85 = vector.load %arg3[%c1_121, %c0_122, %c0_123] : memref<2x1x32xf32, #tpu.memory_space<vmem>>, vector<1x1x32xf32>
    %86 = vector.shape_cast %85 : vector<1x1x32xf32> to vector<1x32xf32>
    %87 = vector.broadcast %86 : vector<1x32xf32> to vector<16x32xf32>
    %88 = arith.mulf %84, %87 : vector<16x32xf32>
    %c1_124 = arith.constant 1 : index
    %c0_125 = arith.constant 0 : index
    %c0_126 = arith.constant 0 : index
    %89 = vector.load %arg4[%c1_124, %c0_125, %c0_126] : memref<2x1x32xf32, #tpu.memory_space<vmem>>, vector<1x1x32xf32>
    %90 = vector.shape_cast %89 : vector<1x1x32xf32> to vector<1x32xf32>
    %91 = vector.broadcast %90 : vector<1x32xf32> to vector<16x32xf32>
    %92 = arith.addf %88, %91 : vector<16x32xf32>
    %cst_127 = arith.constant 0.000000e+00 : f32
    %93 = vector.broadcast %cst_127 : f32 to vector<16x32xf32>
    %94 = arith.maximumf %92, %93 : vector<16x32xf32>
    %95 = arith.truncf %94 : vector<16x32xf32> to vector<16x32xbf16>
    %c2_128 = arith.constant 2 : index
    %c0_129 = arith.constant 0 : index
    %96 = vector.load %arg11[%c2_128, %c0_129] : memref<20x32xbf16, #tpu.memory_space<vmem>>, vector<16x32xbf16>
    tpu.vector_store %arg11[%c2_128, %c0_129], %95 {strides = array<i32>} : memref<20x32xbf16, #tpu.memory_space<vmem>>, vector<16x32xbf16>,
    %c2_130 = arith.constant 2 : index
    %c0_131 = arith.constant 0 : index
    %97 = vector.load %arg11[%c2_130, %c0_131] : memref<20x32xbf16, #tpu.memory_space<vmem>>, vector<16x32xbf16>
    %c0_132 = arith.constant 0 : index
    %c0_133 = arith.constant 0 : index
    %98 = vector.load %arg5[%c0_132, %c0_133] : memref<32x64xbf16, #tpu.memory_space<vmem>>, vector<32x64xbf16>
    %cst_134 = arith.constant dense<0.000000e+00> : vector<16x64xf32>
    %99 = tpu.matmul %97, %98, %cst_134 {dimension_numbers = #tpu.dot_dimension_numbers<[1], [0], [0], [1], [0, 0, 1, 1], [], []>} : vector<16x32xbf16>, vector<32x64xbf16>, vector<16x64xf32> -> vector<16x64xf32>
    %c0_135 = arith.constant 0 : index
    %c0_136 = arith.constant 0 : index
    %100 = vector.load %arg6[%c0_135, %c0_136] : memref<1x64xf32, #tpu.memory_space<vmem>>, vector<1x64xf32>
    %101 = vector.broadcast %100 : vector<1x64xf32> to vector<16x64xf32>
    %102 = arith.addf %99, %101 : vector<16x64xf32>
    %c0_137 = arith.constant 0 : index
    %c0_138 = arith.constant 0 : index
    %c0_139 = arith.constant 0 : index
    %103 = vector.load %arg9[%c0_137, %c0_138, %c0_139] : memref<1x16x64xf32, #tpu.memory_space<vmem>>, vector<1x16x64xf32>
    %104 = vector.shape_cast %103 : vector<1x16x64xf32> to vector<16x64xf32>
    %105 = vector.shape_cast %102 : vector<16x64xf32> to vector<1x16x64xf32>
    tpu.vector_store %arg9[%c0_137, %c0_138, %c0_139], %105 {strides = array<i32>} : memref<1x16x64xf32, #tpu.memory_space<vmem>>, vector<1x16x64xf32>,
    %c0_140 = arith.constant 0 : index
    %c0_141 = arith.constant 0 : index
    %106 = vector.load %arg7[%c0_140, %c0_141] : memref<32x64xbf16, #tpu.memory_space<vmem>>, vector<32x64xbf16>
    %cst_142 = arith.constant dense<0.000000e+00> : vector<16x64xf32>
    %107 = tpu.matmul %97, %106, %cst_142 {dimension_numbers = #tpu.dot_dimension_numbers<[1], [0], [0], [1], [0, 0, 1, 1], [], []>} : vector<16x32xbf16>, vector<32x64xbf16>, vector<16x64xf32> -> vector<16x64xf32>
    %c0_143 = arith.constant 0 : index
    %c0_144 = arith.constant 0 : index
    %108 = vector.load %arg8[%c0_143, %c0_144] : memref<1x64xf32, #tpu.memory_space<vmem>>, vector<1x64xf32>
    %109 = vector.broadcast %108 : vector<1x64xf32> to vector<16x64xf32>
    %110 = arith.addf %107, %109 : vector<16x64xf32>
    %c0_145 = arith.constant 0 : index
    %c0_146 = arith.constant 0 : index
    %c0_147 = arith.constant 0 : index
    %111 = vector.load %arg10[%c0_145, %c0_146, %c0_147] : memref<1x16x64xf32, #tpu.memory_space<vmem>>, vector<1x16x64xf32>
    %112 = vector.shape_cast %111 : vector<1x16x64xf32> to vector<16x64xf32>
    %113 = vector.shape_cast %110 : vector<16x64xf32> to vector<1x16x64xf32>
    tpu.vector_store %arg10[%c0_145, %c0_146, %c0_147], %113 {strides = array<i32>} : memref<1x16x64xf32, #tpu.memory_space<vmem>>, vector<1x16x64xf32>,
    return
  }
  func.func @transform_0(%arg0: i32) -> (i32, i32, i32) {
    %c0_i32 = arith.constant 0 : i32
    %c0_i32_0 = arith.constant 0 : i32
    %c0_i32_1 = arith.constant 0 : i32
    return %arg0, %c0_i32, %c0_i32_0 : i32, i32, i32
  }
  func.func @transform_1(%arg0: i32) -> (i32, i32, i32, i32) {
    %c0_i32 = arith.constant 0 : i32
    %c0_i32_0 = arith.constant 0 : i32
    %c0_i32_1 = arith.constant 0 : i32
    %c0_i32_2 = arith.constant 0 : i32
    %c0_i32_3 = arith.constant 0 : i32
    return %c0_i32, %c0_i32_0, %c0_i32_1, %c0_i32_2 : i32, i32, i32, i32
  }
  func.func @transform_2(%arg0: i32) -> (i32, i32, i32) {
    %c0_i32 = arith.constant 0 : i32
    %c0_i32_0 = arith.constant 0 : i32
    %c0_i32_1 = arith.constant 0 : i32
    %c0_i32_2 = arith.constant 0 : i32
    return %c0_i32, %c0_i32_0, %c0_i32_1 : i32, i32, i32
  }
  func.func @transform_3(%arg0: i32) -> (i32, i32, i32) {
    %c0_i32 = arith.constant 0 : i32
    %c0_i32_0 = arith.constant 0 : i32
    %c0_i32_1 = arith.constant 0 : i32
    %c0_i32_2 = arith.constant 0 : i32
    return %c0_i32, %c0_i32_0, %c0_i32_1 : i32, i32, i32
  }
  func.func @transform_4(%arg0: i32) -> (i32, i32) {
    %c0_i32 = arith.constant 0 : i32
    %c0_i32_0 = arith.constant 0 : i32
    %c0_i32_1 = arith.constant 0 : i32
    return %c0_i32, %c0_i32_0 : i32, i32
  }
  func.func @transform_5(%arg0: i32) -> (i32, i32) {
    %c0_i32 = arith.constant 0 : i32
    %c0_i32_0 = arith.constant 0 : i32
    %c0_i32_1 = arith.constant 0 : i32
    return %c0_i32, %c0_i32_0 : i32, i32
  }
  func.func @transform_6(%arg0: i32) -> (i32, i32) {
    %c0_i32 = arith.constant 0 : i32
    %c0_i32_0 = arith.constant 0 : i32
    %c0_i32_1 = arith.constant 0 : i32
    return %c0_i32, %c0_i32_0 : i32, i32
  }
  func.func @transform_7(%arg0: i32) -> (i32, i32) {
    %c0_i32 = arith.constant 0 : i32
    %c0_i32_0 = arith.constant 0 : i32
    %c0_i32_1 = arith.constant 0 : i32
    return %c0_i32, %c0_i32_0 : i32, i32
  }
  func.func @transform_8(%arg0: i32) -> (i32, i32, i32) {
    %c0_i32 = arith.constant 0 : i32
    %c0_i32_0 = arith.constant 0 : i32
    %c0_i32_1 = arith.constant 0 : i32
    return %arg0, %c0_i32, %c0_i32_0 : i32, i32, i32
  }
  func.func @transform_9(%arg0: i32) -> (i32, i32, i32) {
    %c0_i32 = arith.constant 0 : i32
    %c0_i32_0 = arith.constant 0 : i32
    %c0_i32_1 = arith.constant 0 : i32
    return %arg0, %c0_i32, %c0_i32_0 : i32, i32, i32
  }
}

</mosaic_0001>

<bundles_post_ra>
// kernel: encoder_forward.2
= control target key start
LH: loop header
LB: loop body
LE: loop exit
PB: predicated region body
PF: predicated region fallthrough
CT: control target
= control target key end

     0   :  { %15 = vsyncpa [#allocation5], 0  ;;  %s2422_s0 = inlined_call_operand.vmem [shape: bf16[2,16,32], index: 0, kind: input, shape index: {}]   ;;  %s2423_s1 = inlined_call_operand.vmem [shape: bf16[2,5,32,32], index: 1, kind: input, shape index: {}]   ;;  %s2424_s2 = inlined_call_operand.hbm [shape: f32[2,1,32], index: 2, kind: input, shape index: {}]   ;;  %s2425_s3 = inlined_call_operand.hbm [shape: f32[2,1,32], index: 3, kind: input, shape index: {}]   ;;  %s2426_s4 = inlined_call_operand.vmem [shape: bf16[32,64], index: 4, kind: input, shape index: {}]   ;;  %s2427_s5 = inlined_call_operand.vmem [shape: f32[1,64], index: 5, kind: input, shape index: {}]   ;;  %s2428_s6 = inlined_call_operand.vmem [shape: bf16[32,64], index: 6, kind: input, shape index: {}]   ;;  %s2429_s7 = inlined_call_operand.hbm [shape: f32[1,64], index: 7, kind: input, shape index: {}]   ;;  %s2430_s8 = inlined_call_operand.vmem [shape: f32[2,16,64], index: 8, kind: output, shape index: {0}]   ;;  %s2431_s9 = inlined_call_operand.vmem [shape: f32[2,16,64], index: 9, kind: output, shape index: {1}]  }
   0x1   :  { %16 = vsyncpa [#allocation7], 0  ;;  %s2107_s30 = smov 0  }
   0x2 LB: > { %s2113_s10 = sadd.s32 4294967295, %s2047_s30   ;;  %p1603_p0 = scmp.ge.s32.totalorder %s2047_s30, 1  ;;  %s2047_s30 = sphi %s2107_s30, %s22_s30  }
   0x3   : > { %p252_p1 = scmp.lt.s32.totalorder %s2047_s30, 3  ;;  %p2432_p2 = scmp.eq.s32.totalorder %s2113_s10, 0 }
   0x4   : > { %s2049_s12 = smov [#allocation6]   ;;  %s2050_s14 = smov [#allocation4]  }
   0x5   : > { %p2118_p3 = pnand %p1603_p0, %p252_p1  ;;  %s280_s13 = sshll.u32 %s2049_s12, 4  ;;  %s281_s13 = int_to_ptr.vmem [resolvable:$true] %s280_s13 }
   0x6   : > { %s267_s15 = sshll.u32 %s2050_s14, 4  ;;  %s2051_s17 = smov [#allocation8]   ;;  %s2130_s15 = int_to_ptr.vmem [resolvable:$true] %s267_s15 }
   0x7   : > { %s2434_s11 = scalar_select %p2118_p3, 1, 0 }
   0x8   : > { %p1873_p4 = pneg %p2118_p3  ;;  %s303_s18 = sshll.u32 %s2051_s17, 4  ;;  %s2132_s18 = int_to_ptr.vmem [resolvable:$true] %s303_s18 }
   0x9   : > { %s1949_s21 = scalar_lea.hbm %s2425_s3, 32 }
   0xa   : > { %p2126_p5 = pnand %p2432_p2, %p1873_p4  ;;  %p1950_p6 = scmp.ne.s32.totalorder %s2425_s3, %s1949_s21 }
   0xb   : > { %p1956_p10 = scmp.lt.u32.totalorder %s1949_s21, %s2425_s3 }
   0xc   : > { %p2142_p7 = pneg %p2126_p5 }
   0xe   : > { %p1952_p8 = pnand %p2142_p7, %p1950_p6 }
  0x10   : > { %p1953_p9 = pneg %p1952_p8 }
  0x12   : > { %p1958_p11 = pnand %p1956_p10, %p1953_p9 }
  0x14   : > { %1961 = shalt.err (!%p1958_p11)
}
  0x15   : > { %s1962_s27 = scalar_lea.vmem %s281_s13, 32  ;;  %p1970_p1 = scmp.lt.s32.totalorder %s281_s13, %s281_s13 }
  0x16   : > { %p1963_p12 = scmp.ne.s32.totalorder %s281_s13, %s1962_s27  ;;  %p1971_p4 = scmp.lt.s32.totalorder %s1962_s27, %s1962_s27 }
  0x18   : > { %p1965_p13 = pnand %p1963_p12, %p2142_p7  ;;  %p1972_p2 = por %p1971_p4, %p1970_p1 }
  0x1a   : > { %p1966_p0 = pneg %p1965_p13 }
  0x1c   : > { %p1973_p3 = pnand %p1972_p2, %p1966_p0 }
  0x1e   : > { %1976 = shalt.err (!%p1973_p3)
}
  0x1f   : > { %s2052_s28 = smov 16   ;;  %s2053_s29 = smov 1  }
  0x20   : > { %1879 = dma.hbm_to_vmem [thread:$0]  (!%p2126_p5), %s2425_s3, 32, %s281_s13, [#allocation7], %s2052_s28, %s2052_s28, %s2053_s29  }
  0x21   : > { %s1977_s20 = scalar_lea.hbm %s2424_s2, 32 }
  0x22   : > { %p1978_p6 = scmp.ne.s32.totalorder %s2424_s2, %s1977_s20  ;;  %p1984_p8 = scmp.lt.u32.totalorder %s1977_s20, %s2424_s2 }
  0x24   : > { %p1980_p2 = pnand %p1978_p6, %p2142_p7 }
  0x26   : > { %p1981_p3 = pneg %p1980_p2 }
  0x28   : > { %p1986_p9 = pnand %p1984_p8, %p1981_p3 }
  0x2a   : > { %1989 = shalt.err (!%p1986_p9)
}
  0x2b   : > { %s1990_s13 = scalar_lea.vmem %s2130_s15, 32  ;;  %p1998_p13 = scmp.lt.s32.totalorder %s2130_s15, %s2130_s15 }
  0x2c   : > { %p1991_p10 = scmp.ne.s32.totalorder %s2130_s15, %s1990_s13  ;;  %p1999_p0 = scmp.lt.s32.totalorder %s1990_s13, %s1990_s13 }
  0x2e   : > { %p1993_p11 = pnand %p1991_p10, %p2142_p7  ;;  %p2000_p1 = por %p1999_p0, %p1998_p13 }
  0x30   : > { %p1994_p12 = pneg %p1993_p11 }
  0x32   : > { %p2001_p4 = pnand %p2000_p1, %p1994_p12 }
  0x34   : > { %2004 = shalt.err (!%p2001_p4)
}
  0x35   : > { %1876 = dma.hbm_to_vmem [thread:$0]  (!%p2126_p5), %s2424_s2, 32, %s2130_s15, [#allocation5], %s2052_s28, %s2052_s28, %s2053_s29  }
  0x36   : > { %s2005_s17 = scalar_lea.hbm %s2429_s7, 16 }
  0x37   : > { %p2006_p6 = scmp.ne.s32.totalorder %s2429_s7, %s2005_s17  ;;  %p2012_p8 = scmp.lt.u32.totalorder %s2005_s17, %s2429_s7 }
  0x39   : > { %p2008_p2 = pnand %p2006_p6, %p2142_p7 }
  0x3b   : > { %p2009_p3 = pneg %p2008_p2 }
  0x3d   : > { %p2014_p9 = pnand %p2012_p8, %p2009_p3 }
  0x3f   : > { %2017 = shalt.err (!%p2014_p9)
}
  0x40   : > { %s2018_s15 = scalar_lea.vmem %s2132_s18, 16  ;;  %s2025_s28 = scalar_lea.vmem %s2132_s18, 32 }
  0x41   : > { %p2019_p10 = scmp.ne.s32.totalorder %s2132_s18, %s2018_s15  ;;  %p2026_p13 = scmp.lt.s32.totalorder %s2132_s18, %s2132_s18 }
  0x42   : > { %p2027_p0 = scmp.lt.s32.totalorder %s2025_s28, %s2018_s15 }
  0x43   : > { %p2021_p11 = pnand %p2019_p10, %p2142_p7 }
  0x44   : > { %p2028_p1 = por %p2027_p0, %p2026_p13 }
  0x45   : > { %p2022_p12 = pneg %p2021_p11 }
  0x47   : > { %p2029_p4 = pnand %p2028_p1, %p2022_p12 }
  0x49   : > { %2032 = shalt.err (!%p2029_p4)
}
  0x4a   : > { %1882 = dma.hbm_to_vmem [thread:$0]  (!%p2126_p5), %s2429_s7, 16, %s2132_s18, [#allocation7]  }
  0x4b   : > { %p2437_p6 = scmp.ne.s32.totalorder %s2434_s11, 0 }
  0x4c   : > { %p2438_p7 = scmp.eq.s32.totalorder (!%p2437_p6), %s2113_s10, 0 }
  0x4d   : > { %324 = sbr.rel (%p2437_p6) target bundleno = 891 (0x37b), region = 52 }
  0x54   : > { %2038 = dma.done.wait (%p2438_p7), [#allocation5], 32   ;;  %p2439_p2 = pmov %p2438_p7 }
  0x56   : > { %2040 = vsyncadd (%p2439_p2), [#allocation5], 4294967264  ;;  %p2440_p3 = pmov %p2439_p2 }
  0x57   : > { %p2441_p8 = pmov %p2439_p2 }
  0x58   : > { %2042 = dma.done.wait (%p2440_p3), [#allocation7], 48  }
  0x59   : > { %2044 = vsyncadd (%p2441_p8), [#allocation7], 4294967248  ;;  %p373_p9 = scmp.lt.s32.totalorder %s2113_s10, 1  ;;  %vm389_vm0 = vcmask 257024   ;;  %v2054_v0 = vmov 0.0   ;;  %vm2055_vm1 = vmmov 0  }
  0x5a   : > { %1765 = vmatprep.subr.bf16.mxu0 %v2054_v0  ;;  %1769 = vmatprep.mubr.msk.bf16.mxu0 %vm2055_vm1, %v2054_v0  ;;  %vm392_vm2 = vcmask 254976   ;;  %v2056_v1 = vmov 0   ;;  %vm398_vm3 = vcmask 1040384   ;;  %v1905_v2 = vld [vmem:[%s2423_s1] sm:$0xff]   ;;  %vm399_vm4 = vcmask 1044484   ;;  %v1906_v3 = vld [vmem:[%s2423_s1 + $0x8] sm:$0xff]  }
  0x5b   : > { %1773 = vmatprep.subr.bf16.mxu1 %v2054_v0  ;;  %s2445_s10 = smov (!%p373_p9, %s2113_s10), 1  ;;  %390 = vst.msk [vmem:[#allocation2] sm:$0xf] %vm389_vm0, %v2056_v1  ;;  %391 = vst.msk [vmem:[#allocation2 + $0x4] sm:$0xf] %vm389_vm0, %v2056_v1  ;;  %1777 = vmatprep.mubr.msk.bf16.mxu1 %vm2055_vm1, %v2054_v0  ;;  %vm409_vm5 = vcmask 257025  }
  0x5c   : > { %393 = vst.msk [vmem:[#allocation2 + $0x8] sm:$0x3] %vm392_vm2, %v2056_v1  ;;  %s1722_s11 = sshll.u32 %s2445_s10, 3  ;;  %1766 = vmatpush3.bf16.msra.mxu0 %v1905_v2  ;;  %vm2238_vm6 = vmor %vm398_vm3, %vm399_vm4  ;;  %v1908_v9 = vld [vmem:[%s2423_s1 + $0x10] sm:$0xff]   ;;  %vm412_vm7 = vcmask 253952   ;;  %v1909_v11 = vld [vmem:[%s2423_s1 + $0x18] sm:$0xff]  }
  0x5d   : > { %s377_s24 = scalar_lea.vmem %s2422_s0, %s1722_s11  ;;  %1767 = vmatprep.subr.bf16.mxu0 %v2054_v0  ;;  %1774 = vmatpush3.bf16.msra.mxu1 %v1908_v9  ;;  %vm437_vm8 = vcmask 261120   ;;  %vm502_vm9 = vsmask.f32 7424  ;;  %v1912_v15 = vld [vmem:[%s2423_s1 + $0x20] sm:$0xff]   ;;  %vm593_vm10 = vcmask 1046528   ;;  %v1913_v24 = vld [vmem:[%s2423_s1 + $0x28] sm:$0xff]  }
  0x5e   : > { %v394_v4 = vld [vmem:[%s377_s24] sm:$0xf]  ;;  %v395_v5 = vld [vmem:[%s377_s24 + $0x4] sm:$0xf]  ;;  %1775 = vmatprep.subr.bf16.mxu1 %v2054_v0  ;;  %vm675_vm11 = vsmask.f32 6400 }
  0x5f   : > { %v401_v7 = vrot.slane %v394_v4, 7  ;;  %v403_v8 = vrot.slane %v395_v5, 7  ;;  %vm771_vm12 = vcmask 1045504   ;;  %v1916_v35 = vld [vmem:[%s2423_s1 + $0x30] sm:$0xff]   ;;  %v1920_v41 = vld [vmem:[%s2423_s1 + $0x40] sm:$0xff]   ;;  %v1917_v44 = vld [vmem:[%s2423_s1 + $0x38] sm:$0xff]  }
  0x60   : > { %1768 = vmatpush3.bf16.msra.mxu0 %v1906_v3  ;;  %v1921_v48 = vld [vmem:[%s2423_s1 + $0x48] sm:$0xff]   ;;  %v1924_v53 = vld [vmem:[%s2423_s1 + $0x50] sm:$0xff]   ;;  %v1925_v54 = vld [vmem:[%s2423_s1 + $0x58] sm:$0xff]   ;;  %s1723_s22 = sshll.u32 %s2445_s10, 4  ;;  %vm1413_vm13 = vcmask 523264  }
  0x61   : > { %v402_v10 = vrot.slane %v401_v7, 4  ;;  %410 = vst.msk [vmem:[#allocation2] sm:$0xe] %vm409_vm5, %v401_v7  ;;  %v405_v12 = vrot.slane %v403_v8, 4  ;;  %1781 = vmatprep.subr.bf16.mxu0 %v2054_v0  ;;  %1776 = vmatpush3.bf16.msra.mxu1 %v1909_v11  ;;  %v1927_v55 = vld [vmem:[%s2423_s1 + $0x60] sm:$0xff]   ;;  %v1929_v56 = vld [vmem:[%s2423_s1 + $0x68] sm:$0xff]   ;;  %s382_s11 = scalar_lea.vmem %s2430_s8, %s1723_s22  ;;  %s387_s24 = scalar_lea.vmem %s2431_s9, %s1723_s22 }
  0x62   : > { %1789 = vmatprep.subr.bf16.mxu1 %v2054_v0  ;;  %v1710_v6 = vld [vmem:[%s2427_s5] ss:$0 sm:$0xff] }
  0x63   : > { %v404_v13 = vsel %vm2238_vm6, %v402_v10, %v403_v8  ;;  %413 = vst.msk [vmem:[#allocation2 + $0x8] sm:$0x1] %vm412_vm7, %v405_v12 }
  0x64   : > { %411 = vst.msk [vmem:[#allocation2 + $0x4] sm:$0xf] %vm389_vm0, %v404_v13 }
  0x6a   : > { %v1911_v14 = vld [vmem:[#allocation2 + $0x8] ss:$0 sps:$4 sm:$0x11]  }
  0x6b   : > { %v1907_v16 = vld [vmem:[#allocation2] sm:$0xff]   ;;  %v511_v18 = vshll.u32 %v1911_v14, 16  ;;  %v1915_v20 = vld [vmem:[#allocation2 + $0x8] ss:$0 sps:$4 sm:$0x11]  }
  0x6c   : > { %v1910_v17 = vld [vmem:[#allocation2] sm:$0xff]   ;;  %1770 = vmatmul.mubr.msk.bf16.vlgmr.msra.gmra.mrb[0].mxu0 %vm437_vm8, %v1907_v16  ;;  %v595_v26 = vrot.slane %v1915_v20, 1  ;;  %v1919_v29 = vld [vmem:[#allocation2 + $0x8] ss:$0 sps:$4 sm:$0x33]  }
  0x6d   : > { %v1914_v19 = vld [vmem:[#allocation2] sm:$0xfe]   ;;  %v504_v21 = vshrl.u32 %v1910_v17, 16  ;;  %v506_v22 = vshll.u32 %v1910_v17, 16  ;;  %v513_v23 = vrot.slane %v511_v18, 1  ;;  %1782 = vmatpush3.bf16.msra.mxu0 %v1912_v15  ;;  %1785 = vmatprep.mubr.msk.bf16.mxu0 %vm2055_vm1, %v2054_v0  ;;  %v685_v36 = vshrl.u32 %v1919_v29, 16 }
  0x6e   : > { %1783 = vmatprep.subr.bf16.mxu0 %v2054_v0  ;;  %v594_v25 = vrot.slane %v1914_v19, 1  ;;  %v1918_v27 = vld [vmem:[#allocation2] sm:$0xfe]   ;;  %v688_v37 = vshll.u32 %v1919_v29, 16 }
  0x6f   : > { %v508_v28 = vrot.slane %v506_v22, 1  ;;  %v677_v30 = vshrl.u32 %v1918_v27, 16  ;;  %v680_v31 = vshll.u32 %v1918_v27, 16  ;;  %v1922_v32 = vld [vmem:[#allocation2] sm:$0xfc]   ;;  %v687_v45 = vrot.slane %v685_v36, 1 }
  0x70   : > { %v596_v34 = vsel %vm593_vm10, %v594_v25, %v595_v26  ;;  %v1923_v38 = vld [vmem:[#allocation2 + $0x8] ss:$0 sps:$4 sm:$0x33]   ;;  %v772_v42 = vrot.slane %v1922_v32, 2  ;;  %v690_v46 = vrot.slane %v688_v37, 2 }
  0x71   : > { %v509_v33 = vor.u32 %v508_v28, %v504_v21  ;;  %1784 = vmatpush3.bf16.msra.mxu0 %v1913_v24  ;;  %v679_v39 = vrot.slane %v677_v30, 1  ;;  %v682_v40 = vrot.slane %v680_v31, 2  ;;  %v773_v47 = vrot.slane %v1923_v38, 2  ;;  %v1658_v31 = vld [vmem:[#allocation4] ss:$0 sm:$0xff] }
  0x72   : > { %1797 = vmatprep.subr.bf16.mxu0 %v2054_v0  ;;  %v691_v50 = vor.u32 %v690_v46, %v687_v45 }
  0x73   : > { %v514_v43 = vsel %vm502_vm9, %v509_v33, %v513_v23  ;;  %v683_v49 = vor.u32 %v682_v40, %v679_v39  ;;  %v774_v52 = vsel %vm771_vm12, %v772_v42, %v773_v47  ;;  %v1659_v33 = vld [vmem:[#allocation6] ss:$0 sm:$0xff] }
  0x74   : > { %1778 = vmatmul.mubr.msk.bf16.vlgmr.msra.gmra.mrb[0].mxu1 %vm437_vm8, %v514_v43  ;;  %1786 = vmatmul.mubr.msk.bf16.vlgmr.msra.gmra.mrb[4].mxu0 %vm437_vm8, %v596_v34 }
  0x75   : > { %1790 = vmatpush3.bf16.msra.mxu1 %v1916_v35  ;;  %1793 = vmatprep.mubr.msk.bf16.mxu1 %vm2055_vm1, %v2054_v0  ;;  %v692_v51 = vsel %vm675_vm11, %v683_v49, %v691_v50 }
  0x76   : > { %1791 = vmatprep.subr.bf16.mxu1 %v2054_v0  ;;  %1798 = vmatpush3.bf16.msra.mxu0 %v1920_v41 }
  0x77   : > { %1799 = vmatprep.subr.bf16.mxu0 %v2054_v0  ;;  %1801 = vmatprep.mubr.msk.bf16.mxu0 %vm2055_vm1, %v2054_v0 }
  0x79   : > { %1792 = vmatpush3.bf16.msra.mxu1 %v1917_v44 }
  0x7a   : > { %1800 = vmatpush3.bf16.msra.mxu0 %v1921_v48  ;;  %1805 = vmatprep.subr.bf16.mxu1 %v2054_v0  ;;  %v1928_v48 = vld [vmem:[%s2423_s1 + $0x70] sm:$0xff]  }
  0x7b   : > { %1813 = vmatprep.subr.bf16.mxu0 %v2054_v0 }
  0x7c   : > { %1794 = vmatmul.mubr.msk.bf16.vlgmr.msra.gmra.mrb[4].mxu1 %vm437_vm8, %v692_v51 }
  0x7d   : > { %1802 = vmatmul.mubr.msk.bf16.vlgmr.msra.gmra.mrb[8].mxu0 %vm437_vm8, %v774_v52  ;;  %1809 = vmatprep.mubr.msk.bf16.mxu1 %vm2055_vm1, %v2054_v0 }
  0x7e   : > { %1817 = vmatprep.mubr.msk.bf16.mxu0 %vm2055_vm1, %v2054_v0  ;;  %1806 = vmatpush3.bf16.msra.mxu1 %v1924_v53  ;;  %v1930_v53 = vld [vmem:[%s2423_s1 + $0x78] sm:$0xff]  }
  0x7f   : > { %1807 = vmatprep.subr.bf16.mxu1 %v2054_v0  ;;  %1814 = vmatpush3.bf16.msra.mxu0 %v1927_v55 }
  0x80   : > { %1815 = vmatprep.subr.bf16.mxu0 %v2054_v0 }
  0x82   : > { %1808 = vmatpush3.bf16.msra.mxu1 %v1925_v54 }
  0x83   : > { %1821 = vmatprep.subr.bf16.mxu1 %v2054_v0  ;;  %1816 = vmatpush3.bf16.msra.mxu0 %v1929_v56 }
  0x84   : > { %1829 = vmatprep.subr.bf16.mxu0 %v2054_v0 }
 0x13f   : > { %v475_v57 = vpop.f32.mrb[0].mxu0 }
 0x140   : > { %482 = vst.msk [vmem:[#allocation3] sm:$0xff] %vm437_vm8, %v475_v57  ;;  %v1771_v58 = vpop.f32.mrb[1].mxu0 }
 0x141   : > { %v478_v59 = vpop.f32.mrb[2].mxu0 }
 0x142   : > { %483 = vst.msk [vmem:[#allocation3 + $0x8] sm:$0xff] %vm437_vm8, %v478_v59  ;;  %v1772_v60 = vpop.f32.mrb[3].mxu0 }
 0x147   : > { %v484_v61 = vld [vmem:[#allocation3] sm:$0xff]  ;;  %v564_v62 = vpop.f32.mrb[0].mxu1  ;;  %v646_v63 = vpop.f32.mrb[4].mxu0 }
 0x148   : > { %v571_v1 = vadd.f32 %v564_v62, %v484_v61  ;;  %v1779_v2 = vpop.f32.mrb[1].mxu1  ;;  %v1787_v3 = vpop.f32.mrb[5].mxu0 }
 0x149   : > { %v485_v4 = vld [vmem:[#allocation3 + $0x8] sm:$0xff]  ;;  %v567_v5 = vpop.f32.mrb[2].mxu1  ;;  %v649_v7 = vpop.f32.mrb[6].mxu0  ;;  %v1935_v2 = vld [vmem:[%s2423_s1 + $0x80] sm:$0xff]  }
 0x14a   : > { %573 = vst.msk [vmem:[#allocation3] sm:$0xff] %vm437_vm8, %v571_v1  ;;  %v572_v8 = vadd.f32 %v567_v5, %v485_v4  ;;  %v1780_v9 = vpop.f32.mrb[3].mxu1  ;;  %v1788_v10 = vpop.f32.mrb[7].mxu0  ;;  %v1936_v3 = vld [vmem:[%s2423_s1 + $0x90] sm:$0xff]  }
 0x14c   : > { %574 = vst.msk [vmem:[#allocation3 + $0x8] sm:$0xff] %vm437_vm8, %v572_v8 }
 0x14f   : > { %v742_v11 = vpop.f32.mrb[4].mxu1 }
 0x150   : > { %v1795_v12 = vpop.f32.mrb[5].mxu1  ;;  %v824_v13 = vpop.f32.mrb[8].mxu0 }
 0x151   : > { %v575_v14 = vld [vmem:[#allocation3] sm:$0xff]  ;;  %v745_v15 = vpop.f32.mrb[6].mxu1  ;;  %v1803_v16 = vpop.f32.mrb[9].mxu0 }
 0x152   : > { %v653_v17 = vadd.f32 %v646_v63, %v575_v14  ;;  %v1796_v18 = vpop.f32.mrb[7].mxu1  ;;  %v827_v19 = vpop.f32.mrb[10].mxu0 }
 0x153   : > { %v576_v20 = vld [vmem:[#allocation3 + $0x8] sm:$0xff]  ;;  %v1804_v21 = vpop.f32.mrb[11].mxu0 }
 0x154   : > { %655 = vst.msk [vmem:[#allocation3] sm:$0xff] %vm437_vm8, %v653_v17  ;;  %v654_v22 = vadd.f32 %v649_v7, %v576_v20  ;;  %v1937_v17 = vld [vmem:[%s2423_s1 + $0x88] sm:$0xff]   ;;  %v1938_v18 = vld [vmem:[%s2423_s1 + $0x98] sm:$0xff]  }
 0x156   : > { %656 = vst.msk [vmem:[#allocation3 + $0x8] sm:$0xff] %vm437_vm8, %v654_v22 }
 0x15b   : > { %v657_v23 = vld [vmem:[#allocation3] sm:$0xff] }
 0x15c   : > { %v749_v24 = vadd.f32 %v742_v11, %v657_v23 }
 0x15d   : > { %v658_v25 = vld [vmem:[#allocation3 + $0x8] sm:$0xff] }
 0x15e   : > { %751 = vst.msk [vmem:[#allocation3] sm:$0xff] %vm437_vm8, %v749_v24  ;;  %v750_v26 = vadd.f32 %v745_v15, %v658_v25  ;;  %v1943_v25 = vld [vmem:[%s2426_s4] sm:$0xff]  }
 0x160   : > { %752 = vst.msk [vmem:[#allocation3 + $0x8] sm:$0xff] %vm437_vm8, %v750_v26  ;;  %v1944_v26 = vld [vmem:[%s2428_s6] sm:$0xff]  }
 0x165   : > { %v753_v27 = vld [vmem:[#allocation3] sm:$0xff] }
 0x166   : > { %v831_v28 = vadd.f32 %v824_v13, %v753_v27  ;;  %v1945_v27 = vld [vmem:[%s2426_s4 + $0x8] sm:$0xff]  }
 0x167   : > { %v754_v29 = vld [vmem:[#allocation3 + $0x8] sm:$0xff] }
 0x168   : > { %833 = vst.msk [vmem:[#allocation3] sm:$0xff] %vm437_vm8, %v831_v28  ;;  %v832_v30 = vadd.f32 %v827_v19, %v754_v29  ;;  %v1946_v28 = vld [vmem:[%s2428_s6 + $0x8] sm:$0xff]  }
 0x16a   : > { %834 = vst.msk [vmem:[#allocation3 + $0x8] sm:$0xff] %vm437_vm8, %v832_v30 }
 0x16f   : > { %v835_v32 = vld [vmem:[#allocation3] sm:$0xff] }
 0x170   : > { %v844_v34 = vmul.f32 %v1658_v31, %v835_v32 }
 0x171   : > { %v836_v35 = vld [vmem:[#allocation3 + $0x8] sm:$0xff] }
 0x172   : > { %v853_v36 = vadd.f32 %v1659_v33, %v844_v34  ;;  %v845_v37 = vmul.f32 %v1658_v31, %v836_v35 }
 0x174   : > { %v855_v38 = vmax.f32 %v853_v36, 0.0  ;;  %v854_v39 = vadd.f32 %v1659_v33, %v845_v37 }
 0x176   : > { %v1725_v40 = vpack.c.bf16 %v855_v38, %v855_v38  ;;  %v856_v41 = vmax.f32 %v854_v39, 0.0 }
 0x178   : > { %v863_v42 = vrot.slane %v1725_v40, 7  ;;  %v1726_v43 = vpack.c.bf16 %v856_v41, %v856_v41 }
 0x17a   : > { %v864_v44 = vrot.slane %v863_v42, 4  ;;  %871 = vst.msk [vmem:[#allocation2] sm:$0xe] %vm409_vm5, %v863_v42  ;;  %v865_v45 = vrot.slane %v1726_v43, 7 }
 0x17c   : > { %v866_v46 = vsel %vm2238_vm6, %v864_v44, %v865_v45  ;;  %v867_v47 = vrot.slane %v865_v45, 4 }
 0x17d   : > { %872 = vst.msk [vmem:[#allocation2 + $0x4] sm:$0xf] %vm389_vm0, %v866_v46 }
 0x17e   : > { %873 = vst.msk [vmem:[#allocation2 + $0x8] sm:$0x1] %vm412_vm7, %v867_v47 }
 0x184   : > { %v1926_v49 = vld [vmem:[#allocation2] sm:$0xff]  }
 0x185   : > { %v1931_v50 = vld [vmem:[#allocation2] sm:$0xff]   ;;  %v1932_v51 = vld [vmem:[#allocation2 + $0x8] ss:$0 sps:$4 sm:$0x11]   ;;  %1810 = vmatmul.mubr.msk.bf16.vlgmr.msra.gmra.mrb[8].mxu1 %vm437_vm8, %v1926_v49 }
 0x186   : > { %v1933_v52 = vld [vmem:[#allocation2] sm:$0xfe]   ;;  %1822 = vmatpush3.bf16.msra.mxu1 %v1928_v48  ;;  %v965_v54 = vshll.u32 %v1931_v50, 16  ;;  %v970_v55 = vshll.u32 %v1932_v51, 16  ;;  %1825 = vmatprep.mubr.msk.bf16.mxu1 %vm2055_vm1, %v2054_v0  ;;  %v963_v57 = vshrl.u32 %v1931_v50, 16 }
 0x187   : > { %v1934_v56 = vld [vmem:[#allocation2 + $0x8] ss:$0 sps:$4 sm:$0x11]   ;;  %1823 = vmatprep.subr.bf16.mxu1 %v2054_v0  ;;  %v1052_v60 = vrot.slane %v1933_v52, 1  ;;  %v1939_v62 = vld [vmem:[#allocation2] sm:$0xfe]  }
 0x188   : > { %v967_v58 = vrot.slane %v965_v54, 1  ;;  %v972_v59 = vrot.slane %v970_v55, 1  ;;  %v1053_v61 = vrot.slane %v1934_v56, 1  ;;  %v1940_v63 = vld [vmem:[#allocation2 + $0x8] ss:$0 sps:$4 sm:$0x33]  }
 0x189   : > { %v1134_v4 = vshrl.u32 %v1939_v62, 16  ;;  %v1137_v5 = vshll.u32 %v1939_v62, 16  ;;  %v1142_v7 = vshrl.u32 %v1940_v63, 16  ;;  %v1145_v8 = vshll.u32 %v1940_v63, 16  ;;  %v1941_v9 = vld [vmem:[#allocation2] sm:$0xfc]  }
 0x18a   : > { %1824 = vmatpush3.bf16.msra.mxu1 %v1930_v53  ;;  %v968_v1 = vor.u32 %v967_v58, %v963_v57  ;;  %v1054_v11 = vsel %vm593_vm10, %v1052_v60, %v1053_v61  ;;  %v1942_v14 = vld [vmem:[#allocation2 + $0x8] ss:$0 sps:$4 sm:$0x33]   ;;  %v1228_v21 = vrot.slane %v1941_v9, 2 }
 0x18b   : > { %1837 = vmatprep.subr.bf16.mxu1 %v2054_v0  ;;  %v1136_v12 = vrot.slane %v1134_v4, 1  ;;  %v1139_v13 = vrot.slane %v1137_v5, 2  ;;  %v1144_v15 = vrot.slane %v1142_v7, 1  ;;  %v1147_v16 = vrot.slane %v1145_v8, 2 }
 0x18c   : > { %v973_v10 = vsel %vm502_vm9, %v968_v1, %v972_v59  ;;  %v1229_v22 = vrot.slane %v1942_v14, 2  ;;  %v1706_v1 = vld [vmem:[#allocation4 + $0x1] ss:$0 sm:$0xff] }
 0x18d   : > { %1818 = vmatmul.mubr.msk.bf16.vlgmr.msra.gmra.mrb[12].mxu0 %vm437_vm8, %v973_v10  ;;  %1826 = vmatmul.mubr.msk.bf16.vlgmr.msra.gmra.mrb[12].mxu1 %vm437_vm8, %v1054_v11  ;;  %v1140_v19 = vor.u32 %v1139_v13, %v1136_v12  ;;  %v1148_v20 = vor.u32 %v1147_v16, %v1144_v15 }
 0x18e   : > { %1830 = vmatpush3.bf16.msra.mxu0 %v1935_v2  ;;  %1838 = vmatpush3.bf16.msra.mxu1 %v1936_v3  ;;  %v1230_v24 = vsel %vm771_vm12, %v1228_v21, %v1229_v22  ;;  %v1707_v3 = vld [vmem:[#allocation6 + $0x1] ss:$0 sm:$0xff] }
 0x18f   : > { %1831 = vmatprep.subr.bf16.mxu0 %v2054_v0  ;;  %1839 = vmatprep.subr.bf16.mxu1 %v2054_v0  ;;  %v1149_v23 = vsel %vm675_vm11, %v1140_v19, %v1148_v20 }
 0x190   : > { %1833 = vmatprep.mubr.msk.bf16.mxu0 %vm2055_vm1, %v2054_v0  ;;  %1841 = vmatprep.mubr.msk.bf16.mxu1 %vm2055_vm1, %v2054_v0 }
 0x192   : > { %1832 = vmatpush3.bf16.msra.mxu0 %v1937_v17  ;;  %1840 = vmatpush3.bf16.msra.mxu1 %v1938_v18 }
 0x193   : > { %1845 = vmatprep.subr.bf16.mxu0 %v2054_v0  ;;  %1853 = vmatprep.subr.bf16.mxu1 %v2054_v0 }
 0x195   : > { %1834 = vmatmul.mubr.msk.bf16.vlgmr.msra.gmra.mrb[16].mxu0 %vm437_vm8, %v1149_v23  ;;  %1842 = vmatmul.mubr.msk.bf16.vlgmr.msra.gmra.mrb[16].mxu1 %vm437_vm8, %v1230_v24  ;;  %v1716_v24 = vld [vmem:[#allocation8] ss:$0 sm:$0xff] }
 0x196   : > { %1849 = vmatprep.mubr.msk.bf16.mxu0 %vm2055_vm1, %v2054_v0  ;;  %1857 = vmatprep.mubr.msk.bf16.mxu1 %vm2055_vm1, %v2054_v0 }
 0x197   : > { %1846 = vmatpush3.bf16.msra.mxu0 %v1943_v25  ;;  %1854 = vmatpush3.bf16.msra.mxu1 %v1944_v26 }
 0x198   : > { %1847 = vmatprep.subr.bf16.mxu0 %v2054_v0  ;;  %1855 = vmatprep.subr.bf16.mxu1 %v2054_v0 }
 0x19b   : > { %1848 = vmatpush3.bf16.msra.mxu0 %v1945_v27  ;;  %1856 = vmatpush3.bf16.msra.mxu1 %v1946_v28 }
 0x258   : > { %v935_v29 = vpop.f32.mrb[8].mxu1 }
 0x259   : > { %942 = vst.msk [vmem:[#allocation3] sm:$0xff] %vm437_vm8, %v935_v29  ;;  %v1811_v30 = vpop.f32.mrb[9].mxu1 }
 0x25a   : > { %v938_v31 = vpop.f32.mrb[10].mxu1 }
 0x25b   : > { %943 = vst.msk [vmem:[#allocation3 + $0x8] sm:$0xff] %vm437_vm8, %v938_v31  ;;  %v1812_v32 = vpop.f32.mrb[11].mxu1 }
 0x260   : > { %v944_v33 = vld [vmem:[#allocation3] sm:$0xff]  ;;  %v1023_v34 = vpop.f32.mrb[12].mxu0  ;;  %v1104_v35 = vpop.f32.mrb[12].mxu1 }
 0x261   : > { %v1030_v36 = vadd.f32 %v1023_v34, %v944_v33  ;;  %v1819_v37 = vpop.f32.mrb[13].mxu0  ;;  %v1827_v38 = vpop.f32.mrb[13].mxu1 }
 0x262   : > { %v945_v39 = vld [vmem:[#allocation3 + $0x8] sm:$0xff]  ;;  %v1026_v40 = vpop.f32.mrb[14].mxu0  ;;  %v1107_v41 = vpop.f32.mrb[14].mxu1 }
 0x263   : > { %1032 = vst.msk [vmem:[#allocation3] sm:$0xff] %vm437_vm8, %v1030_v36  ;;  %v1031_v0 = vadd.f32 %v1026_v40, %v945_v39  ;;  %v1820_v42 = vpop.f32.mrb[15].mxu0  ;;  %v1828_v43 = vpop.f32.mrb[15].mxu1 }
 0x265   : > { %1033 = vst.msk [vmem:[#allocation3 + $0x8] sm:$0xff] %vm437_vm8, %v1031_v0 }
 0x268   : > { %v1199_v44 = vpop.f32.mrb[16].mxu0  ;;  %v1280_v45 = vpop.f32.mrb[16].mxu1 }
 0x269   : > { %v1835_v46 = vpop.f32.mrb[17].mxu0  ;;  %v1843_v47 = vpop.f32.mrb[17].mxu1 }
 0x26a   : > { %v1034_v48 = vld [vmem:[#allocation3] sm:$0xff]  ;;  %v1202_v49 = vpop.f32.mrb[18].mxu0  ;;  %v1283_v50 = vpop.f32.mrb[18].mxu1 }
 0x26b   : > { %v1111_v51 = vadd.f32 %v1104_v35, %v1034_v48  ;;  %v1836_v52 = vpop.f32.mrb[19].mxu0  ;;  %v1844_v53 = vpop.f32.mrb[19].mxu1 }
 0x26c   : > { %v1035_v54 = vld [vmem:[#allocation3 + $0x8] sm:$0xff] }
 0x26d   : > { %1113 = vst.msk [vmem:[#allocation3] sm:$0xff] %vm437_vm8, %v1111_v51  ;;  %v1112_v55 = vadd.f32 %v1107_v41, %v1035_v54 }
 0x26f   : > { %1114 = vst.msk [vmem:[#allocation3 + $0x8] sm:$0xff] %vm437_vm8, %v1112_v55 }
 0x274   : > { %v1115_v56 = vld [vmem:[#allocation3] sm:$0xff] }
 0x275   : > { %v1206_v57 = vadd.f32 %v1199_v44, %v1115_v56 }
 0x276   : > { %v1116_v58 = vld [vmem:[#allocation3 + $0x8] sm:$0xff] }
 0x277   : > { %1208 = vst.msk [vmem:[#allocation3] sm:$0xff] %vm437_vm8, %v1206_v57  ;;  %v1207_v59 = vadd.f32 %v1202_v49, %v1116_v58 }
 0x279   : > { %1209 = vst.msk [vmem:[#allocation3 + $0x8] sm:$0xff] %vm437_vm8, %v1207_v59 }
 0x27e   : > { %v1210_v60 = vld [vmem:[#allocation3] sm:$0xff] }
 0x27f   : > { %v1287_v61 = vadd.f32 %v1280_v45, %v1210_v60 }
 0x280   : > { %v1211_v62 = vld [vmem:[#allocation3 + $0x8] sm:$0xff] }
 0x281   : > { %1289 = vst.msk [vmem:[#allocation3] sm:$0xff] %vm437_vm8, %v1287_v61  ;;  %v1288_v63 = vadd.f32 %v1283_v50, %v1211_v62 }
 0x283   : > { %1290 = vst.msk [vmem:[#allocation3 + $0x8] sm:$0xff] %vm437_vm8, %v1288_v63 }
 0x288   : > { %v1291_v2 = vld [vmem:[#allocation3] sm:$0xff] }
 0x289   : > { %v1301_v4 = vmul.f32 %v1706_v1, %v1291_v2 }
 0x28a   : > { %v1292_v5 = vld [vmem:[#allocation3 + $0x8] sm:$0xff] }
 0x28b   : > { %v1311_v7 = vadd.f32 %v1707_v3, %v1301_v4  ;;  %v1302_v8 = vmul.f32 %v1706_v1, %v1292_v5 }
 0x28d   : > { %v1313_v9 = vmax.f32 %v1311_v7, 0.0  ;;  %v1312_v10 = vadd.f32 %v1707_v3, %v1302_v8 }
 0x28f   : > { %v1727_v11 = vpack.c.bf16 %v1313_v9, %v1313_v9  ;;  %v1314_v12 = vmax.f32 %v1312_v10, 0.0 }
 0x291   : > { %v1321_v13 = vrot.slane %v1727_v11, 7  ;;  %v1728_v14 = vpack.c.bf16 %v1314_v12, %v1314_v12 }
 0x293   : > { %v1322_v15 = vrot.slane %v1321_v13, 4  ;;  %1329 = vst.msk [vmem:[#allocation2] sm:$0xe] %vm409_vm5, %v1321_v13  ;;  %v1323_v16 = vrot.slane %v1728_v14, 7 }
 0x295   : > { %v1324_v17 = vsel %vm2238_vm6, %v1322_v15, %v1323_v16  ;;  %v1325_v18 = vrot.slane %v1323_v16, 4 }
 0x296   : > { %1330 = vst.msk [vmem:[#allocation2 + $0x4] sm:$0xf] %vm389_vm0, %v1324_v17 }
 0x297   : > { %1331 = vst.msk [vmem:[#allocation2 + $0x8] sm:$0x1] %vm412_vm7, %v1325_v18 }
 0x29d   : > { %v1947_v19 = vld [vmem:[#allocation2] sm:$0xfe]  }
 0x29e   : > { %v1948_v20 = vld [vmem:[#allocation2 + $0x8] ss:$0 sps:$4 sm:$0x11]   ;;  %v1354_v21 = vrot.slane %v1947_v19, 1 }
 0x29f   : > { %v1355_v22 = vrot.slane %v1948_v20, 1 }
 0x2a1   : > { %v1356_v23 = vsel %vm593_vm10, %v1354_v21, %v1355_v22 }
 0x2a2   : > { %1850 = vmatmul.mubr.msk.bf16.vlgmr.msra.gmra.mrb[20].mxu0 %vm437_vm8, %v1356_v23  ;;  %1858 = vmatmul.mubr.msk.bf16.vlgmr.msra.gmra.mrb[20].mxu1 %vm437_vm8, %v1356_v23 }
 0x375   : > { %v1406_v25 = vpop.f32.mrb[20].mxu0  ;;  %v1473_v26 = vpop.f32.mrb[20].mxu1 }
 0x376   : > { %v1407_v27 = vadd.f32 %v1710_v6, %v1406_v25  ;;  %v1474_v28 = vadd.f32 %v1716_v24, %v1473_v26  ;;  %v1851_v29 = vpop.f32.mrb[21].mxu0  ;;  %v1859_v30 = vpop.f32.mrb[21].mxu1 }
 0x377   : > { %v1409_v31 = vpop.f32.mrb[22].mxu0  ;;  %v1476_v32 = vpop.f32.mrb[22].mxu1 }
 0x378   : > { %1414 = vst.msk [vmem:[%s382_s11] sm:$0xff] %vm1413_vm13, %v1407_v27  ;;  %1480 = vst.msk [vmem:[%s387_s24] sm:$0xff] %vm1413_vm13, %v1474_v28  ;;  %v1410_v33 = vadd.f32 %v1710_v6, %v1409_v31  ;;  %v1477_v34 = vadd.f32 %v1716_v24, %v1476_v32  ;;  %v1852_v35 = vpop.f32.mrb[23].mxu0  ;;  %v1860_v36 = vpop.f32.mrb[23].mxu1 }
 0x37a   : > { %1415 = vst.msk [vmem:[%s382_s11 + $0x8] sm:$0xff] %vm1413_vm13, %v1410_v33  ;;  %1481 = vst.msk [vmem:[%s387_s24 + $0x8] sm:$0xff] %vm1413_vm13, %v1477_v34 }
 0x37b PF: > { %s22_s30 = sadd.s32 1, %s2047_s30  }
 0x37c   : > { %p19_p5 = scmp.ge.s32.totalorder %s22_s30, 4  }
 0x37e   :  { %21 = sbr.rel (!%p19_p5) target bundleno = 2 (0x2), region = 118 }
 0x385   :  { %1519 = vsyncpa [#allocation5], 1 }
 0x386   :  { %1521 = vsyncpa [#allocation5 + $0x1], 1 }
 0x387   :  { %1522 = vsyncpa [#allocation7], 1 }

// kernel: encoder_forward.3
= control target key start
LH: loop header
LB: loop body
LE: loop exit
PB: predicated region body
PF: predicated region fallthrough
CT: control target
= control target key end

     0   :  { %s3886_s21 = smov 0   ;;  %s3888_s22 = smov 0   ;;  %s4864_s0 = inlined_call_operand.vmem [shape: s32[2,1], index: 0, kind: input, shape index: {}]   ;;  %s4865_s1 = inlined_call_operand.vmem [shape: f32[2,16,64], index: 1, kind: input, shape index: {}]   ;;  %s4866_s2 = inlined_call_operand.vmem [shape: f32[2,16,64], index: 2, kind: input, shape index: {}]   ;;  %s4867_s3 = inlined_call_operand.vmem [shape: bf16[16,64], index: 3, kind: input, shape index: {}]   ;;  %s4868_s4 = inlined_call_operand.vmem [shape: bf16[16,64], index: 4, kind: input, shape index: {}]   ;;  %s4869_s5 = inlined_call_operand.vmem [shape: f32[2,16,16], index: 5, kind: output, shape index: {0}]   ;;  %s4870_s6 = inlined_call_operand.vmem [shape: f32[2,16,16], index: 6, kind: output, shape index: {1}]  }
   0x1   :  { %s3890_s23 = smov 0   ;;  %s3892_s24 = smov 0  }
   0x2   :  { %s3894_s25 = smov 0  }
   0x3 LB: > { %s3912_s26 = sadd.s32 4294967295, %s3839_s25   ;;  %s3915_s27 = sadd.s32 1, %s3839_s25   ;;  %s3839_s25 = sphi %s3894_s25, %s4880_s25   ;;  %s3835_s24 = sphi %s3892_s24, %s4879_s24   ;;  %s3831_s23 = sphi %s3890_s23, %s4878_s23   ;;  %s3827_s22 = sphi %s3888_s22, %s4877_s22   ;;  %s3823_s21 = sphi %s3886_s21, %s4876_s21  }
   0x4   : > { %s42_s28 = ssub.s32 %s3839_s25, %s3915_s27  ;;  %s45_s29 = sadd.s32 1, %s3835_s24 }
   0x5   : > { %p43_p0 = scmp.eq.s32.totalorder %s42_s28, 0  ;;  %p52_p1 = scmp.ne.s32.totalorder %s3835_s24, %s3831_s23 }
   0x6   : > { %p53_p2 = scmp.eq.s32.totalorder %s3839_s25, 0  ;;  %s68_s30 = ssub.s32 1, %s3839_s25 }
   0x7   : > { %s3925_s7 = scalar_select %p43_p0, %s3835_s24, %s45_s29  }
   0x8   : > { %p54_p3 = por %p53_p2, %p52_p1  ;;  %s69_s8 = ssub.s32 1, %s3915_s27 }
   0x9   : > { %4871 = sst [smem:[#allocation10_spill]] %s3925_s7  ;;  %s70_s9 = ssub.s32 %s68_s30, %s69_s8 }
   0xa   : > { %s73_s10 = sadd.s32 1, %s3827_s22  ;;  %p71_p4 = scmp.eq.s32.totalorder %s70_s9, 0 }
   0xb   : > { %p80_p5 = scmp.ne.s32.totalorder %s3827_s22, %s3823_s21  ;;  %p152_p6 = scmp.eq.s32.totalorder %s3912_s26, 1 }
   0xc   : > { %s3936_s11 = scalar_select %p71_p4, %s3827_s22, %s73_s10  }
   0xd   : > { %p3938_p7 = por %p80_p5, %p53_p2  ;;  %p3945_p8 = por %p152_p6, %p52_p1 }
   0xe   : > { %p3949_p9 = por %p152_p6, %p80_p5  ;;  %p3264_p10 = scmp.ge.s32.totalorder %s3839_s25, 2 }
  0x10   : > { %211 = sbr.rel (%p3264_p10) target bundleno = 37 (0x25), region = 28 }
  0x17   : > { %214 = sbr.rel (!%p54_p3) target bundleno = 30 (0x1e), region = 32  ;;  %s216_s15 = sand.u32 (%p54_p3), 1, %s3835_s24  }
  0x18   : > { %s3266_s16 = sshll.u32 (%p54_p3), %s3839_s25, 3  ;;  %s3265_s17 = sshll.u32 (%p54_p3), %s216_s15, 4 }
  0x19   : > { %s220_s20 = scalar_lea.vmem (%p54_p3), %s4865_s1, %s3266_s16  ;;  %s218_s28 = scalar_lea.vmem (%p54_p3), [#allocation6], %s3265_s17 }
  0x1a   : > { %v250_v0 = vld [vmem:[%s220_s20] sm:$0xff] (%p54_p3)  ;;  %v252_v1 = vld [vmem:[%s220_s20 + $0x10] sm:$0xff] (%p54_p3) }
  0x1b   : > { %251 = vst [vmem:[%s218_s28] sm:$0xff] (%p54_p3), %v250_v0  ;;  %253 = vst [vmem:[%s218_s28 + $0x8] sm:$0xff] (%p54_p3), %v252_v1 }
  0x1e PF: > { %259 = sbr.rel (!%p3938_p7) target bundleno = 37 (0x25), region = 70  ;;  %s261_s29 = sand.u32 (%p3938_p7), 1, %s3827_s22  }
  0x1f   : > { %s3268_s8 = sshll.u32 (%p3938_p7), %s68_s30, 3  ;;  %s3267_s9 = sshll.u32 (%p3938_p7), %s261_s29, 4 }
  0x20   : > { %s266_s15 = scalar_lea.vmem (%p3938_p7), %s4866_s2, %s3268_s8  ;;  %s263_s16 = scalar_lea.vmem (%p3938_p7), [#allocation7], %s3267_s9 }
  0x21   : > { %v296_v2 = vld [vmem:[%s266_s15] sm:$0xff] (%p3938_p7)  ;;  %v298_v3 = vld [vmem:[%s266_s15 + $0x10] sm:$0xff] (%p3938_p7) }
  0x22   : > { %297 = vst [vmem:[%s263_s16] sm:$0xff] (%p3938_p7), %v296_v2  ;;  %299 = vst [vmem:[%s263_s16 + $0x8] sm:$0xff] (%p3938_p7), %v298_v3 }
  0x25 PF: > { %p3269_p11 = scmp.ge.s32.totalorder %s3839_s25, 1  ;;  %p304_p12 = scmp.lt.s32.totalorder %s3839_s25, 3 }
  0x27   : > { %p305_p13 = pnand %p3269_p11, %p304_p12 }
  0x28   : > { %s311_s30 = sand.u32 (!%p305_p13), 1, %s3831_s23   ;;  %s318_s12 = sand.u32 (!%p305_p13), 1, %s3823_s21  }
  0x29   : > { %308 = sbr.rel (%p305_p13) target bundleno = 5777 (0x1691), region = 108  ;;  %s3270_s17 = sshll.u32 (!%p305_p13), %s311_s30, 4 }
  0x2a   : > { %s3271_s7 = sshll.u32 (!%p305_p13), %s318_s12, 4  ;;  %s3969_s18 = scalar_lea.vmem (!%p305_p13), [#allocation6], %s3270_s17 }
  0x2b   : > { %s3971_s19 = scalar_lea.vmem (!%p305_p13), [#allocation7], %s3271_s7  ;;  %s3973_s20 = scalar_lea.vmem (!%p305_p13), [#allocation8], %s3270_s17 }
  0x2c   : > { %s3975_s28 = scalar_lea.vmem (!%p305_p13), [#allocation9], %s3271_s7  ;;  %p3274_p0 = scmp.ne.s32.totalorder (!%p305_p13), %s3912_s26, 0 }
  0x30   : > { %360 = sbr.rel (%p3274_p0) target bundleno = 55 (0x37), region = 120  ;;  %vm361_vm0 = vcmask (!%p3274_p0), 123904   ;;  %v3841_v4 = vmov (!%p3274_p0), 0.0  }
  0x31   : > { %362 = vst.msk [vmem:[#allocation2] sm:$0x3] (!%p3274_p0), %vm361_vm0, %v3841_v4  ;;  %363 = vst.msk [vmem:[#allocation3] sm:$0x3] (!%p3274_p0), %vm361_vm0, %v3841_v4 }
  0x32   : > { %364 = vst.msk [vmem:[#allocation4] sm:$0x3] (!%p3274_p0), %vm361_vm0, %v3841_v4  ;;  %365 = vst.msk [vmem:[#allocation5] sm:$0x3] (!%p3274_p0), %vm361_vm0, %v3841_v4 }
  0x37 PF: > { %v3527_v5 = vld [vmem:[%s4867_s3] sm:$0xff]   ;;  %v3842_v6 = vmov 0.0   ;;  %vm3843_vm1 = vmmov 0   ;;  %vm383_vm2 = vcmask 130048   ;;  %v372_v12 = vld [vmem:[%s3969_s18] sm:$0x1] }
  0x38   : > { %3379 = vmatprep.subr.bf16.mxu0 %v3842_v6  ;;  %3385 = vmatprep.subr.bf16.mxu1 %v3842_v6  ;;  %v3528_v7 = vld [vmem:[%s4868_s4] sm:$0xff]   ;;  %v545_v13 = vld [vmem:[%s3971_s19 + $0x7] sm:$0x1]  ;;  %s3844_s8 = smov 96   ;;  %s3845_s9 = smov 16   ;;  %v3846_v62 = vmov 0  }
  0x39   : > { %3380 = vmatpush3.bf16.msra.mxu0 %v3527_v5  ;;  %3381 = vmatprep.mubr.msk.bf16.mxu0 %vm3843_vm1, %v3842_v6  ;;  %v3988_v8 = vld [vmem:[#allocation2] sm:$0x3]  ;;  %v3990_v9 = vld [vmem:[#allocation4] sm:$0x3]  ;;  %v546_v25 = vld [vmem:[%s3971_s19 + $0xf] sm:$0x1] }
  0x3a   : > { %3386 = vmatpush3.bf16.msra.mxu1 %v3528_v7  ;;  %v374_v10 = vpack.c.bf16 %v3988_v8, %v3988_v8  ;;  %3387 = vmatprep.mubr.msk.bf16.mxu1 %vm3843_vm1, %v3842_v6  ;;  %v547_v11 = vpack.c.bf16 %v3990_v9, %v3990_v9  ;;  %v373_v14 = vld [vmem:[%s3969_s18 + $0x8] sm:$0x1]  ;;  %v4011_v32 = vld [vmem:[#allocation5] sm:$0x3]  ;;  %v4016_v35 = vld [vmem:[#allocation3] sm:$0x3] }
  0x3b   : > { %3391 = vmatprep.subr.bf16.mxu0 %v3842_v6  ;;  %3397 = vmatprep.subr.bf16.mxu1 %v3842_v6  ;;  %v620_v34 = vrot.slane %v4011_v32, 1  ;;  %v448_v37 = vrot.slane %v4016_v35, 1  ;;  %vm499_vm3 = vcmask 1041409   ;;  %s542_s10 = ssub.s32 1, %s3912_s26  ;;  %s4051_s15 = sshll.u32 %s3912_s26, 3  ;;  %vm539_vm7 = vcmask 122880  }
  0x3c   : > { %3382 = vmatmul.mubr.msk.bf16.vlgmr.msra.gmra.mrb[0].mxu0 %vm383_vm2, %v374_v10  ;;  %3526 = vset.pattern.permute.xlu1 %v3846_v62  ;;  %s4053_s16 = sshll.u32 %s542_s10, 3  ;;  %s3847_s30 = smov 32  }
  0x3d   : > { %3388 = vmatmul.mubr.msk.bf16.vlgmr.msra.gmra.mrb[0].mxu1 %vm383_vm2, %v547_v11  ;;  %3393 = vmatprep.mubr.msk.bf16.mxu0 %vm3843_vm1, %v3842_v6  ;;  %s544_s12 = sadd.s32 7, %s4053_s16  ;;  %s3848_s29 = smov 80  }
  0x3e   : > { %3399 = vmatprep.mubr.msk.bf16.mxu1 %vm3843_vm1, %v3842_v6  ;;  %3525 = vset.pattern.permute.xlu0 %v3846_v62  ;;  %s3849_s10 = smov 112   ;;  %s880_s17 = sadd.s32 6, %s4053_s16 }
  0x3f   : > { %s1048_s25 = sadd.s32 2, %s4051_s15  ;;  %s1384_s23 = sadd.s32 3, %s4051_s15 }
  0x40   : > { %s2392_s21 = sadd.s32 6, %s4051_s15 }
 0x10f   : > { %v421_v15 = vpop.f32.mrb[0].mxu0 }
 0x110   : > { %v428_v16 = vrot.slane %v421_v15, 1  ;;  %v431_v17 = vadd.f32 %v421_v15, %v372_v12  ;;  %v3383_v18 = vpop.f32.mrb[1].mxu0  ;;  %v593_v19 = vpop.f32.mrb[0].mxu1 }
 0x111   : > { %v600_v20 = vrot.slane %v593_v19, 1  ;;  %v603_v21 = vadd.f32 %v593_v19, %v545_v13  ;;  %v424_v22 = vpop.f32.mrb[2].mxu0  ;;  %v3389_v23 = vpop.f32.mrb[1].mxu1 }
 0x112   : > { %v432_v24 = vadd.f32 %v428_v16, %v373_v14  ;;  %3543 = vtanh.f32 %v431_v17  ;;  %v3384_v26 = vpop.f32.mrb[3].mxu0  ;;  %v596_v27 = vpop.f32.mrb[2].mxu1  ;;  %v3278_v38 = vmul.f32 -1.442695, %v431_v17  ;;  %v489_v23 = vstv %s4051_s15 }
 0x113   : > { %v3390_v28 = vpop.f32.mrb[3].mxu1  ;;  %3545 = vtanh.f32 %v603_v21  ;;  %v604_v29 = vadd.f32 %v600_v20, %v546_v25  ;;  %v3283_v41 = vmul.f32 -1.442695, %v603_v21  ;;  %v3529_v26 = vld [vmem:[%s4867_s3] sm:$0xff]  }
 0x114   : > { %3547 = vtanh.f32 %v432_v24  ;;  %v3279_v39 = vmul.f32 -1.442695, %v432_v24  ;;  %v4062_v24 = vld [vmem:[%s4864_s0] sm:$0x3]  ;;  %v661_v28 = vstv %s544_s12  ;;  %3392 = vmatpush3.bf16.msra.mxu0 %v3529_v26  ;;  %s712_s12 = sadd.s32 1, %s4051_s15 }
 0x115   : > { %3549 = vtanh.f32 %v604_v29  ;;  %v3284_v40 = vmul.f32 -1.442695, %v604_v29  ;;  %vm490_vm4 = vcmp.lt.s32.totalorder %v489_v23, %v4062_v24  ;;  %vm662_vm5 = vcmp.lt.s32.totalorder %v661_v28, %v4062_v24  ;;  %3403 = vmatprep.subr.bf16.mxu0 %v3842_v6  ;;  %v881_v23 = vld [vmem:[%s3971_s19 + $0x6] sm:$0x1] }
 0x116   : > { %3551 = vpow2.f32 %v3278_v38  ;;  %v491_v29 = vsel %vm490_vm4, 1, %v3846_v62 }
 0x117   : > { %3553 = vpow2.f32 %v3279_v39 }
 0x118   : > { %3555 = vpow2.f32 %v3284_v40 }
 0x119   : > { %3557 = vpow2.f32 %v3283_v41 }
 0x11c   : > { %v3544_v30 = vpop.eup %3543 }
 0x11d   : > { %459 = vrot.lane.b32.xlu1 %v3544_v30, %s3844_s8  ;;  %v3546_v31 = vpop.eup %3545 }
 0x11e   : > { %v3548_v33 = vpop.eup %3547 }
 0x11f   : > { %461 = vrot.lane.b32.xlu0 %v3548_v33, %s3844_s8  ;;  %v3550_v36 = vpop.eup %3549  ;;  %v3530_v33 = vld [vmem:[%s4868_s4] sm:$0xff]  }
 0x120   : > { %v3552_v42 = vpop.eup %3551  ;;  %3398 = vmatpush3.bf16.msra.mxu1 %v3530_v33 }
 0x121   : > { %631 = vrot.lane.b32.xlu1 %v3546_v31, %s3844_s8  ;;  %v3554_v43 = vpop.eup %3553  ;;  %v439_v44 = vadd.f32 1.0, %v3552_v42  ;;  %v663_v31 = vsel %vm662_vm5, 1, %v3846_v62  ;;  %3409 = vmatprep.subr.bf16.mxu1 %v3842_v6 }
 0x122   : > { %v440_v45 = vadd.f32 1.0, %v3554_v43  ;;  %v3556_v46 = vpop.eup %3555 }
 0x123   : > { %633 = vrot.lane.b32.xlu0 %v3550_v36, %s3844_s8  ;;  %3559 = vrcp.f32 %v439_v44  ;;  %v612_v47 = vadd.f32 1.0, %v3556_v46  ;;  %v3558_v48 = vpop.eup %3557 }
 0x124   : > { %3561 = vrcp.f32 %v440_v45  ;;  %v611_v49 = vadd.f32 1.0, %v3558_v48 }
 0x125   : > { %623 = vrot.lane.b32.xlu1 %v620_v34, %s3845_s9  ;;  %3563 = vrcp.f32 %v612_v47  ;;  %v3850_v47 = vmov 1966171168  }
 0x126   : > { %3565 = vrcp.f32 %v611_v49  ;;  %v516_v48 = vunpack.c.l.s4 %v3850_v47  ;;  %v518_v49 = vlaneseq }
 0x127   : > { %451 = vrot.lane.b32.xlu0 %v448_v37, %s3845_s9 }
 0x12b   : > { %449 = vrot.lane.b32.xlu0 %v4016_v35, %s3845_s9 }
 0x12d   : > { %v4026_v50 = vpop.eup %3559 }
 0x12e   : > { %v4029_v53 = vpop.eup %3561 }
 0x12f   : > { %621 = vrot.lane.b32.xlu0 %v4011_v32, %s3845_s9  ;;  %v4034_v56 = vpop.eup %3563 }
 0x130   : > { %v4038_v60 = vpop.eup %3565 }
 0x18f   : > { %v460_v51 = vpop.permute.xlu1 %459 }
 0x190   : > { %v465_v52 = vmul.f32 %v4026_v50, %v460_v51  ;;  %v517_v51 = vunpack.c.0.s8 %v516_v48 }
 0x191   : > { %v462_v54 = vpop.permute.xlu0 %461 }
 0x192   : > { %469 = vrot.lane.b32.xlu0 %v465_v52, %s3845_s9  ;;  %v466_v55 = vmul.f32 %v4029_v53, %v462_v54  ;;  %v519_v52 = vshrl.u32 %v518_v49, 7 }
 0x193   : > { %v632_v59 = vpop.permute.xlu1 %631 }
 0x194   : > { %471 = vrot.lane.b32.xlu1 %v466_v55, %s3845_s9  ;;  %v637_v61 = vmul.f32 %v4038_v60, %v632_v59  ;;  %v4091_v54 = vsub.s32 %v517_v51, %v519_v52 }
 0x195   : > { %v634_v57 = vpop.permute.xlu0 %633 }
 0x196   : > { %v638_v58 = vmul.f32 %v4034_v56, %v634_v57 }
 0x197   : > { %v624_v2 = vpop.permute.xlu1 %623 }
 0x198   : > { %643 = vrot.lane.b32.xlu1 %v638_v58, %s3845_s9  ;;  %v628_v12 = vmul.f32 %v4034_v56, %v624_v2 }
 0x199   : > { %v452_v63 = vpop.permute.xlu0 %451 }
 0x19a   : > { %v456_v3 = vmul.f32 %v4029_v53, %v452_v63 }
 0x19c   : > { %641 = vrot.lane.b32.xlu1 %v637_v61, %s3845_s9 }
 0x19d   : > { %v450_v0 = vpop.permute.xlu0 %449 }
 0x19e   : > { %v455_v5 = vmul.f32 %v4026_v50, %v450_v0 }
 0x1a1   : > { %v622_v1 = vpop.permute.xlu0 %621 }
 0x1a2   : > { %v627_v17 = vmul.f32 %v4038_v60, %v622_v1 }
 0x204   : > { %v470_v4 = vpop.permute.xlu0 %469 }
 0x205   : > { %v475_v11 = vadd.f32 %v470_v4, %v455_v5 }
 0x206   : > { %v472_v7 = vpop.permute.xlu1 %471 }
 0x207   : > { %v476_v10 = vadd.f32 %v472_v7, %v456_v3  ;;  %v714_v7 = vld [vmem:[%s3969_s18 + $0x9] sm:$0x1] }
 0x209   : > { %3567 = vtanh.f32 %v476_v10  ;;  %v507_v13 = vrot.slane %v476_v10, 7 }
 0x20a   : > { %v644_v14 = vpop.permute.xlu1 %643  ;;  %3569 = vtanh.f32 %v475_v11 }
 0x20b   : > { %v648_v15 = vadd.f32 %v644_v14, %v628_v12  ;;  %v508_v16 = vsel %vm499_vm3, %v507_v13, %v475_v11  ;;  %v713_v13 = vld [vmem:[%s3969_s18 + $0x1] sm:$0x1] }
 0x20d   : > { %3571 = vtanh.f32 %v648_v15  ;;  %v678_v19 = vrot.slane %v648_v15, 7 }
 0x20e   : > { %v642_v18 = vpop.permute.xlu1 %641 }
 0x20f   : > { %v647_v20 = vadd.f32 %v642_v18, %v627_v17  ;;  %v882_v17 = vld [vmem:[%s3971_s19 + $0xe] sm:$0x1] }
 0x211   : > { %3573 = vtanh.f32 %v647_v20  ;;  %v679_v21 = vsel %vm499_vm3, %v678_v19, %v647_v20 }
 0x213   : > { %v3568_v22 = vpop.eup %3567 }
 0x214   : > { %483 = vrot.lane.b32.xlu0 %v3568_v22, %s3847_s30  ;;  %v3570_v25 = vpop.eup %3569 }
 0x217   : > { %v3572_v27 = vpop.eup %3571 }
 0x218   : > { %655 = vrot.lane.b32.xlu1 %v3572_v27, %s3847_s30  ;;  %481 = vrot.lane.b32.xlu0 %v3570_v25, %s3847_s30 }
 0x21b   : > { %v3574_v30 = vpop.eup %3573 }
 0x21c   : > { %653 = vrot.lane.b32.xlu1 %v3574_v30, %s3847_s30  ;;  %493 = vperm.xlu0 %3525, %v491_v29  }
 0x220   : > { %665 = vperm.xlu1 %3526, %v663_v31  }
 0x286   : > { %v484_v34 = vpop.permute.xlu0 %483 }
 0x287   : > { %v488_v36 = vmul.f32 %v4029_v53, %v484_v34 }
 0x289   : > { %v498_v39 = vrot.slane %v488_v36, 7 }
 0x28a   : > { %v656_v37 = vpop.permute.xlu1 %655  ;;  %v482_v38 = vpop.permute.xlu0 %481 }
 0x28b   : > { %v660_v40 = vmul.f32 %v4034_v56, %v656_v37  ;;  %v487_v41 = vmul.f32 %v4026_v50, %v482_v38 }
 0x28d   : > { %v500_v42 = vsel %vm499_vm3, %v498_v39, %v487_v41  ;;  %v670_v44 = vrot.slane %v660_v40, 7 }
 0x28e   : > { %v654_v43 = vpop.permute.xlu1 %653  ;;  %501 = vrot.lane.b32.xlu1 %v500_v42, %s3848_s29 }
 0x28f   : > { %v659_v45 = vmul.f32 %v4038_v60, %v654_v43 }
 0x291   : > { %v671_v46 = vsel %vm499_vm3, %v670_v44, %v659_v45 }
 0x292   : > { %509 = vrot.lane.b32.xlu1 %v508_v16, %s3849_s10  ;;  %672 = vrot.lane.b32.xlu0 %v671_v46, %s3848_s29 }
 0x296   : > { %680 = vrot.lane.b32.xlu0 %v679_v21, %s3849_s10 }
 0x29b   : > { %v494_v53 = vpop.permute.xlu0 %493 }
 0x29c   : > { %vm495_vm6 = vcmp.eq.s32.totalorder %v494_v53, 1 }
 0x29f   : > { %v4089_v50 = vpop.permute.xlu1 %665 }
 0x2a0   : > { %vm667_vm8 = vcmp.eq.s32.totalorder %v4089_v50, 1 }
 0x300   : > { %v502_v55 = vpop.permute.xlu1 %501 }
 0x301   : > { %v4095_v56 = vsel %vm495_vm6, %v502_v55, %v3988_v8  ;;  %v513_v57 = vsel %vm495_vm6, %v502_v55, 0.0 }
 0x302   : > { %v521_v58 = vrot.slane %v513_v57, %v4091_v54  ;;  %v715_v59 = vpack.c.bf16 %v4095_v56, %v4095_v56 }
 0x304   : > { %v522_v60 = vcombine.high %v521_v58, %v521_v58  ;;  %v529_v61 = vrot.slane %v521_v58, %v4091_v54  ;;  %3394 = vmatmul.mubr.msk.bf16.vlgmr.msra.gmra.mrb[4].mxu0 %vm383_vm2, %v715_v59  ;;  %v673_v8 = vpop.permute.xlu0 %672  ;;  %v510_v29 = vpop.permute.xlu1 %509 }
 0x305   : > { %v4107_v63 = vsel %vm667_vm8, %v673_v8, %v3990_v9  ;;  %v684_v0 = vsel %vm667_vm8, %v673_v8, 0.0  ;;  %3405 = vmatprep.mubr.msk.bf16.mxu0 %vm3843_vm1, %v3842_v6  ;;  %v4137_v33 = vsel %vm495_vm6, %v510_v29, %v4016_v35 }
 0x306   : > { %v536_v1 = vrot.slane %v522_v60, %v4091_v54  ;;  %540 = vst.msk [vmem:[%s3973_s20] sm:$0x1] %vm539_vm7, %v529_v61  ;;  %v692_v2 = vrot.slane %v684_v0, %v4091_v54  ;;  %v883_v3 = vpack.c.bf16 %v4107_v63, %v4107_v63  ;;  %v788_v36 = vrot.slane %v4137_v33, 1 }
 0x308   : > { %541 = vst.msk [vmem:[%s3973_s20 + $0x8] sm:$0x1] %vm539_vm7, %v536_v1  ;;  %v693_v9 = vcombine.high %v692_v2, %v692_v2  ;;  %v700_v4 = vrot.slane %v692_v2, %v4091_v54  ;;  %3400 = vmatmul.mubr.msk.bf16.vlgmr.msra.gmra.mrb[4].mxu1 %vm383_vm2, %v883_v3  ;;  %v681_v34 = vpop.permute.xlu0 %680 }
 0x309   : > { %3411 = vmatprep.mubr.msk.bf16.mxu1 %vm3843_vm1, %v3842_v6  ;;  %v4145_v38 = vsel %vm667_vm8, %v681_v34, %v4011_v32  ;;  %v3531_v34 = vld [vmem:[%s4867_s3] sm:$0xff]  }
 0x30a   : > { %v707_v5 = vrot.slane %v693_v9, %v4091_v54  ;;  %710 = vst.msk [vmem:[%s3975_s28 + $0x7] sm:$0x1] %vm539_vm7, %v700_v4  ;;  %v956_v35 = vrot.slane %v4145_v38, 1  ;;  %3404 = vmatpush3.bf16.msra.mxu0 %v3531_v34 }
 0x30b   : > { %3415 = vmatprep.subr.bf16.mxu0 %v3842_v6 }
 0x30c   : > { %711 = vst.msk [vmem:[%s3975_s28 + $0xf] sm:$0x1] %vm539_vm7, %v707_v5 }
 0x3d7   : > { %v761_v10 = vpop.f32.mrb[4].mxu0 }
 0x3d8   : > { %v768_v11 = vrot.slane %v761_v10, 1  ;;  %v3395_v12 = vpop.f32.mrb[5].mxu0  ;;  %v771_v19 = vadd.f32 %v761_v10, %v713_v13 }
 0x3d9   : > { %v764_v14 = vpop.f32.mrb[6].mxu0 }
 0x3da   : > { %v772_v15 = vadd.f32 %v768_v11, %v714_v7  ;;  %v3396_v16 = vpop.f32.mrb[7].mxu0  ;;  %v3287_v40 = vmul.f32 -1.442695, %v771_v19 }
 0x3db   : > { %v929_v18 = vpop.f32.mrb[4].mxu1 }
 0x3dc   : > { %v936_v20 = vrot.slane %v929_v18, 1  ;;  %v3401_v21 = vpop.f32.mrb[5].mxu1  ;;  %3575 = vtanh.f32 %v772_v15  ;;  %v939_v27 = vadd.f32 %v929_v18, %v881_v23  ;;  %v3288_v39 = vmul.f32 -1.442695, %v772_v15 }
 0x3dd   : > { %v932_v22 = vpop.f32.mrb[6].mxu1  ;;  %3577 = vtanh.f32 %v771_v19 }
 0x3de   : > { %v940_v25 = vadd.f32 %v936_v20, %v882_v17  ;;  %v3402_v26 = vpop.f32.mrb[7].mxu1  ;;  %v3291_v32 = vmul.f32 -1.442695, %v939_v27 }
 0x3e0   : > { %3579 = vtanh.f32 %v940_v25  ;;  %v3292_v41 = vmul.f32 -1.442695, %v940_v25  ;;  %v829_v25 = vstv %s712_s12  ;;  %s1216_s12 = sadd.s32 5, %s4053_s16 }
 0x3e1   : > { %3581 = vtanh.f32 %v939_v27  ;;  %vm830_vm9 = vcmp.lt.s32.totalorder %v829_v25, %v4062_v24 }
 0x3e2   : > { %3583 = vpow2.f32 %v3288_v39  ;;  %v831_v29 = vsel %vm830_vm9, 1, %v3846_v62 }
 0x3e3   : > { %3585 = vpow2.f32 %v3287_v40 }
 0x3e4   : > { %3587 = vpow2.f32 %v3292_v41 }
 0x3e5   : > { %3589 = vpow2.f32 %v3291_v32 }
 0x3e6   : > { %v3576_v28 = vpop.eup %3575 }
 0x3e7   : > { %801 = vrot.lane.b32.xlu1 %v3576_v28, %s3844_s8  ;;  %v3578_v30 = vpop.eup %3577  ;;  %v997_v28 = vstv %s880_s17 }
 0x3e8   : > { %vm998_vm10 = vcmp.lt.s32.totalorder %v997_v28, %v4062_v24 }
 0x3ea   : > { %v3580_v31 = vpop.eup %3579 }
 0x3eb   : > { %799 = vrot.lane.b32.xlu1 %v3578_v30, %s3844_s8  ;;  %969 = vrot.lane.b32.xlu0 %v3580_v31, %s3844_s8  ;;  %v3582_v37 = vpop.eup %3581  ;;  %v999_v31 = vsel %vm998_vm10, 1, %v3846_v62 }
 0x3ec   : > { %v3584_v42 = vpop.eup %3583 }
 0x3ed   : > { %v3586_v43 = vpop.eup %3585  ;;  %v780_v44 = vadd.f32 1.0, %v3584_v42 }
 0x3ee   : > { %v3588_v45 = vpop.eup %3587  ;;  %v779_v46 = vadd.f32 1.0, %v3586_v43 }
 0x3ef   : > { %791 = vrot.lane.b32.xlu1 %v788_v36, %s3845_s9  ;;  %967 = vrot.lane.b32.xlu0 %v3582_v37, %s3844_s8  ;;  %3591 = vrcp.f32 %v780_v44  ;;  %v948_v47 = vadd.f32 1.0, %v3588_v45  ;;  %v3590_v48 = vpop.eup %3589  ;;  %v3532_v36 = vld [vmem:[%s4868_s4] sm:$0xff]  }
 0x3f0   : > { %3593 = vrcp.f32 %v779_v46  ;;  %v947_v49 = vadd.f32 1.0, %v3590_v48  ;;  %3410 = vmatpush3.bf16.msra.mxu1 %v3532_v36 }
 0x3f1   : > { %3595 = vrcp.f32 %v948_v47  ;;  %3421 = vmatprep.subr.bf16.mxu1 %v3842_v6 }
 0x3f2   : > { %3597 = vrcp.f32 %v947_v49 }
 0x3f3   : > { %789 = vrot.lane.b32.xlu1 %v4137_v33, %s3845_s9  ;;  %959 = vrot.lane.b32.xlu0 %v956_v35, %s3845_s9 }
 0x3f7   : > { %957 = vrot.lane.b32.xlu1 %v4145_v38, %s3845_s9 }
 0x3f9   : > { %v4155_v50 = vpop.eup %3591 }
 0x3fa   : > { %v4158_v53 = vpop.eup %3593 }
 0x3fb   : > { %v4161_v55 = vpop.eup %3595 }
 0x3fc   : > { %v4167_v61 = vpop.eup %3597 }
 0x459   : > { %v802_v51 = vpop.permute.xlu1 %801 }
 0x45a   : > { %v806_v52 = vmul.f32 %v4155_v50, %v802_v51 }
 0x45c   : > { %811 = vrot.lane.b32.xlu0 %v806_v52, %s3845_s9 }
 0x45d   : > { %v800_v57 = vpop.permute.xlu1 %799  ;;  %v970_v58 = vpop.permute.xlu0 %969 }
 0x45e   : > { %v805_v59 = vmul.f32 %v4158_v53, %v800_v57  ;;  %v974_v60 = vmul.f32 %v4161_v55, %v970_v58 }
 0x460   : > { %809 = vrot.lane.b32.xlu1 %v805_v59, %s3845_s9  ;;  %979 = vrot.lane.b32.xlu0 %v974_v60, %s3845_s9 }
 0x461   : > { %v968_v8 = vpop.permute.xlu0 %967  ;;  %v792_v1 = vpop.permute.xlu1 %791 }
 0x462   : > { %v973_v0 = vmul.f32 %v4167_v61, %v968_v8  ;;  %v796_v9 = vmul.f32 %v4155_v50, %v792_v1 }
 0x464   : > { %977 = vrot.lane.b32.xlu0 %v973_v0, %s3845_s9 }
 0x465   : > { %v790_v2 = vpop.permute.xlu1 %789  ;;  %v960_v3 = vpop.permute.xlu0 %959 }
 0x466   : > { %v795_v10 = vmul.f32 %v4158_v53, %v790_v2  ;;  %v964_v11 = vmul.f32 %v4161_v55, %v960_v3  ;;  %v1050_v3 = vld [vmem:[%s3969_s18 + $0xa] sm:$0x1] }
 0x469   : > { %v958_v4 = vpop.permute.xlu1 %957 }
 0x46a   : > { %v963_v17 = vmul.f32 %v4167_v61, %v958_v4 }
 0x4ce   : > { %v812_v5 = vpop.permute.xlu0 %811 }
 0x4cf   : > { %v816_v7 = vadd.f32 %v812_v5, %v796_v9 }
 0x4d1   : > { %3599 = vtanh.f32 %v816_v7  ;;  %v846_v14 = vrot.slane %v816_v7, 7 }
 0x4d2   : > { %v810_v12 = vpop.permute.xlu1 %809  ;;  %v980_v13 = vpop.permute.xlu0 %979 }
 0x4d3   : > { %v815_v15 = vadd.f32 %v810_v12, %v795_v10  ;;  %v984_v16 = vadd.f32 %v980_v13, %v964_v11  ;;  %v1049_v10 = vld [vmem:[%s3969_s18 + $0x2] sm:$0x1]  ;;  %v1218_v13 = vld [vmem:[%s3971_s19 + $0xd] sm:$0x1] }
 0x4d5   : > { %3601 = vtanh.f32 %v815_v15  ;;  %v847_v18 = vsel %vm499_vm3, %v846_v14, %v815_v15  ;;  %v1014_v20 = vrot.slane %v984_v16, 7 }
 0x4d6   : > { %3603 = vtanh.f32 %v984_v16  ;;  %v978_v19 = vpop.permute.xlu0 %977 }
 0x4d7   : > { %v983_v21 = vadd.f32 %v978_v19, %v963_v17  ;;  %v1217_v19 = vld [vmem:[%s3971_s19 + $0x5] sm:$0x1] }
 0x4d9   : > { %3605 = vtanh.f32 %v983_v21  ;;  %v1015_v22 = vsel %vm499_vm3, %v1014_v20, %v983_v21 }
 0x4db   : > { %v3600_v23 = vpop.eup %3599 }
 0x4dc   : > { %823 = vrot.lane.b32.xlu1 %v3600_v23, %s3847_s30 }
 0x4df   : > { %v3602_v26 = vpop.eup %3601 }
 0x4e0   : > { %v3604_v27 = vpop.eup %3603  ;;  %821 = vrot.lane.b32.xlu1 %v3602_v26, %s3847_s30 }
 0x4e1   : > { %991 = vrot.lane.b32.xlu0 %v3604_v27, %s3847_s30 }
 0x4e3   : > { %v3606_v30 = vpop.eup %3605 }
 0x4e4   : > { %833 = vperm.xlu1 %3526, %v831_v29  }
 0x4e5   : > { %989 = vrot.lane.b32.xlu0 %v3606_v30, %s3847_s30 }
 0x4e9   : > { %1001 = vperm.xlu0 %3525, %v999_v31  }
 0x54e   : > { %v824_v37 = vpop.permute.xlu1 %823 }
 0x54f   : > { %v828_v35 = vmul.f32 %v4155_v50, %v824_v37 }
 0x551   : > { %v838_v40 = vrot.slane %v828_v35, 7 }
 0x552   : > { %v822_v39 = vpop.permute.xlu1 %821 }
 0x553   : > { %v827_v41 = vmul.f32 %v4158_v53, %v822_v39  ;;  %v992_v32 = vpop.permute.xlu0 %991 }
 0x554   : > { %v996_v42 = vmul.f32 %v4161_v55, %v992_v32 }
 0x555   : > { %v839_v43 = vsel %vm499_vm3, %v838_v40, %v827_v41 }
 0x556   : > { %840 = vrot.lane.b32.xlu1 %v839_v43, %s3848_s29  ;;  %v1006_v45 = vrot.slane %v996_v42, 7 }
 0x557   : > { %v990_v44 = vpop.permute.xlu0 %989 }
 0x558   : > { %v995_v46 = vmul.f32 %v4167_v61, %v990_v44 }
 0x55a   : > { %848 = vrot.lane.b32.xlu1 %v847_v18, %s3849_s10  ;;  %v1007_v47 = vsel %vm499_vm3, %v1006_v45, %v995_v46 }
 0x55b   : > { %1008 = vrot.lane.b32.xlu0 %v1007_v47, %s3848_s29 }
 0x55f   : > { %1016 = vrot.lane.b32.xlu0 %v1015_v22, %s3849_s10 }
 0x563   : > { %v834_v48 = vpop.permute.xlu1 %833 }
 0x564   : > { %vm835_vm11 = vcmp.eq.s32.totalorder %v834_v48, 1 }
 0x568   : > { %v1002_v50 = vpop.permute.xlu0 %1001 }
 0x569   : > { %vm1003_vm12 = vcmp.eq.s32.totalorder %v1002_v50, 1 }
 0x5c8   : > { %v841_v49 = vpop.permute.xlu1 %840 }
 0x5c9   : > { %v4207_v51 = vsel %vm835_vm11, %v841_v49, %v4095_v56  ;;  %v852_v52 = vsel %vm835_vm11, %v841_v49, 0.0 }
 0x5ca   : > { %v860_v53 = vrot.slane %v852_v52, %v4091_v54  ;;  %v1051_v55 = vpack.c.bf16 %v4207_v51, %v4207_v51 }
 0x5cc   : > { %v861_v57 = vcombine.high %v860_v53, %v860_v53  ;;  %v868_v58 = vrot.slane %v860_v53, %v4091_v54  ;;  %3406 = vmatmul.mubr.msk.bf16.vlgmr.msra.gmra.mrb[8].mxu0 %vm383_vm2, %v1051_v55  ;;  %v849_v25 = vpop.permute.xlu1 %848 }
 0x5cd   : > { %v1009_v59 = vpop.permute.xlu0 %1008  ;;  %3417 = vmatprep.mubr.msk.bf16.mxu0 %vm3843_vm1, %v3842_v6  ;;  %v4246_v27 = vsel %vm835_vm11, %v849_v25, %v4137_v33 }
 0x5ce   : > { %v875_v56 = vrot.slane %v861_v57, %v4091_v54  ;;  %878 = vst.msk [vmem:[%s3973_s20 + $0x1] sm:$0x1] %vm539_vm7, %v868_v58  ;;  %v4222_v60 = vsel %vm1003_vm12, %v1009_v59, %v4107_v63  ;;  %v1020_v61 = vsel %vm1003_vm12, %v1009_v59, 0.0  ;;  %v1124_v30 = vrot.slane %v4246_v27, 1 }
 0x5cf   : > { %v1028_v8 = vrot.slane %v1020_v61, %v4091_v54  ;;  %v1219_v0 = vpack.c.bf16 %v4222_v60, %v4222_v60 }
 0x5d0   : > { %879 = vst.msk [vmem:[%s3973_s20 + $0x9] sm:$0x1] %vm539_vm7, %v875_v56 }
 0x5d1   : > { %v1029_v1 = vcombine.high %v1028_v8, %v1028_v8  ;;  %v1036_v2 = vrot.slane %v1028_v8, %v4091_v54  ;;  %3412 = vmatmul.mubr.msk.bf16.vlgmr.msra.gmra.mrb[8].mxu1 %vm383_vm2, %v1219_v0  ;;  %v1017_v29 = vpop.permute.xlu0 %1016 }
 0x5d2   : > { %3423 = vmatprep.mubr.msk.bf16.mxu1 %vm3843_vm1, %v3842_v6  ;;  %v4253_v34 = vsel %vm1003_vm12, %v1017_v29, %v4145_v38  ;;  %v3533_v29 = vld [vmem:[%s4867_s3] sm:$0xff]  }
 0x5d3   : > { %v1043_v63 = vrot.slane %v1029_v1, %v4091_v54  ;;  %1046 = vst.msk [vmem:[%s3975_s28 + $0x6] sm:$0x1] %vm539_vm7, %v1036_v2  ;;  %v1292_v33 = vrot.slane %v4253_v34, 1  ;;  %3416 = vmatpush3.bf16.msra.mxu0 %v3533_v29 }
 0x5d4   : > { %3427 = vmatprep.subr.bf16.mxu0 %v3842_v6 }
 0x5d5   : > { %1047 = vst.msk [vmem:[%s3975_s28 + $0xe] sm:$0x1] %vm539_vm7, %v1043_v63 }
 0x69f   : > { %v1097_v9 = vpop.f32.mrb[8].mxu0 }
 0x6a0   : > { %v1104_v4 = vrot.slane %v1097_v9, 1  ;;  %v3407_v5 = vpop.f32.mrb[9].mxu0  ;;  %v1107_v15 = vadd.f32 %v1097_v9, %v1049_v10 }
 0x6a1   : > { %v1100_v7 = vpop.f32.mrb[10].mxu0 }
 0x6a2   : > { %v1108_v11 = vadd.f32 %v1104_v4, %v1050_v3  ;;  %v3408_v12 = vpop.f32.mrb[11].mxu0  ;;  %v3295_v37 = vmul.f32 -1.442695, %v1107_v15 }
 0x6a4   : > { %v1265_v14 = vpop.f32.mrb[8].mxu1  ;;  %3607 = vtanh.f32 %v1108_v11  ;;  %v3296_v36 = vmul.f32 -1.442695, %v1108_v11 }
 0x6a5   : > { %v1272_v16 = vrot.slane %v1265_v14, 1  ;;  %v3413_v17 = vpop.f32.mrb[9].mxu1  ;;  %3609 = vtanh.f32 %v1107_v15  ;;  %v1275_v22 = vadd.f32 %v1265_v14, %v1217_v19 }
 0x6a6   : > { %v1268_v18 = vpop.f32.mrb[10].mxu1 }
 0x6a7   : > { %v1276_v20 = vadd.f32 %v1272_v16, %v1218_v13  ;;  %v3414_v21 = vpop.f32.mrb[11].mxu1  ;;  %v3299_v38 = vmul.f32 -1.442695, %v1275_v22 }
 0x6a9   : > { %3611 = vtanh.f32 %v1276_v20  ;;  %v3300_v35 = vmul.f32 -1.442695, %v1276_v20  ;;  %v1165_v20 = vstv %s1048_s25  ;;  %s1552_s25 = sadd.s32 4, %s4053_s16 }
 0x6aa   : > { %3613 = vtanh.f32 %v1275_v22  ;;  %vm1166_vm13 = vcmp.lt.s32.totalorder %v1165_v20, %v4062_v24 }
 0x6ab   : > { %3615 = vpow2.f32 %v3296_v36  ;;  %v1167_v25 = vsel %vm1166_vm13, 1, %v3846_v62 }
 0x6ac   : > { %3617 = vpow2.f32 %v3295_v37 }
 0x6ad   : > { %3619 = vpow2.f32 %v3300_v35 }
 0x6ae   : > { %v3608_v23 = vpop.eup %3607  ;;  %3621 = vpow2.f32 %v3299_v38 }
 0x6af   : > { %1137 = vrot.lane.b32.xlu1 %v3608_v23, %s3844_s8  ;;  %v3610_v26 = vpop.eup %3609  ;;  %v1333_v23 = vstv %s1216_s12  ;;  %s1888_s12 = sadd.s32 3, %s4053_s16 }
 0x6b0   : > { %vm1334_vm14 = vcmp.lt.s32.totalorder %v1333_v23, %v4062_v24 }
 0x6b3   : > { %v3612_v28 = vpop.eup %3611  ;;  %1135 = vrot.lane.b32.xlu1 %v3610_v26, %s3844_s8 }
 0x6b4   : > { %1305 = vrot.lane.b32.xlu0 %v3612_v28, %s3844_s8  ;;  %v3614_v31 = vpop.eup %3613  ;;  %v1335_v28 = vsel %vm1334_vm14, 1, %v3846_v62 }
 0x6b5   : > { %v3616_v39 = vpop.eup %3615 }
 0x6b6   : > { %v1116_v40 = vadd.f32 1.0, %v3616_v39  ;;  %v3618_v41 = vpop.eup %3617 }
 0x6b7   : > { %1127 = vrot.lane.b32.xlu1 %v1124_v30, %s3845_s9  ;;  %v3620_v32 = vpop.eup %3619  ;;  %v1115_v42 = vadd.f32 1.0, %v3618_v41  ;;  %v3534_v30 = vld [vmem:[%s4868_s4] sm:$0xff]  }
 0x6b8   : > { %1303 = vrot.lane.b32.xlu0 %v3614_v31, %s3844_s8  ;;  %3623 = vrcp.f32 %v1116_v40  ;;  %v1284_v43 = vadd.f32 1.0, %v3620_v32  ;;  %v3622_v44 = vpop.eup %3621  ;;  %3422 = vmatpush3.bf16.msra.mxu1 %v3534_v30 }
 0x6b9   : > { %3625 = vrcp.f32 %v1115_v42  ;;  %v1283_v45 = vadd.f32 1.0, %v3622_v44  ;;  %3433 = vmatprep.subr.bf16.mxu1 %v3842_v6 }
 0x6ba   : > { %3627 = vrcp.f32 %v1284_v43 }
 0x6bb   : > { %1125 = vrot.lane.b32.xlu1 %v4246_v27, %s3845_s9  ;;  %3629 = vrcp.f32 %v1283_v45 }
 0x6bc   : > { %1295 = vrot.lane.b32.xlu0 %v1292_v33, %s3845_s9 }
 0x6bf   : > { %1293 = vrot.lane.b32.xlu1 %v4253_v34, %s3845_s9 }
 0x6c2   : > { %v4263_v46 = vpop.eup %3623 }
 0x6c3   : > { %v4267_v49 = vpop.eup %3625 }
 0x6c4   : > { %v4269_v52 = vpop.eup %3627 }
 0x6c5   : > { %v4275_v58 = vpop.eup %3629 }
 0x721   : > { %v1138_v47 = vpop.permute.xlu1 %1137 }
 0x722   : > { %v1142_v48 = vmul.f32 %v4263_v46, %v1138_v47 }
 0x724   : > { %1147 = vrot.lane.b32.xlu0 %v1142_v48, %s3845_s9 }
 0x725   : > { %v1136_v50 = vpop.permute.xlu1 %1135 }
 0x726   : > { %v1141_v53 = vmul.f32 %v4267_v49, %v1136_v50  ;;  %v1306_v55 = vpop.permute.xlu0 %1305 }
 0x727   : > { %v1310_v57 = vmul.f32 %v4269_v52, %v1306_v55 }
 0x728   : > { %1145 = vrot.lane.b32.xlu1 %v1141_v53, %s3845_s9 }
 0x729   : > { %1315 = vrot.lane.b32.xlu0 %v1310_v57, %s3845_s9  ;;  %v1128_v61 = vpop.permute.xlu1 %1127 }
 0x72a   : > { %v1304_v59 = vpop.permute.xlu0 %1303  ;;  %v1132_v1 = vmul.f32 %v4263_v46, %v1128_v61 }
 0x72b   : > { %v1309_v56 = vmul.f32 %v4275_v58, %v1304_v59 }
 0x72d   : > { %1313 = vrot.lane.b32.xlu0 %v1309_v56, %s3845_s9  ;;  %v1126_v8 = vpop.permute.xlu1 %1125 }
 0x72e   : > { %v1296_v0 = vpop.permute.xlu0 %1295  ;;  %v1131_v9 = vmul.f32 %v4267_v49, %v1126_v8  ;;  %v1386_v8 = vld [vmem:[%s3969_s18 + $0xb] sm:$0x1] }
 0x72f   : > { %v1300_v4 = vmul.f32 %v4269_v52, %v1296_v0 }
 0x731   : > { %v1294_v2 = vpop.permute.xlu1 %1293 }
 0x732   : > { %v1299_v14 = vmul.f32 %v4275_v58, %v1294_v2 }
 0x796   : > { %v1148_v63 = vpop.permute.xlu0 %1147 }
 0x797   : > { %v1152_v3 = vadd.f32 %v1148_v63, %v1132_v1 }
 0x799   : > { %3631 = vtanh.f32 %v1152_v3  ;;  %v1182_v7 = vrot.slane %v1152_v3, 7  ;;  %v1385_v3 = vld [vmem:[%s3969_s18 + $0x3] sm:$0x1] }
 0x79a   : > { %v1146_v5 = vpop.permute.xlu1 %1145 }
 0x79b   : > { %v1151_v10 = vadd.f32 %v1146_v5, %v1131_v9  ;;  %v1316_v11 = vpop.permute.xlu0 %1315  ;;  %v1554_v5 = vld [vmem:[%s3971_s19 + $0xc] sm:$0x1] }
 0x79c   : > { %v1320_v12 = vadd.f32 %v1316_v11, %v1300_v4 }
 0x79d   : > { %3633 = vtanh.f32 %v1151_v10  ;;  %v1183_v13 = vsel %vm499_vm3, %v1182_v7, %v1151_v10 }
 0x79e   : > { %3635 = vtanh.f32 %v1320_v12  ;;  %v1350_v16 = vrot.slane %v1320_v12, 7 }
 0x79f   : > { %v1314_v15 = vpop.permute.xlu0 %1313 }
 0x7a0   : > { %v1319_v17 = vadd.f32 %v1314_v15, %v1299_v14  ;;  %v1553_v14 = vld [vmem:[%s3971_s19 + $0x4] sm:$0x1] }
 0x7a2   : > { %3637 = vtanh.f32 %v1319_v17  ;;  %v1351_v18 = vsel %vm499_vm3, %v1350_v16, %v1319_v17 }
 0x7a3   : > { %v3632_v19 = vpop.eup %3631 }
 0x7a4   : > { %1159 = vrot.lane.b32.xlu1 %v3632_v19, %s3847_s30 }
 0x7a7   : > { %v3634_v21 = vpop.eup %3633 }
 0x7a8   : > { %v3636_v22 = vpop.eup %3635  ;;  %1157 = vrot.lane.b32.xlu1 %v3634_v21, %s3847_s30 }
 0x7a9   : > { %1327 = vrot.lane.b32.xlu0 %v3636_v22, %s3847_s30 }
 0x7ac   : > { %v3638_v26 = vpop.eup %3637  ;;  %1169 = vperm.xlu1 %3526, %v1167_v25  }
 0x7ad   : > { %1325 = vrot.lane.b32.xlu0 %v3638_v26, %s3847_s30 }
 0x7b1   : > { %1337 = vperm.xlu0 %3525, %v1335_v28  }
 0x816   : > { %v1160_v24 = vpop.permute.xlu1 %1159 }
 0x817   : > { %v1164_v31 = vmul.f32 %v4263_v46, %v1160_v24 }
 0x819   : > { %v1174_v36 = vrot.slane %v1164_v31, 7 }
 0x81a   : > { %v1158_v33 = vpop.permute.xlu1 %1157 }
 0x81b   : > { %v1163_v37 = vmul.f32 %v4267_v49, %v1158_v33  ;;  %v1328_v35 = vpop.permute.xlu0 %1327 }
 0x81c   : > { %v1332_v38 = vmul.f32 %v4269_v52, %v1328_v35 }
 0x81d   : > { %v1175_v39 = vsel %vm499_vm3, %v1174_v36, %v1163_v37 }
 0x81e   : > { %1176 = vrot.lane.b32.xlu1 %v1175_v39, %s3848_s29  ;;  %v1342_v41 = vrot.slane %v1332_v38, 7 }
 0x81f   : > { %v1326_v40 = vpop.permute.xlu0 %1325 }
 0x820   : > { %v1331_v32 = vmul.f32 %v4275_v58, %v1326_v40 }
 0x822   : > { %1184 = vrot.lane.b32.xlu1 %v1183_v13, %s3849_s10  ;;  %v1343_v42 = vsel %vm499_vm3, %v1342_v41, %v1331_v32 }
 0x823   : > { %1344 = vrot.lane.b32.xlu0 %v1343_v42, %s3848_s29 }
 0x827   : > { %1352 = vrot.lane.b32.xlu0 %v1351_v18, %s3849_s10 }
 0x82b   : > { %v1170_v43 = vpop.permute.xlu1 %1169 }
 0x82c   : > { %vm1171_vm15 = vcmp.eq.s32.totalorder %v1170_v43, 1 }
 0x830   : > { %v1338_v45 = vpop.permute.xlu0 %1337 }
 0x831   : > { %vm1339_vm0 = vcmp.eq.s32.totalorder %v1338_v45, 1 }
 0x890   : > { %v1177_v44 = vpop.permute.xlu1 %1176 }
 0x891   : > { %v4315_v46 = vsel %vm1171_vm15, %v1177_v44, %v4207_v51  ;;  %v1188_v47 = vsel %vm1171_vm15, %v1177_v44, 0.0 }
 0x892   : > { %v1196_v48 = vrot.slane %v1188_v47, %v4091_v54  ;;  %v1387_v49 = vpack.c.bf16 %v4315_v46, %v4315_v46 }
 0x894   : > { %v1197_v50 = vcombine.high %v1196_v48, %v1196_v48  ;;  %v1204_v52 = vrot.slane %v1196_v48, %v4091_v54  ;;  %3418 = vmatmul.mubr.msk.bf16.vlgmr.msra.gmra.mrb[12].mxu0 %vm383_vm2, %v1387_v49  ;;  %v1185_v19 = vpop.permute.xlu1 %1184 }
 0x895   : > { %v1345_v53 = vpop.permute.xlu0 %1344  ;;  %3429 = vmatprep.mubr.msk.bf16.mxu0 %vm3843_vm1, %v3842_v6  ;;  %v4354_v21 = vsel %vm1171_vm15, %v1185_v19, %v4246_v27 }
 0x896   : > { %v1211_v51 = vrot.slane %v1197_v50, %v4091_v54  ;;  %1214 = vst.msk [vmem:[%s3973_s20 + $0x2] sm:$0x1] %vm539_vm7, %v1204_v52  ;;  %v4330_v55 = vsel %vm1339_vm0, %v1345_v53, %v4222_v60  ;;  %v1356_v57 = vsel %vm1339_vm0, %v1345_v53, 0.0  ;;  %v1460_v25 = vrot.slane %v4354_v21, 1 }
 0x897   : > { %v1364_v58 = vrot.slane %v1356_v57, %v4091_v54  ;;  %v1555_v59 = vpack.c.bf16 %v4330_v55, %v4330_v55 }
 0x898   : > { %1215 = vst.msk [vmem:[%s3973_s20 + $0xa] sm:$0x1] %vm539_vm7, %v1211_v51 }
 0x899   : > { %v1365_v56 = vcombine.high %v1364_v58, %v1364_v58  ;;  %v1372_v61 = vrot.slane %v1364_v58, %v4091_v54  ;;  %3424 = vmatmul.mubr.msk.bf16.vlgmr.msra.gmra.mrb[12].mxu1 %vm383_vm2, %v1555_v59  ;;  %v1353_v23 = vpop.permute.xlu0 %1352 }
 0x89a   : > { %3435 = vmatprep.mubr.msk.bf16.mxu1 %vm3843_vm1, %v3842_v6  ;;  %v4361_v28 = vsel %vm1339_vm0, %v1353_v23, %v4253_v34  ;;  %v3535_v23 = vld [vmem:[%s4867_s3] sm:$0xff]  }
 0x89b   : > { %v1379_v60 = vrot.slane %v1365_v56, %v4091_v54  ;;  %1382 = vst.msk [vmem:[%s3975_s28 + $0x5] sm:$0x1] %vm539_vm7, %v1372_v61  ;;  %v1628_v27 = vrot.slane %v4361_v28, 1  ;;  %3428 = vmatpush3.bf16.msra.mxu0 %v3535_v23 }
 0x89c   : > { %3439 = vmatprep.subr.bf16.mxu0 %v3842_v6 }
 0x89d   : > { %1383 = vst.msk [vmem:[%s3975_s28 + $0xd] sm:$0x1] %vm539_vm7, %v1379_v60 }
 0x967   : > { %v1433_v0 = vpop.f32.mrb[12].mxu0 }
 0x968   : > { %v1440_v1 = vrot.slane %v1433_v0, 1  ;;  %v3419_v2 = vpop.f32.mrb[13].mxu0  ;;  %v1443_v10 = vadd.f32 %v1433_v0, %v1385_v3 }
 0x969   : > { %v1436_v63 = vpop.f32.mrb[14].mxu0 }
 0x96a   : > { %v1444_v9 = vadd.f32 %v1440_v1, %v1386_v8  ;;  %v3420_v4 = vpop.f32.mrb[15].mxu0  ;;  %v3303_v30 = vmul.f32 -1.442695, %v1443_v10 }
 0x96c   : > { %v1601_v7 = vpop.f32.mrb[12].mxu1  ;;  %3639 = vtanh.f32 %v1444_v9  ;;  %v3304_v29 = vmul.f32 -1.442695, %v1444_v9 }
 0x96d   : > { %v1608_v11 = vrot.slane %v1601_v7, 1  ;;  %v3425_v12 = vpop.f32.mrb[13].mxu1  ;;  %3641 = vtanh.f32 %v1443_v10  ;;  %v1611_v17 = vadd.f32 %v1601_v7, %v1553_v14  ;;  %v1501_v14 = vstv %s1384_s23  ;;  %s2056_s23 = sadd.s32 5, %s4051_s15 }
 0x96e   : > { %v1604_v13 = vpop.f32.mrb[14].mxu1 }
 0x96f   : > { %v1612_v15 = vadd.f32 %v1608_v11, %v1554_v5  ;;  %v3426_v16 = vpop.f32.mrb[15].mxu1  ;;  %v3307_v34 = vmul.f32 -1.442695, %v1611_v17 }
 0x971   : > { %3643 = vtanh.f32 %v1612_v15  ;;  %v3308_v24 = vmul.f32 -1.442695, %v1612_v15  ;;  %v4399_v15 = vld [vmem:[%s4864_s0] sm:$0x3] }
 0x972   : > { %3645 = vtanh.f32 %v1611_v17  ;;  %vm1502_vm4 = vcmp.lt.s32.totalorder %v1501_v14, %v4399_v15 }
 0x973   : > { %3647 = vpow2.f32 %v3304_v29  ;;  %v1503_v19 = vsel %vm1502_vm4, 1, %v3846_v62 }
 0x974   : > { %3649 = vpow2.f32 %v3303_v30 }
 0x975   : > { %3651 = vpow2.f32 %v3308_v24 }
 0x976   : > { %v3640_v18 = vpop.eup %3639  ;;  %3653 = vpow2.f32 %v3307_v34 }
 0x977   : > { %1473 = vrot.lane.b32.xlu1 %v3640_v18, %s3844_s8  ;;  %v3642_v20 = vpop.eup %3641  ;;  %v1669_v18 = vstv %s1552_s25  ;;  %s1720_s25 = sadd.s32 4, %s4051_s15 }
 0x978   : > { %vm1670_vm5 = vcmp.lt.s32.totalorder %v1669_v18, %v4399_v15 }
 0x97b   : > { %v3644_v22 = vpop.eup %3643  ;;  %1471 = vrot.lane.b32.xlu1 %v3642_v20, %s3844_s8 }
 0x97c   : > { %1641 = vrot.lane.b32.xlu0 %v3644_v22, %s3844_s8  ;;  %v3646_v26 = vpop.eup %3645  ;;  %v1671_v22 = vsel %vm1670_vm5, 1, %v3846_v62 }
 0x97d   : > { %v3648_v31 = vpop.eup %3647 }
 0x97e   : > { %v1452_v33 = vadd.f32 1.0, %v3648_v31  ;;  %v3650_v36 = vpop.eup %3649 }
 0x97f   : > { %1463 = vrot.lane.b32.xlu1 %v1460_v25, %s3845_s9  ;;  %v3652_v37 = vpop.eup %3651  ;;  %v1451_v35 = vadd.f32 1.0, %v3650_v36  ;;  %v3536_v25 = vld [vmem:[%s4868_s4] sm:$0xff]  }
 0x980   : > { %1639 = vrot.lane.b32.xlu0 %v3646_v26, %s3844_s8  ;;  %3655 = vrcp.f32 %v1452_v33  ;;  %v1620_v38 = vadd.f32 1.0, %v3652_v37  ;;  %v3654_v39 = vpop.eup %3653  ;;  %3434 = vmatpush3.bf16.msra.mxu1 %v3536_v25 }
 0x981   : > { %3657 = vrcp.f32 %v1451_v35  ;;  %v1619_v40 = vadd.f32 1.0, %v3654_v39  ;;  %3445 = vmatprep.subr.bf16.mxu1 %v3842_v6 }
 0x982   : > { %3659 = vrcp.f32 %v1620_v38 }
 0x983   : > { %1461 = vrot.lane.b32.xlu1 %v4354_v21, %s3845_s9  ;;  %3661 = vrcp.f32 %v1619_v40 }
 0x984   : > { %1631 = vrot.lane.b32.xlu0 %v1628_v27, %s3845_s9 }
 0x987   : > { %1629 = vrot.lane.b32.xlu1 %v4361_v28, %s3845_s9 }
 0x98a   : > { %v4371_v41 = vpop.eup %3655 }
 0x98b   : > { %v4375_v43 = vpop.eup %3657 }
 0x98c   : > { %v4377_v45 = vpop.eup %3659 }
 0x98d   : > { %v4383_v50 = vpop.eup %3661 }
 0x9e9   : > { %v1474_v32 = vpop.permute.xlu1 %1473 }
 0x9ea   : > { %v1478_v42 = vmul.f32 %v4371_v41, %v1474_v32 }
 0x9ec   : > { %1483 = vrot.lane.b32.xlu0 %v1478_v42, %s3845_s9 }
 0x9ed   : > { %v1472_v44 = vpop.permute.xlu1 %1471 }
 0x9ee   : > { %v1477_v47 = vmul.f32 %v4375_v43, %v1472_v44  ;;  %v1642_v48 = vpop.permute.xlu0 %1641 }
 0x9ef   : > { %v1646_v49 = vmul.f32 %v4377_v45, %v1642_v48 }
 0x9f0   : > { %1481 = vrot.lane.b32.xlu1 %v1477_v47, %s3845_s9 }
 0x9f1   : > { %1651 = vrot.lane.b32.xlu0 %v1646_v49, %s3845_s9  ;;  %v1464_v51 = vpop.permute.xlu1 %1463 }
 0x9f2   : > { %v1640_v52 = vpop.permute.xlu0 %1639  ;;  %v1468_v59 = vmul.f32 %v4371_v41, %v1464_v51 }
 0x9f3   : > { %v1645_v53 = vmul.f32 %v4383_v50, %v1640_v52 }
 0x9f5   : > { %1649 = vrot.lane.b32.xlu0 %v1645_v53, %s3845_s9  ;;  %v1462_v57 = vpop.permute.xlu1 %1461 }
 0x9f6   : > { %v1632_v58 = vpop.permute.xlu0 %1631  ;;  %v1467_v8 = vmul.f32 %v4375_v43, %v1462_v57 }
 0x9f7   : > { %v1636_v0 = vmul.f32 %v4377_v45, %v1632_v58  ;;  %v1722_v58 = vld [vmem:[%s3969_s18 + $0xc] sm:$0x1] }
 0x9f9   : > { %v1630_v56 = vpop.permute.xlu1 %1629 }
 0x9fa   : > { %v1635_v5 = vmul.f32 %v4383_v50, %v1630_v56 }
 0xa5e   : > { %v1484_v61 = vpop.permute.xlu0 %1483 }
 0xa5f   : > { %v1488_v60 = vadd.f32 %v1484_v61, %v1468_v59 }
 0xa61   : > { %3663 = vtanh.f32 %v1488_v60  ;;  %v1518_v2 = vrot.slane %v1488_v60, 7 }
 0xa62   : > { %v1482_v1 = vpop.permute.xlu1 %1481 }
 0xa63   : > { %v1487_v63 = vadd.f32 %v1482_v1, %v1467_v8  ;;  %v1652_v3 = vpop.permute.xlu0 %1651  ;;  %v1721_v8 = vld [vmem:[%s3969_s18 + $0x4] sm:$0x1] }
 0xa64   : > { %v1656_v9 = vadd.f32 %v1652_v3, %v1636_v0 }
 0xa65   : > { %3665 = vtanh.f32 %v1487_v63  ;;  %v1519_v4 = vsel %vm499_vm3, %v1518_v2, %v1487_v63  ;;  %v1890_v2 = vld [vmem:[%s3971_s19 + $0xb] sm:$0x1] }
 0xa66   : > { %3667 = vtanh.f32 %v1656_v9  ;;  %v1686_v10 = vrot.slane %v1656_v9, 7 }
 0xa67   : > { %v1650_v7 = vpop.permute.xlu0 %1649 }
 0xa68   : > { %v1655_v11 = vadd.f32 %v1650_v7, %v1635_v5  ;;  %v1889_v7 = vld [vmem:[%s3971_s19 + $0x3] sm:$0x1] }
 0xa6a   : > { %3669 = vtanh.f32 %v1655_v11  ;;  %v1687_v12 = vsel %vm499_vm3, %v1686_v10, %v1655_v11 }
 0xa6b   : > { %v3664_v13 = vpop.eup %3663 }
 0xa6c   : > { %1495 = vrot.lane.b32.xlu1 %v3664_v13, %s3847_s30 }
 0xa6f   : > { %v3666_v16 = vpop.eup %3665 }
 0xa70   : > { %v3668_v17 = vpop.eup %3667  ;;  %1493 = vrot.lane.b32.xlu1 %v3666_v16, %s3847_s30 }
 0xa71   : > { %1663 = vrot.lane.b32.xlu0 %v3668_v17, %s3847_s30 }
 0xa74   : > { %v3670_v20 = vpop.eup %3669  ;;  %1505 = vperm.xlu1 %3526, %v1503_v19  }
 0xa75   : > { %1661 = vrot.lane.b32.xlu0 %v3670_v20, %s3847_s30 }
 0xa79   : > { %1673 = vperm.xlu0 %3525, %v1671_v22  }
 0xade   : > { %v1496_v26 = vpop.permute.xlu1 %1495 }
 0xadf   : > { %v1500_v27 = vmul.f32 %v4371_v41, %v1496_v26 }
 0xae1   : > { %v1510_v30 = vrot.slane %v1500_v27, 7 }
 0xae2   : > { %v1494_v29 = vpop.permute.xlu1 %1493 }
 0xae3   : > { %v1499_v24 = vmul.f32 %v4375_v43, %v1494_v29  ;;  %v1664_v34 = vpop.permute.xlu0 %1663 }
 0xae4   : > { %v1668_v31 = vmul.f32 %v4377_v45, %v1664_v34 }
 0xae5   : > { %v1511_v33 = vsel %vm499_vm3, %v1510_v30, %v1499_v24 }
 0xae6   : > { %1512 = vrot.lane.b32.xlu1 %v1511_v33, %s3848_s29  ;;  %v1678_v37 = vrot.slane %v1668_v31, 7 }
 0xae7   : > { %v1662_v36 = vpop.permute.xlu0 %1661 }
 0xae8   : > { %v1667_v35 = vmul.f32 %v4383_v50, %v1662_v36 }
 0xaea   : > { %1520 = vrot.lane.b32.xlu1 %v1519_v4, %s3849_s10  ;;  %v1679_v38 = vsel %vm499_vm3, %v1678_v37, %v1667_v35 }
 0xaeb   : > { %1680 = vrot.lane.b32.xlu0 %v1679_v38, %s3848_s29 }
 0xaef   : > { %1688 = vrot.lane.b32.xlu0 %v1687_v12, %s3849_s10 }
 0xaf3   : > { %v1506_v39 = vpop.permute.xlu1 %1505 }
 0xaf4   : > { %vm1507_vm6 = vcmp.eq.s32.totalorder %v1506_v39, 1 }
 0xaf8   : > { %v1674_v41 = vpop.permute.xlu0 %1673 }
 0xaf9   : > { %vm1675_vm8 = vcmp.eq.s32.totalorder %v1674_v41, 1 }
 0xb58   : > { %v1513_v40 = vpop.permute.xlu1 %1512 }
 0xb59   : > { %v4428_v32 = vsel %vm1507_vm6, %v1513_v40, %v4315_v46  ;;  %v1524_v42 = vsel %vm1507_vm6, %v1513_v40, 0.0 }
 0xb5a   : > { %v1532_v43 = vrot.slane %v1524_v42, %v4091_v54  ;;  %v1723_v44 = vpack.c.bf16 %v4428_v32, %v4428_v32 }
 0xb5c   : > { %v1533_v45 = vcombine.high %v1532_v43, %v1532_v43  ;;  %v1540_v47 = vrot.slane %v1532_v43, %v4091_v54  ;;  %3430 = vmatmul.mubr.msk.bf16.vlgmr.msra.gmra.mrb[16].mxu0 %vm383_vm2, %v1723_v44  ;;  %v1521_v14 = vpop.permute.xlu1 %1520 }
 0xb5d   : > { %v1681_v48 = vpop.permute.xlu0 %1680  ;;  %3441 = vmatprep.mubr.msk.bf16.mxu0 %vm3843_vm1, %v3842_v6  ;;  %v4467_v17 = vsel %vm1507_vm6, %v1521_v14, %v4354_v21 }
 0xb5e   : > { %v1547_v46 = vrot.slane %v1533_v45, %v4091_v54  ;;  %1550 = vst.msk [vmem:[%s3973_s20 + $0x3] sm:$0x1] %vm539_vm7, %v1540_v47  ;;  %v4443_v49 = vsel %vm1675_vm8, %v1681_v48, %v4330_v55  ;;  %v1692_v50 = vsel %vm1675_vm8, %v1681_v48, 0.0  ;;  %v1796_v20 = vrot.slane %v4467_v17, 1 }
 0xb5f   : > { %v1700_v52 = vrot.slane %v1692_v50, %v4091_v54  ;;  %v1891_v53 = vpack.c.bf16 %v4443_v49, %v4443_v49 }
 0xb60   : > { %1551 = vst.msk [vmem:[%s3973_s20 + $0xb] sm:$0x1] %vm539_vm7, %v1547_v46 }
 0xb61   : > { %v1701_v51 = vcombine.high %v1700_v52, %v1700_v52  ;;  %v1708_v57 = vrot.slane %v1700_v52, %v4091_v54  ;;  %3436 = vmatmul.mubr.msk.bf16.vlgmr.msra.gmra.mrb[16].mxu1 %vm383_vm2, %v1891_v53  ;;  %v1689_v19 = vpop.permute.xlu0 %1688 }
 0xb62   : > { %3447 = vmatprep.mubr.msk.bf16.mxu1 %vm3843_vm1, %v3842_v6  ;;  %v4474_v23 = vsel %vm1675_vm8, %v1689_v19, %v4361_v28  ;;  %v3537_v19 = vld [vmem:[%s4867_s3] sm:$0xff]  }
 0xb63   : > { %v1715_v55 = vrot.slane %v1701_v51, %v4091_v54  ;;  %1718 = vst.msk [vmem:[%s3975_s28 + $0x4] sm:$0x1] %vm539_vm7, %v1708_v57  ;;  %v1964_v21 = vrot.slane %v4474_v23, 1  ;;  %3440 = vmatpush3.bf16.msra.mxu0 %v3537_v19 }
 0xb64   : > { %3451 = vmatprep.subr.bf16.mxu0 %v3842_v6 }
 0xb65   : > { %1719 = vst.msk [vmem:[%s3975_s28 + $0xc] sm:$0x1] %vm539_vm7, %v1715_v55 }
 0xc2f   : > { %v1769_v59 = vpop.f32.mrb[16].mxu0 }
 0xc30   : > { %v1776_v56 = vrot.slane %v1769_v59, 1  ;;  %v3431_v61 = vpop.f32.mrb[17].mxu0  ;;  %v1779_v3 = vadd.f32 %v1769_v59, %v1721_v8 }
 0xc31   : > { %v1772_v60 = vpop.f32.mrb[18].mxu0 }
 0xc32   : > { %v1780_v0 = vadd.f32 %v1776_v56, %v1722_v58  ;;  %v3432_v1 = vpop.f32.mrb[19].mxu0  ;;  %v3311_v26 = vmul.f32 -1.442695, %v1779_v3 }
 0xc34   : > { %v1937_v63 = vpop.f32.mrb[16].mxu1  ;;  %3671 = vtanh.f32 %v1780_v0  ;;  %v3312_v25 = vmul.f32 -1.442695, %v1780_v0 }
 0xc35   : > { %v1944_v9 = vrot.slane %v1937_v63, 1  ;;  %v3437_v4 = vpop.f32.mrb[17].mxu1  ;;  %3673 = vtanh.f32 %v1779_v3  ;;  %v1947_v12 = vadd.f32 %v1937_v63, %v1889_v7 }
 0xc36   : > { %v1940_v5 = vpop.f32.mrb[18].mxu1 }
 0xc37   : > { %v1948_v10 = vadd.f32 %v1944_v9, %v1890_v2  ;;  %v3438_v11 = vpop.f32.mrb[19].mxu1  ;;  %v3315_v28 = vmul.f32 -1.442695, %v1947_v12 }
 0xc39   : > { %3675 = vtanh.f32 %v1948_v10  ;;  %v3316_v27 = vmul.f32 -1.442695, %v1948_v10  ;;  %v1837_v10 = vstv %s1720_s25  ;;  %s2224_s25 = sadd.s32 2, %s4053_s16 }
 0xc3a   : > { %3677 = vtanh.f32 %v1947_v12  ;;  %vm1838_vm9 = vcmp.lt.s32.totalorder %v1837_v10, %v4399_v15 }
 0xc3b   : > { %3679 = vpow2.f32 %v3312_v25  ;;  %v1839_v14 = vsel %vm1838_vm9, 1, %v3846_v62  ;;  %vm3063_vm9 = vcmask 123904  }
 0xc3c   : > { %3681 = vpow2.f32 %v3311_v26 }
 0xc3d   : > { %3683 = vpow2.f32 %v3316_v27 }
 0xc3e   : > { %v3672_v13 = vpop.eup %3671  ;;  %3685 = vpow2.f32 %v3315_v28 }
 0xc3f   : > { %1809 = vrot.lane.b32.xlu1 %v3672_v13, %s3844_s8  ;;  %v3674_v16 = vpop.eup %3673  ;;  %v2005_v13 = vstv %s1888_s12 }
 0xc40   : > { %vm2006_vm10 = vcmp.lt.s32.totalorder %v2005_v13, %v4399_v15 }
 0xc43   : > { %v3676_v18 = vpop.eup %3675  ;;  %1807 = vrot.lane.b32.xlu1 %v3674_v16, %s3844_s8 }
 0xc44   : > { %1977 = vrot.lane.b32.xlu0 %v3676_v18, %s3844_s8  ;;  %v3678_v22 = vpop.eup %3677  ;;  %v2007_v18 = vsel %vm2006_vm10, 1, %v3846_v62 }
 0xc45   : > { %v3680_v29 = vpop.eup %3679 }
 0xc46   : > { %v1788_v30 = vadd.f32 1.0, %v3680_v29  ;;  %v3682_v24 = vpop.eup %3681 }
 0xc47   : > { %1799 = vrot.lane.b32.xlu1 %v1796_v20, %s3845_s9  ;;  %v3684_v34 = vpop.eup %3683  ;;  %v1787_v31 = vadd.f32 1.0, %v3682_v24  ;;  %v3538_v20 = vld [vmem:[%s4868_s4] sm:$0xff]  }
 0xc48   : > { %1975 = vrot.lane.b32.xlu0 %v3678_v22, %s3844_s8  ;;  %3687 = vrcp.f32 %v1788_v30  ;;  %v1956_v33 = vadd.f32 1.0, %v3684_v34  ;;  %v3686_v36 = vpop.eup %3685  ;;  %3446 = vmatpush3.bf16.msra.mxu1 %v3538_v20 }
 0xc49   : > { %3689 = vrcp.f32 %v1787_v31  ;;  %v1955_v37 = vadd.f32 1.0, %v3686_v36  ;;  %3457 = vmatprep.subr.bf16.mxu1 %v3842_v6 }
 0xc4a   : > { %3691 = vrcp.f32 %v1956_v33 }
 0xc4b   : > { %1797 = vrot.lane.b32.xlu1 %v4467_v17, %s3845_s9  ;;  %3693 = vrcp.f32 %v1955_v37 }
 0xc4c   : > { %1967 = vrot.lane.b32.xlu0 %v1964_v21, %s3845_s9 }
 0xc4f   : > { %1965 = vrot.lane.b32.xlu1 %v4474_v23, %s3845_s9 }
 0xc52   : > { %v4484_v35 = vpop.eup %3687 }
 0xc53   : > { %v4488_v40 = vpop.eup %3689 }
 0xc54   : > { %v4490_v42 = vpop.eup %3691 }
 0xc55   : > { %v4496_v47 = vpop.eup %3693 }
 0xcb1   : > { %v1810_v38 = vpop.permute.xlu1 %1809 }
 0xcb2   : > { %v1814_v39 = vmul.f32 %v4484_v35, %v1810_v38 }
 0xcb4   : > { %1819 = vrot.lane.b32.xlu0 %v1814_v39, %s3845_s9 }
 0xcb5   : > { %v1808_v41 = vpop.permute.xlu1 %1807 }
 0xcb6   : > { %v1813_v43 = vmul.f32 %v4488_v40, %v1808_v41  ;;  %v1978_v44 = vpop.permute.xlu0 %1977 }
 0xcb7   : > { %v1982_v45 = vmul.f32 %v4490_v42, %v1978_v44 }
 0xcb8   : > { %1817 = vrot.lane.b32.xlu1 %v1813_v43, %s3845_s9 }
 0xcb9   : > { %1987 = vrot.lane.b32.xlu0 %v1982_v45, %s3845_s9  ;;  %v1800_v50 = vpop.permute.xlu1 %1799 }
 0xcba   : > { %v1976_v48 = vpop.permute.xlu0 %1975  ;;  %v1804_v51 = vmul.f32 %v4484_v35, %v1800_v50 }
 0xcbb   : > { %v1981_v46 = vmul.f32 %v4496_v47, %v1976_v48 }
 0xcbd   : > { %1985 = vrot.lane.b32.xlu0 %v1981_v46, %s3845_s9  ;;  %v1798_v52 = vpop.permute.xlu1 %1797 }
 0xcbe   : > { %v1968_v53 = vpop.permute.xlu0 %1967  ;;  %v1803_v59 = vmul.f32 %v4488_v40, %v1798_v52 }
 0xcbf   : > { %v1972_v56 = vmul.f32 %v4490_v42, %v1968_v53  ;;  %v2058_v53 = vld [vmem:[%s3969_s18 + $0xd] sm:$0x1] }
 0xcc1   : > { %v1966_v57 = vpop.permute.xlu1 %1965 }
 0xcc2   : > { %v1971_v63 = vmul.f32 %v4496_v47, %v1966_v57 }
 0xd26   : > { %v1820_v55 = vpop.permute.xlu0 %1819 }
 0xd27   : > { %v1824_v58 = vadd.f32 %v1820_v55, %v1804_v51 }
 0xd29   : > { %3695 = vtanh.f32 %v1824_v58  ;;  %v1854_v60 = vrot.slane %v1824_v58, 7 }
 0xd2a   : > { %v1818_v61 = vpop.permute.xlu1 %1817 }
 0xd2b   : > { %v1823_v8 = vadd.f32 %v1818_v61, %v1803_v59  ;;  %v1988_v0 = vpop.permute.xlu0 %1987  ;;  %v2057_v59 = vld [vmem:[%s3969_s18 + $0x5] sm:$0x1] }
 0xd2c   : > { %v1992_v1 = vadd.f32 %v1988_v0, %v1972_v56 }
 0xd2d   : > { %3697 = vtanh.f32 %v1823_v8  ;;  %v1855_v2 = vsel %vm499_vm3, %v1854_v60, %v1823_v8  ;;  %v2226_v60 = vld [vmem:[%s3971_s19 + $0xa] sm:$0x1] }
 0xd2e   : > { %3699 = vtanh.f32 %v1992_v1  ;;  %v2022_v9 = vrot.slane %v1992_v1, 7 }
 0xd2f   : > { %v1986_v3 = vpop.permute.xlu0 %1985 }
 0xd30   : > { %v1991_v4 = vadd.f32 %v1986_v3, %v1971_v63  ;;  %v2225_v3 = vld [vmem:[%s3971_s19 + $0x2] sm:$0x1] }
 0xd32   : > { %3701 = vtanh.f32 %v1991_v4  ;;  %v2023_v5 = vsel %vm499_vm3, %v2022_v9, %v1991_v4 }
 0xd33   : > { %v3696_v7 = vpop.eup %3695 }
 0xd34   : > { %1831 = vrot.lane.b32.xlu1 %v3696_v7, %s3847_s30 }
 0xd37   : > { %v3698_v11 = vpop.eup %3697 }
 0xd38   : > { %v3700_v12 = vpop.eup %3699  ;;  %1829 = vrot.lane.b32.xlu1 %v3698_v11, %s3847_s30 }
 0xd39   : > { %1999 = vrot.lane.b32.xlu0 %v3700_v12, %s3847_s30 }
 0xd3c   : > { %v3702_v16 = vpop.eup %3701  ;;  %1841 = vperm.xlu1 %3526, %v1839_v14  }
 0xd3d   : > { %1997 = vrot.lane.b32.xlu0 %v3702_v16, %s3847_s30 }
 0xd41   : > { %2009 = vperm.xlu0 %3525, %v2007_v18  }
 0xda6   : > { %v1832_v22 = vpop.permute.xlu1 %1831 }
 0xda7   : > { %v1836_v21 = vmul.f32 %v4484_v35, %v1832_v22 }
 0xda9   : > { %v1846_v26 = vrot.slane %v1836_v21, 7 }
 0xdaa   : > { %v1830_v25 = vpop.permute.xlu1 %1829 }
 0xdab   : > { %v1835_v27 = vmul.f32 %v4488_v40, %v1830_v25  ;;  %v2000_v28 = vpop.permute.xlu0 %1999 }
 0xdac   : > { %v2004_v29 = vmul.f32 %v4490_v42, %v2000_v28 }
 0xdad   : > { %v1847_v30 = vsel %vm499_vm3, %v1846_v26, %v1835_v27 }
 0xdae   : > { %1848 = vrot.lane.b32.xlu1 %v1847_v30, %s3848_s29  ;;  %v2014_v34 = vrot.slane %v2004_v29, 7 }
 0xdaf   : > { %v1998_v24 = vpop.permute.xlu0 %1997 }
 0xdb0   : > { %v2003_v31 = vmul.f32 %v4496_v47, %v1998_v24 }
 0xdb2   : > { %1856 = vrot.lane.b32.xlu1 %v1855_v2, %s3849_s10  ;;  %v2015_v33 = vsel %vm499_vm3, %v2014_v34, %v2003_v31 }
 0xdb3   : > { %2016 = vrot.lane.b32.xlu0 %v2015_v33, %s3848_s29 }
 0xdb7   : > { %2024 = vrot.lane.b32.xlu0 %v2023_v5, %s3849_s10 }
 0xdbb   : > { %v1842_v36 = vpop.permute.xlu1 %1841 }
 0xdbc   : > { %vm1843_vm11 = vcmp.eq.s32.totalorder %v1842_v36, 1 }
 0xdc0   : > { %v2010_v35 = vpop.permute.xlu0 %2009 }
 0xdc1   : > { %vm2011_vm12 = vcmp.eq.s32.totalorder %v2010_v35, 1 }
 0xe20   : > { %v1849_v37 = vpop.permute.xlu1 %1848 }
 0xe21   : > { %v4536_v38 = vsel %vm1843_vm11, %v1849_v37, %v4428_v32  ;;  %v1860_v39 = vsel %vm1843_vm11, %v1849_v37, 0.0 }
 0xe22   : > { %v1868_v40 = vrot.slane %v1860_v39, %v4091_v54  ;;  %v2059_v41 = vpack.c.bf16 %v4536_v38, %v4536_v38 }
 0xe24   : > { %v1869_v42 = vcombine.high %v1868_v40, %v1868_v40  ;;  %v1876_v43 = vrot.slane %v1868_v40, %v4091_v54  ;;  %3442 = vmatmul.mubr.msk.bf16.vlgmr.msra.gmra.mrb[20].mxu0 %vm383_vm2, %v2059_v41  ;;  %v1857_v10 = vpop.permute.xlu1 %1856 }
 0xe25   : > { %v2017_v44 = vpop.permute.xlu0 %2016  ;;  %3453 = vmatprep.mubr.msk.bf16.mxu0 %vm3843_vm1, %v3842_v6  ;;  %v4575_v12 = vsel %vm1843_vm11, %v1857_v10, %v4467_v17 }
 0xe26   : > { %v1883_v32 = vrot.slane %v1869_v42, %v4091_v54  ;;  %1886 = vst.msk [vmem:[%s3973_s20 + $0x4] sm:$0x1] %vm539_vm7, %v1876_v43  ;;  %v4551_v45 = vsel %vm2011_vm12, %v2017_v44, %v4443_v49  ;;  %v2028_v47 = vsel %vm2011_vm12, %v2017_v44, 0.0  ;;  %v2132_v16 = vrot.slane %v4575_v12, 1 }
 0xe27   : > { %v2036_v48 = vrot.slane %v2028_v47, %v4091_v54  ;;  %v2227_v46 = vpack.c.bf16 %v4551_v45, %v4551_v45 }
 0xe28   : > { %1887 = vst.msk [vmem:[%s3973_s20 + $0xc] sm:$0x1] %vm539_vm7, %v1883_v32 }
 0xe29   : > { %v2037_v50 = vcombine.high %v2036_v48, %v2036_v48  ;;  %v2044_v52 = vrot.slane %v2036_v48, %v4091_v54  ;;  %3448 = vmatmul.mubr.msk.bf16.vlgmr.msra.gmra.mrb[20].mxu1 %vm383_vm2, %v2227_v46  ;;  %v2025_v14 = vpop.permute.xlu0 %2024 }
 0xe2a   : > { %3459 = vmatprep.mubr.msk.bf16.mxu1 %vm3843_vm1, %v3842_v6  ;;  %v4582_v19 = vsel %vm2011_vm12, %v2025_v14, %v4474_v23  ;;  %v3539_v14 = vld [vmem:[%s4867_s3] sm:$0xff]  }
 0xe2b   : > { %v2051_v49 = vrot.slane %v2037_v50, %v4091_v54  ;;  %2054 = vst.msk [vmem:[%s3975_s28 + $0x3] sm:$0x1] %vm539_vm7, %v2044_v52  ;;  %v2300_v17 = vrot.slane %v4582_v19, 1  ;;  %3452 = vmatpush3.bf16.msra.mxu0 %v3539_v14 }
 0xe2c   : > { %3463 = vmatprep.subr.bf16.mxu0 %v3842_v6 }
 0xe2d   : > { %2055 = vst.msk [vmem:[%s3975_s28 + $0xb] sm:$0x1] %vm539_vm7, %v2051_v49 }
 0xef7   : > { %v2105_v51 = vpop.f32.mrb[20].mxu0 }
 0xef8   : > { %v2112_v57 = vrot.slane %v2105_v51, 1  ;;  %v3443_v55 = vpop.f32.mrb[21].mxu0  ;;  %v2115_v0 = vadd.f32 %v2105_v51, %v2057_v59 }
 0xef9   : > { %v2108_v58 = vpop.f32.mrb[22].mxu0 }
 0xefa   : > { %v2116_v56 = vadd.f32 %v2112_v57, %v2058_v53  ;;  %v3444_v61 = vpop.f32.mrb[23].mxu0  ;;  %v3319_v22 = vmul.f32 -1.442695, %v2115_v0 }
 0xefc   : > { %v2273_v8 = vpop.f32.mrb[20].mxu1  ;;  %3703 = vtanh.f32 %v2116_v56  ;;  %v3320_v20 = vmul.f32 -1.442695, %v2116_v56 }
 0xefd   : > { %v2280_v1 = vrot.slane %v2273_v8, 1  ;;  %v3449_v2 = vpop.f32.mrb[21].mxu1  ;;  %3705 = vtanh.f32 %v2115_v0  ;;  %v2283_v5 = vadd.f32 %v2273_v8, %v2225_v3 }
 0xefe   : > { %v2276_v63 = vpop.f32.mrb[22].mxu1 }
 0xeff   : > { %v2284_v9 = vadd.f32 %v2280_v1, %v2226_v60  ;;  %v3450_v4 = vpop.f32.mrb[23].mxu1  ;;  %v3323_v23 = vmul.f32 -1.442695, %v2283_v5 }
 0xf01   : > { %3707 = vtanh.f32 %v2284_v9  ;;  %v3324_v21 = vmul.f32 -1.442695, %v2284_v9  ;;  %v2173_v9 = vstv %s2056_s23  ;;  %s2560_s23 = sadd.s32 1, %s4053_s16 }
 0xf02   : > { %3709 = vtanh.f32 %v2283_v5  ;;  %vm2174_vm13 = vcmp.lt.s32.totalorder %v2173_v9, %v4399_v15 }
 0xf03   : > { %3711 = vpow2.f32 %v3320_v20  ;;  %v2175_v10 = vsel %vm2174_vm13, 1, %v3846_v62 }
 0xf04   : > { %3713 = vpow2.f32 %v3319_v22 }
 0xf05   : > { %3715 = vpow2.f32 %v3324_v21 }
 0xf06   : > { %v3704_v7 = vpop.eup %3703  ;;  %3717 = vpow2.f32 %v3323_v23 }
 0xf07   : > { %2145 = vrot.lane.b32.xlu1 %v3704_v7, %s3844_s8  ;;  %v3706_v11 = vpop.eup %3705  ;;  %v2341_v7 = vstv %s2224_s25 }
 0xf08   : > { %vm2342_vm14 = vcmp.lt.s32.totalorder %v2341_v7, %v4399_v15 }
 0xf0b   : > { %v3708_v13 = vpop.eup %3707  ;;  %2143 = vrot.lane.b32.xlu1 %v3706_v11, %s3844_s8 }
 0xf0c   : > { %2313 = vrot.lane.b32.xlu0 %v3708_v13, %s3844_s8  ;;  %v3710_v18 = vpop.eup %3709  ;;  %v2343_v13 = vsel %vm2342_vm14, 1, %v3846_v62 }
 0xf0d   : > { %v3712_v25 = vpop.eup %3711 }
 0xf0e   : > { %v2124_v26 = vadd.f32 1.0, %v3712_v25  ;;  %v3714_v27 = vpop.eup %3713 }
 0xf0f   : > { %2135 = vrot.lane.b32.xlu1 %v2132_v16, %s3845_s9  ;;  %v3716_v28 = vpop.eup %3715  ;;  %v2123_v29 = vadd.f32 1.0, %v3714_v27  ;;  %v3540_v16 = vld [vmem:[%s4868_s4] sm:$0xff]  }
 0xf10   : > { %2311 = vrot.lane.b32.xlu0 %v3710_v18, %s3844_s8  ;;  %3719 = vrcp.f32 %v2124_v26  ;;  %v2292_v30 = vadd.f32 1.0, %v3716_v28  ;;  %v3718_v24 = vpop.eup %3717  ;;  %3458 = vmatpush3.bf16.msra.mxu1 %v3540_v16 }
 0xf11   : > { %3721 = vrcp.f32 %v2123_v29  ;;  %v2291_v34 = vadd.f32 1.0, %v3718_v24  ;;  %3469 = vmatprep.subr.bf16.mxu1 %v3842_v6 }
 0xf12   : > { %3723 = vrcp.f32 %v2292_v30 }
 0xf13   : > { %2133 = vrot.lane.b32.xlu1 %v4575_v12, %s3845_s9  ;;  %3725 = vrcp.f32 %v2291_v34 }
 0xf14   : > { %2303 = vrot.lane.b32.xlu0 %v2300_v17, %s3845_s9 }
 0xf17   : > { %2301 = vrot.lane.b32.xlu1 %v4582_v19, %s3845_s9 }
 0xf1a   : > { %v4592_v31 = vpop.eup %3719 }
 0xf1b   : > { %v4596_v37 = vpop.eup %3721 }
 0xf1c   : > { %v4598_v39 = vpop.eup %3723 }
 0xf1d   : > { %v4604_v43 = vpop.eup %3725 }
 0xf79   : > { %v2146_v33 = vpop.permute.xlu1 %2145 }
 0xf7a   : > { %v2150_v36 = vmul.f32 %v4592_v31, %v2146_v33 }
 0xf7c   : > { %2155 = vrot.lane.b32.xlu0 %v2150_v36, %s3845_s9 }
 0xf7d   : > { %v2144_v35 = vpop.permute.xlu1 %2143 }
 0xf7e   : > { %v2149_v40 = vmul.f32 %v4596_v37, %v2144_v35  ;;  %v2314_v41 = vpop.permute.xlu0 %2313 }
 0xf7f   : > { %v2318_v42 = vmul.f32 %v4598_v39, %v2314_v41 }
 0xf80   : > { %2153 = vrot.lane.b32.xlu1 %v2149_v40, %s3845_s9 }
 0xf81   : > { %2323 = vrot.lane.b32.xlu0 %v2318_v42, %s3845_s9  ;;  %v2136_v47 = vpop.permute.xlu1 %2135 }
 0xf82   : > { %v2312_v44 = vpop.permute.xlu0 %2311  ;;  %v2140_v50 = vmul.f32 %v4592_v31, %v2136_v47 }
 0xf83   : > { %v2317_v32 = vmul.f32 %v4604_v43, %v2312_v44 }
 0xf85   : > { %2321 = vrot.lane.b32.xlu0 %v2317_v32, %s3845_s9  ;;  %v2134_v48 = vpop.permute.xlu1 %2133 }
 0xf86   : > { %v2304_v46 = vpop.permute.xlu0 %2303  ;;  %v2139_v51 = vmul.f32 %v4596_v37, %v2134_v48 }
 0xf87   : > { %v2308_v57 = vmul.f32 %v4598_v39, %v2304_v46  ;;  %v2394_v46 = vld [vmem:[%s3969_s18 + $0xe] sm:$0x1] }
 0xf89   : > { %v2302_v52 = vpop.permute.xlu1 %2301 }
 0xf8a   : > { %v2307_v8 = vmul.f32 %v4604_v43, %v2302_v52 }
 0xfee   : > { %v2156_v49 = vpop.permute.xlu0 %2155 }
 0xfef   : > { %v2160_v53 = vadd.f32 %v2156_v49, %v2140_v50 }
 0xff1   : > { %3727 = vtanh.f32 %v2160_v53  ;;  %v2190_v58 = vrot.slane %v2160_v53, 7 }
 0xff2   : > { %v2154_v55 = vpop.permute.xlu1 %2153 }
 0xff3   : > { %v2159_v59 = vadd.f32 %v2154_v55, %v2139_v51  ;;  %v2324_v56 = vpop.permute.xlu0 %2323  ;;  %v2393_v51 = vld [vmem:[%s3969_s18 + $0x6] sm:$0x1] }
 0xff4   : > { %v2328_v61 = vadd.f32 %v2324_v56, %v2308_v57 }
 0xff5   : > { %3729 = vtanh.f32 %v2159_v59  ;;  %v2191_v60 = vsel %vm499_vm3, %v2190_v58, %v2159_v59  ;;  %v2562_v58 = vld [vmem:[%s3971_s19 + $0x9] sm:$0x1] }
 0xff6   : > { %3731 = vtanh.f32 %v2328_v61  ;;  %v2358_v1 = vrot.slane %v2328_v61, 7 }
 0xff7   : > { %v2322_v0 = vpop.permute.xlu0 %2321 }
 0xff8   : > { %v2327_v2 = vadd.f32 %v2322_v0, %v2307_v8  ;;  %v2561_v8 = vld [vmem:[%s3971_s19 + $0x1] sm:$0x1] }
 0xffa   : > { %3733 = vtanh.f32 %v2327_v2  ;;  %v2359_v63 = vsel %vm499_vm3, %v2358_v1, %v2327_v2 }
 0xffb   : > { %v3728_v3 = vpop.eup %3727 }
 0xffc   : > { %2167 = vrot.lane.b32.xlu1 %v3728_v3, %s3847_s30 }
 0xfff   : > { %v3730_v4 = vpop.eup %3729 }
0x1000   : > { %v3732_v5 = vpop.eup %3731  ;;  %2165 = vrot.lane.b32.xlu1 %v3730_v4, %s3847_s30 }
0x1001   : > { %2335 = vrot.lane.b32.xlu0 %v3732_v5, %s3847_s30 }
0x1004   : > { %v3734_v11 = vpop.eup %3733  ;;  %2177 = vperm.xlu1 %3526, %v2175_v10  }
0x1005   : > { %2333 = vrot.lane.b32.xlu0 %v3734_v11, %s3847_s30 }
0x1009   : > { %2345 = vperm.xlu0 %3525, %v2343_v13  }
0x106e   : > { %v2168_v18 = vpop.permute.xlu1 %2167 }
0x106f   : > { %v2172_v17 = vmul.f32 %v4592_v31, %v2168_v18 }
0x1071   : > { %v2182_v22 = vrot.slane %v2172_v17, 7 }
0x1072   : > { %v2166_v20 = vpop.permute.xlu1 %2165 }
0x1073   : > { %v2171_v21 = vmul.f32 %v4596_v37, %v2166_v20  ;;  %v2336_v23 = vpop.permute.xlu0 %2335 }
0x1074   : > { %v2340_v25 = vmul.f32 %v4598_v39, %v2336_v23 }
0x1075   : > { %v2183_v26 = vsel %vm499_vm3, %v2182_v22, %v2171_v21 }
0x1076   : > { %2184 = vrot.lane.b32.xlu1 %v2183_v26, %s3848_s29  ;;  %v2350_v28 = vrot.slane %v2340_v25, 7 }
0x1077   : > { %v2334_v27 = vpop.permute.xlu0 %2333 }
0x1078   : > { %v2339_v29 = vmul.f32 %v4604_v43, %v2334_v27 }
0x107a   : > { %2192 = vrot.lane.b32.xlu1 %v2191_v60, %s3849_s10  ;;  %v2351_v30 = vsel %vm499_vm3, %v2350_v28, %v2339_v29 }
0x107b   : > { %2352 = vrot.lane.b32.xlu0 %v2351_v30, %s3848_s29 }
0x107f   : > { %2360 = vrot.lane.b32.xlu0 %v2359_v63, %s3849_s10 }
0x1083   : > { %v2178_v24 = vpop.permute.xlu1 %2177 }
0x1084   : > { %vm2179_vm15 = vcmp.eq.s32.totalorder %v2178_v24, 1 }
0x1088   : > { %v2346_v31 = vpop.permute.xlu0 %2345 }
0x1089   : > { %vm2347_vm0 = vcmp.eq.s32.totalorder %v2346_v31, 1 }
0x10e8   : > { %v2185_v34 = vpop.permute.xlu1 %2184 }
0x10e9   : > { %v4644_v33 = vsel %vm2179_vm15, %v2185_v34, %v4536_v38  ;;  %v2196_v36 = vsel %vm2179_vm15, %v2185_v34, 0.0 }
0x10ea   : > { %v2204_v37 = vrot.slane %v2196_v36, %v4091_v54  ;;  %v2395_v35 = vpack.c.bf16 %v4644_v33, %v4644_v33 }
0x10ec   : > { %v2205_v39 = vcombine.high %v2204_v37, %v2204_v37  ;;  %v2212_v40 = vrot.slane %v2204_v37, %v4091_v54  ;;  %3454 = vmatmul.mubr.msk.bf16.vlgmr.msra.gmra.mrb[24].mxu0 %vm383_vm2, %v2395_v35  ;;  %v2193_v3 = vpop.permute.xlu1 %2192 }
0x10ed   : > { %v2353_v41 = vpop.permute.xlu0 %2352  ;;  %3465 = vmatprep.mubr.msk.bf16.mxu0 %vm3843_vm1, %v3842_v6  ;;  %v4683_v4 = vsel %vm2179_vm15, %v2193_v3, %v4575_v12 }
0x10ee   : > { %v2219_v38 = vrot.slane %v2205_v39, %v4091_v54  ;;  %2222 = vst.msk [vmem:[%s3973_s20 + $0x5] sm:$0x1] %vm539_vm7, %v2212_v40  ;;  %v4659_v42 = vsel %vm2347_vm0, %v2353_v41, %v4551_v45  ;;  %v2364_v43 = vsel %vm2347_vm0, %v2353_v41, 0.0  ;;  %v2468_v10 = vrot.slane %v4683_v4, 1 }
0x10ef   : > { %v2372_v44 = vrot.slane %v2364_v43, %v4091_v54  ;;  %v2563_v32 = vpack.c.bf16 %v4659_v42, %v4659_v42 }
0x10f0   : > { %2223 = vst.msk [vmem:[%s3973_s20 + $0xd] sm:$0x1] %vm539_vm7, %v2219_v38 }
0x10f1   : > { %v2373_v47 = vcombine.high %v2372_v44, %v2372_v44  ;;  %v2380_v48 = vrot.slane %v2372_v44, %v4091_v54  ;;  %3460 = vmatmul.mubr.msk.bf16.vlgmr.msra.gmra.mrb[24].mxu1 %vm383_vm2, %v2563_v32  ;;  %v2361_v7 = vpop.permute.xlu0 %2360 }
0x10f2   : > { %3471 = vmatprep.mubr.msk.bf16.mxu1 %vm3843_vm1, %v3842_v6  ;;  %v4690_v13 = vsel %vm2347_vm0, %v2361_v7, %v4582_v19  ;;  %v3542_v7 = vld [vmem:[%s4868_s4] sm:$0xff]  }
0x10f3   : > { %v2387_v45 = vrot.slane %v2373_v47, %v4091_v54  ;;  %2390 = vst.msk [vmem:[%s3975_s28 + $0x2] sm:$0x1] %vm539_vm7, %v2380_v48  ;;  %v2636_v12 = vrot.slane %v4690_v13, 1  ;;  %3470 = vmatpush3.bf16.msra.mxu1 %v3542_v7 }
0x10f5   : > { %2391 = vst.msk [vmem:[%s3975_s28 + $0xa] sm:$0x1] %vm539_vm7, %v2387_v45 }
0x11bf   : > { %v2441_v50 = vpop.f32.mrb[24].mxu0 }
0x11c0   : > { %v2448_v52 = vrot.slane %v2441_v50, 1  ;;  %v3455_v49 = vpop.f32.mrb[25].mxu0  ;;  %v2451_v56 = vadd.f32 %v2441_v50, %v2393_v51 }
0x11c1   : > { %v2444_v53 = vpop.f32.mrb[26].mxu0 }
0x11c2   : > { %v2452_v57 = vadd.f32 %v2448_v52, %v2394_v46  ;;  %v3456_v55 = vpop.f32.mrb[27].mxu0  ;;  %v3327_v16 = vmul.f32 -1.442695, %v2451_v56 }
0x11c4   : > { %v2609_v59 = vpop.f32.mrb[24].mxu1  ;;  %3735 = vtanh.f32 %v2452_v57  ;;  %v3328_v14 = vmul.f32 -1.442695, %v2452_v57 }
0x11c5   : > { %v2616_v6 = vrot.slane %v2609_v59, 1  ;;  %v3461_v61 = vpop.f32.mrb[25].mxu1  ;;  %3737 = vtanh.f32 %v2451_v56  ;;  %v2619_v2 = vadd.f32 %v2609_v59, %v2561_v8  ;;  %v2509_v8 = vstv %s2392_s21 }
0x11c6   : > { %v2612_v60 = vpop.f32.mrb[26].mxu1  ;;  %vm2510_vm1 = vcmp.lt.s32.totalorder %v2509_v8, %v4399_v15 }
0x11c7   : > { %v2620_v0 = vadd.f32 %v2616_v6, %v2562_v58  ;;  %v3462_v1 = vpop.f32.mrb[27].mxu1  ;;  %v3331_v19 = vmul.f32 -1.442695, %v2619_v2 }
0x11c9   : > { %3739 = vtanh.f32 %v2620_v0  ;;  %v3332_v18 = vmul.f32 -1.442695, %v2620_v0 }
0x11ca   : > { %3741 = vtanh.f32 %v2619_v2  ;;  %v2677_v2 = vstv %s2560_s23 }
0x11cb   : > { %3743 = vpow2.f32 %v3328_v14  ;;  %vm2678_vm4 = vcmp.lt.s32.totalorder %v2677_v2, %v4399_v15 }
0x11cc   : > { %3745 = vpow2.f32 %v3327_v16 }
0x11cd   : > { %3747 = vpow2.f32 %v3332_v18 }
0x11ce   : > { %v3736_v63 = vpop.eup %3735  ;;  %3749 = vpow2.f32 %v3331_v19 }
0x11cf   : > { %2481 = vrot.lane.b32.xlu1 %v3736_v63, %s3844_s8  ;;  %v3738_v9 = vpop.eup %3737  ;;  %v2511_v63 = vsel %vm2510_vm1, 1, %v3846_v62 }
0x11d3   : > { %v3740_v5 = vpop.eup %3739  ;;  %2479 = vrot.lane.b32.xlu1 %v3738_v9, %s3844_s8  ;;  %v2679_v9 = vsel %vm2678_vm4, 1, %v3846_v62 }
0x11d4   : > { %2649 = vrot.lane.b32.xlu0 %v3740_v5, %s3844_s8  ;;  %v3742_v11 = vpop.eup %3741  ;;  %v3541_v5 = vld [vmem:[%s4867_s3] sm:$0xff]  }
0x11d5   : > { %v3744_v17 = vpop.eup %3743  ;;  %3464 = vmatpush3.bf16.msra.mxu0 %v3541_v5 }
0x11d6   : > { %v2460_v20 = vadd.f32 1.0, %v3744_v17  ;;  %v3746_v22 = vpop.eup %3745 }
0x11d7   : > { %2471 = vrot.lane.b32.xlu1 %v2468_v10, %s3845_s9  ;;  %v3748_v21 = vpop.eup %3747  ;;  %v2459_v23 = vadd.f32 1.0, %v3746_v22 }
0x11d8   : > { %2647 = vrot.lane.b32.xlu0 %v3742_v11, %s3844_s8  ;;  %3751 = vrcp.f32 %v2460_v20  ;;  %v2628_v25 = vadd.f32 1.0, %v3748_v21  ;;  %v3750_v26 = vpop.eup %3749 }
0x11d9   : > { %3753 = vrcp.f32 %v2459_v23  ;;  %v2627_v27 = vadd.f32 1.0, %v3750_v26 }
0x11da   : > { %3755 = vrcp.f32 %v2628_v25 }
0x11db   : > { %2469 = vrot.lane.b32.xlu1 %v4683_v4, %s3845_s9  ;;  %3757 = vrcp.f32 %v2627_v27 }
0x11dc   : > { %2639 = vrot.lane.b32.xlu0 %v2636_v12, %s3845_s9 }
0x11df   : > { %2637 = vrot.lane.b32.xlu1 %v4690_v13, %s3845_s9 }
0x11e2   : > { %v4700_v28 = vpop.eup %3751 }
0x11e3   : > { %v3754_v24 = vpop.eup %3753 }
0x11e4   : > { %v3756_v31 = vpop.eup %3755 }
0x11e5   : > { %v3758_v39 = vpop.eup %3757 }
0x1241   : > { %v2482_v29 = vpop.permute.xlu1 %2481 }
0x1242   : > { %v2486_v30 = vmul.f32 %v4700_v28, %v2482_v29 }
0x1244   : > { %2491 = vrot.lane.b32.xlu0 %v2486_v30, %s3845_s9 }
0x1245   : > { %v2480_v34 = vpop.permute.xlu1 %2479 }
0x1246   : > { %v2485_v36 = vmul.f32 %v3754_v24, %v2480_v34  ;;  %v2650_v37 = vpop.permute.xlu0 %2649 }
0x1247   : > { %v2654_v35 = vmul.f32 %v3756_v31, %v2650_v37 }
0x1248   : > { %2489 = vrot.lane.b32.xlu1 %v2485_v36, %s3845_s9 }
0x1249   : > { %2659 = vrot.lane.b32.xlu0 %v2654_v35, %s3845_s9  ;;  %v2472_v38 = vpop.permute.xlu1 %2471 }
0x124a   : > { %v2648_v40 = vpop.permute.xlu0 %2647  ;;  %v2476_v32 = vmul.f32 %v4700_v28, %v2472_v38 }
0x124b   : > { %v2653_v41 = vmul.f32 %v3758_v39, %v2648_v40 }
0x124d   : > { %2657 = vrot.lane.b32.xlu0 %v2653_v41, %s3845_s9  ;;  %v2470_v43 = vpop.permute.xlu1 %2469 }
0x124e   : > { %v2640_v44 = vpop.permute.xlu0 %2639  ;;  %v2475_v46 = vmul.f32 %v3754_v24, %v2470_v43 }
0x124f   : > { %v2644_v50 = vmul.f32 %v3756_v31, %v2640_v44 }
0x1251   : > { %v2638_v47 = vpop.permute.xlu1 %2637 }
0x1252   : > { %v2643_v58 = vmul.f32 %v3758_v39, %v2638_v47 }
0x12b6   : > { %v2492_v48 = vpop.permute.xlu0 %2491 }
0x12b7   : > { %v2496_v45 = vadd.f32 %v2492_v48, %v2476_v32  ;;  %v2729_v48 = vld [vmem:[%s3969_s18 + $0x7] sm:$0x1] }
0x12b9   : > { %3759 = vtanh.f32 %v2496_v45  ;;  %v2526_v49 = vrot.slane %v2496_v45, 7 }
0x12ba   : > { %v2490_v52 = vpop.permute.xlu1 %2489 }
0x12bb   : > { %v2495_v53 = vadd.f32 %v2490_v52, %v2475_v46  ;;  %v2660_v51 = vpop.permute.xlu0 %2659 }
0x12bc   : > { %v2664_v57 = vadd.f32 %v2660_v51, %v2644_v50  ;;  %v2897_v50 = vld [vmem:[%s3971_s19 + $0x8] sm:$0x1] }
0x12bd   : > { %3761 = vtanh.f32 %v2495_v53  ;;  %v2527_v55 = vsel %vm499_vm3, %v2526_v49, %v2495_v53 }
0x12be   : > { %3763 = vtanh.f32 %v2664_v57  ;;  %v2694_v56 = vrot.slane %v2664_v57, 7 }
0x12bf   : > { %v2658_v59 = vpop.permute.xlu0 %2657 }
0x12c0   : > { %v2663_v6 = vadd.f32 %v2658_v59, %v2643_v58 }
0x12c2   : > { %3765 = vtanh.f32 %v2663_v6  ;;  %v2695_v61 = vsel %vm499_vm3, %v2694_v56, %v2663_v6 }
0x12c3   : > { %v3760_v60 = vpop.eup %3759 }
0x12c4   : > { %2503 = vrot.lane.b32.xlu1 %v3760_v60, %s3847_s30 }
0x12c7   : > { %v3762_v0 = vpop.eup %3761 }
0x12c8   : > { %v3764_v1 = vpop.eup %3763  ;;  %2501 = vrot.lane.b32.xlu1 %v3762_v0, %s3847_s30 }
0x12c9   : > { %2671 = vrot.lane.b32.xlu0 %v3764_v1, %s3847_s30 }
0x12cc   : > { %v3766_v3 = vpop.eup %3765  ;;  %2513 = vperm.xlu1 %3526, %v2511_v63  }
0x12cd   : > { %2669 = vrot.lane.b32.xlu0 %v3766_v3, %s3847_s30 }
0x12d1   : > { %2681 = vperm.xlu0 %3525, %v2679_v9  }
0x1336   : > { %v2504_v10 = vpop.permute.xlu1 %2503 }
0x1337   : > { %v2508_v15 = vmul.f32 %v4700_v28, %v2504_v10 }
0x1339   : > { %v2518_v12 = vrot.slane %v2508_v15, 7 }
0x133a   : > { %v2502_v11 = vpop.permute.xlu1 %2501 }
0x133b   : > { %v2507_v14 = vmul.f32 %v3754_v24, %v2502_v11  ;;  %v2672_v16 = vpop.permute.xlu0 %2671 }
0x133c   : > { %v2676_v18 = vmul.f32 %v3756_v31, %v2672_v16 }
0x133d   : > { %v2519_v19 = vsel %vm499_vm3, %v2518_v12, %v2507_v14 }
0x133e   : > { %2520 = vrot.lane.b32.xlu1 %v2519_v19, %s3848_s29  ;;  %v2686_v20 = vrot.slane %v2676_v18, 7 }
0x133f   : > { %v2670_v17 = vpop.permute.xlu0 %2669 }
0x1340   : > { %v2675_v22 = vmul.f32 %v3758_v39, %v2670_v17 }
0x1342   : > { %2528 = vrot.lane.b32.xlu1 %v2527_v55, %s3849_s10  ;;  %v2687_v21 = vsel %vm499_vm3, %v2686_v20, %v2675_v22  ;;  %v2896_v55 = vld [vmem:[%s3971_s19] sm:$0x1] }
0x1343   : > { %2688 = vrot.lane.b32.xlu0 %v2687_v21, %s3848_s29 }
0x1347   : > { %2696 = vrot.lane.b32.xlu0 %v2695_v61, %s3849_s10 }
0x134b   : > { %v2514_v23 = vpop.permute.xlu1 %2513 }
0x134c   : > { %vm2515_vm5 = vcmp.eq.s32.totalorder %v2514_v23, 1 }
0x1350   : > { %v2682_v26 = vpop.permute.xlu0 %2681 }
0x1351   : > { %vm2683_vm6 = vcmp.eq.s32.totalorder %v2682_v26, 1 }
0x13b0   : > { %v2521_v25 = vpop.permute.xlu1 %2520 }
0x13b1   : > { %v4735_v27 = vsel %vm2515_vm5, %v2521_v25, %v4644_v33  ;;  %v2532_v28 = vsel %vm2515_vm5, %v2521_v25, 0.0 }
0x13b2   : > { %v2540_v29 = vrot.slane %v2532_v28, %v4091_v54  ;;  %v2731_v30 = vpack.c.bf16 %v4735_v27, %v4735_v27 }
0x13b4   : > { %v2541_v24 = vcombine.high %v2540_v29, %v2540_v29  ;;  %v2548_v34 = vrot.slane %v2540_v29, %v4091_v54  ;;  %3466 = vmatmul.mubr.msk.bf16.vlgmr.msra.gmra.mrb[28].mxu0 %vm383_vm2, %v2731_v30  ;;  %v2529_v61 = vpop.permute.xlu1 %2528 }
0x13b5   : > { %v2689_v31 = vpop.permute.xlu0 %2688  ;;  %v4770_v8 = vsel %vm2515_vm5, %v2529_v61, %v4683_v4 }
0x13b6   : > { %v2555_v33 = vrot.slane %v2541_v24, %v4091_v54  ;;  %2558 = vst.msk [vmem:[%s3973_s20 + $0x6] sm:$0x1] %vm539_vm7, %v2548_v34  ;;  %v4748_v36 = vsel %vm2683_vm6, %v2689_v31, %v4659_v42  ;;  %v2700_v37 = vsel %vm2683_vm6, %v2689_v31, 0.0  ;;  %v2730_v42 = vld [vmem:[%s3969_s18 + $0xf] sm:$0x1]  ;;  %v2804_v2 = vrot.slane %v4770_v8, 1 }
0x13b7   : > { %v2708_v35 = vrot.slane %v2700_v37, %v4091_v54  ;;  %v2898_v39 = vpack.c.bf16 %v4748_v36, %v4748_v36  ;;  %s2728_s18 = sadd.s32 7, %s4051_s15 }
0x13b8   : > { %2559 = vst.msk [vmem:[%s3973_s20 + $0xe] sm:$0x1] %vm539_vm7, %v2555_v33 }
0x13b9   : > { %v2709_v40 = vcombine.high %v2708_v35, %v2708_v35  ;;  %v2716_v41 = vrot.slane %v2708_v35, %v4091_v54  ;;  %3472 = vmatmul.mubr.msk.bf16.vlgmr.msra.gmra.mrb[28].mxu1 %vm383_vm2, %v2898_v39  ;;  %v2697_v1 = vpop.permute.xlu0 %2696 }
0x13ba   : > { %v4777_v3 = vsel %vm2683_vm6, %v2697_v1, %v4690_v13 }
0x13bb   : > { %v2723_v38 = vrot.slane %v2709_v40, %v4091_v54  ;;  %2726 = vst.msk [vmem:[%s3975_s28 + $0x1] sm:$0x1] %vm539_vm7, %v2716_v41  ;;  %v2971_v4 = vrot.slane %v4777_v3, 1 }
0x13bd   : > { %2727 = vst.msk [vmem:[%s3975_s28 + $0x9] sm:$0x1] %vm539_vm7, %v2723_v38 }
0x1487   : > { %v2777_v43 = vpop.f32.mrb[28].mxu0 }
0x1488   : > { %v2784_v44 = vrot.slane %v2777_v43, 1  ;;  %v3467_v32 = vpop.f32.mrb[29].mxu0  ;;  %v2787_v49 = vadd.f32 %v2777_v43, %v2729_v48 }
0x1489   : > { %v2780_v47 = vpop.f32.mrb[30].mxu0 }
0x148a   : > { %v2788_v45 = vadd.f32 %v2784_v44, %v2730_v42  ;;  %v3468_v46 = vpop.f32.mrb[31].mxu0  ;;  %v3335_v5 = vmul.f32 -1.442695, %v2787_v49 }
0x148c   : > { %v2944_v52 = vpop.f32.mrb[28].mxu1  ;;  %3767 = vtanh.f32 %v2788_v45  ;;  %v3336_v9 = vmul.f32 -1.442695, %v2788_v45 }
0x148d   : > { %v2951_v53 = vrot.slane %v2944_v52, 1  ;;  %v3473_v51 = vpop.f32.mrb[29].mxu1  ;;  %3769 = vtanh.f32 %v2787_v49  ;;  %v2954_v56 = vadd.f32 %v2944_v52, %v2896_v55  ;;  %v3800_v55 = vld [vmem:[%s4864_s0] sm:$0x3] }
0x148e   : > { %v2947_v57 = vpop.f32.mrb[30].mxu1 }
0x148f   : > { %v2955_v58 = vadd.f32 %v2951_v53, %v2897_v50  ;;  %v3474_v59 = vpop.f32.mrb[31].mxu1  ;;  %v3339_v13 = vmul.f32 -1.442695, %v2954_v56  ;;  %v2845_v57 = vstv %s2728_s18 }
0x1490   : > { %vm2846_vm2 = vcmp.lt.s32.totalorder %v2845_v57, %v3800_v55 }
0x1491   : > { %3771 = vtanh.f32 %v2955_v58  ;;  %v3340_v7 = vmul.f32 -1.442695, %v2955_v58 }
0x1492   : > { %3773 = vtanh.f32 %v2954_v56  ;;  %v3012_v56 = vstv %s4053_s16 }
0x1493   : > { %3775 = vpow2.f32 %v3336_v9  ;;  %vm3013_vm8 = vcmp.lt.s32.totalorder %v3012_v56, %v3800_v55 }
0x1494   : > { %3777 = vpow2.f32 %v3335_v5 }
0x1495   : > { %3779 = vpow2.f32 %v3340_v7 }
0x1496   : > { %v3768_v6 = vpop.eup %3767  ;;  %3781 = vpow2.f32 %v3339_v13 }
0x1497   : > { %2817 = vrot.lane.b32.xlu1 %v3768_v6, %s3844_s8  ;;  %v3770_v60 = vpop.eup %3769  ;;  %v2847_v6 = vsel %vm2846_vm2, 1, %v3846_v62 }
0x149b   : > { %v3772_v0 = vpop.eup %3771  ;;  %2815 = vrot.lane.b32.xlu1 %v3770_v60, %s3844_s8  ;;  %v3014_v60 = vsel %vm3013_vm8, 1, %v3846_v62 }
0x149c   : > { %2984 = vrot.lane.b32.xlu0 %v3772_v0, %s3844_s8  ;;  %v3774_v63 = vpop.eup %3773 }
0x149d   : > { %v3776_v10 = vpop.eup %3775 }
0x149e   : > { %v2796_v15 = vadd.f32 1.0, %v3776_v10  ;;  %v3778_v11 = vpop.eup %3777 }
0x149f   : > { %2807 = vrot.lane.b32.xlu1 %v2804_v2, %s3845_s9  ;;  %v3780_v12 = vpop.eup %3779  ;;  %v2795_v14 = vadd.f32 1.0, %v3778_v11 }
0x14a0   : > { %2982 = vrot.lane.b32.xlu0 %v3774_v63, %s3844_s8  ;;  %3783 = vrcp.f32 %v2796_v15  ;;  %v2963_v16 = vadd.f32 1.0, %v3780_v12  ;;  %v3782_v18 = vpop.eup %3781 }
0x14a1   : > { %3785 = vrcp.f32 %v2795_v14  ;;  %v2962_v19 = vadd.f32 1.0, %v3782_v18 }
0x14a2   : > { %3787 = vrcp.f32 %v2963_v16 }
0x14a3   : > { %2805 = vrot.lane.b32.xlu1 %v4770_v8, %s3845_s9  ;;  %3789 = vrcp.f32 %v2962_v19 }
0x14a4   : > { %2974 = vrot.lane.b32.xlu0 %v2971_v4, %s3845_s9 }
0x14a7   : > { %2972 = vrot.lane.b32.xlu1 %v4777_v3, %s3845_s9 }
0x14aa   : > { %v3784_v17 = vpop.eup %3783 }
0x14ab   : > { %v3786_v21 = vpop.eup %3785 }
0x14ac   : > { %v3788_v25 = vpop.eup %3787 }
0x14ad   : > { %v3790_v30 = vpop.eup %3789 }
0x1509   : > { %v2818_v20 = vpop.permute.xlu1 %2817 }
0x150a   : > { %v2822_v22 = vmul.f32 %v3784_v17, %v2818_v20 }
0x150c   : > { %2827 = vrot.lane.b32.xlu0 %v2822_v22, %s3845_s9 }
0x150d   : > { %v2816_v23 = vpop.permute.xlu1 %2815 }
0x150e   : > { %v2821_v26 = vmul.f32 %v3786_v21, %v2816_v23  ;;  %v2985_v28 = vpop.permute.xlu0 %2984 }
0x150f   : > { %v2989_v29 = vmul.f32 %v3788_v25, %v2985_v28 }
0x1510   : > { %2825 = vrot.lane.b32.xlu1 %v2821_v26, %s3845_s9 }
0x1511   : > { %2994 = vrot.lane.b32.xlu0 %v2989_v29, %s3845_s9  ;;  %v2808_v31 = vpop.permute.xlu1 %2807 }
0x1512   : > { %v2983_v24 = vpop.permute.xlu0 %2982  ;;  %v2812_v35 = vmul.f32 %v3784_v17, %v2808_v31 }
0x1513   : > { %v2988_v34 = vmul.f32 %v3790_v30, %v2983_v24 }
0x1515   : > { %2992 = vrot.lane.b32.xlu0 %v2988_v34, %s3845_s9  ;;  %v2806_v33 = vpop.permute.xlu1 %2805 }
0x1516   : > { %v2975_v37 = vpop.permute.xlu0 %2974  ;;  %v2811_v38 = vmul.f32 %v3786_v21, %v2806_v33 }
0x1517   : > { %v2979_v42 = vmul.f32 %v3788_v25, %v2975_v37 }
0x1519   : > { %v2973_v39 = vpop.permute.xlu1 %2972 }
0x151a   : > { %v2978_v46 = vmul.f32 %v3790_v30, %v2973_v39 }
0x157e   : > { %v2828_v40 = vpop.permute.xlu0 %2827 }
0x157f   : > { %v2832_v41 = vadd.f32 %v2828_v40, %v2812_v35 }
0x1581   : > { %3791 = vtanh.f32 %v2832_v41  ;;  %v2862_v44 = vrot.slane %v2832_v41, 7 }
0x1582   : > { %v2826_v43 = vpop.permute.xlu1 %2825 }
0x1583   : > { %v2831_v32 = vadd.f32 %v2826_v43, %v2811_v38  ;;  %v2995_v47 = vpop.permute.xlu0 %2994 }
0x1584   : > { %v2999_v48 = vadd.f32 %v2995_v47, %v2979_v42 }
0x1585   : > { %3793 = vtanh.f32 %v2831_v32  ;;  %v2863_v45 = vsel %vm499_vm3, %v2862_v44, %v2831_v32 }
0x1586   : > { %3795 = vtanh.f32 %v2999_v48  ;;  %v3029_v52 = vrot.slane %v2999_v48, 7 }
0x1587   : > { %v2993_v50 = vpop.permute.xlu0 %2992 }
0x1588   : > { %v2998_v49 = vadd.f32 %v2993_v50, %v2978_v46 }
0x158a   : > { %3797 = vtanh.f32 %v2998_v49  ;;  %v3030_v53 = vsel %vm499_vm3, %v3029_v52, %v2998_v49 }
0x158b   : > { %v3792_v51 = vpop.eup %3791 }
0x158c   : > { %2839 = vrot.lane.b32.xlu1 %v3792_v51, %s3847_s30 }
0x158f   : > { %v3794_v58 = vpop.eup %3793 }
0x1590   : > { %v3796_v59 = vpop.eup %3795  ;;  %2837 = vrot.lane.b32.xlu1 %v3794_v58, %s3847_s30 }
0x1591   : > { %3006 = vrot.lane.b32.xlu0 %v3796_v59, %s3847_s30 }
0x1594   : > { %v3798_v61 = vpop.eup %3797  ;;  %2849 = vperm.xlu1 %3526, %v2847_v6  }
0x1595   : > { %3004 = vrot.lane.b32.xlu0 %v3798_v61, %s3847_s30 }
0x1599   : > { %3016 = vperm.xlu0 %3525, %v3014_v60  }
0x15fe   : > { %v2840_v0 = vpop.permute.xlu1 %2839 }
0x15ff   : > { %v2844_v1 = vmul.f32 %v3784_v17, %v2840_v0 }
0x1601   : > { %v2854_v63 = vrot.slane %v2844_v1, 7 }
0x1602   : > { %v2838_v2 = vpop.permute.xlu1 %2837 }
0x1603   : > { %v2843_v4 = vmul.f32 %v3786_v21, %v2838_v2  ;;  %v3007_v9 = vpop.permute.xlu0 %3006 }
0x1604   : > { %v3011_v5 = vmul.f32 %v3788_v25, %v3007_v9 }
0x1605   : > { %v2855_v7 = vsel %vm499_vm3, %v2854_v63, %v2843_v4 }
0x1606   : > { %2856 = vrot.lane.b32.xlu1 %v2855_v7, %s3848_s29  ;;  %v3021_v10 = vrot.slane %v3011_v5, 7 }
0x1607   : > { %v3005_v13 = vpop.permute.xlu0 %3004 }
0x1608   : > { %v3010_v15 = vmul.f32 %v3790_v30, %v3005_v13 }
0x160a   : > { %2864 = vrot.lane.b32.xlu1 %v2863_v45, %s3849_s10  ;;  %v3022_v11 = vsel %vm499_vm3, %v3021_v10, %v3010_v15 }
0x160b   : > { %3023 = vrot.lane.b32.xlu0 %v3022_v11, %s3848_s29  ;;  %s3080_s29 = scalar_lea.vmem (%p3945_p8), %s4869_s5, %s4051_s15 }
0x160f   : > { %3031 = vrot.lane.b32.xlu0 %v3030_v53, %s3849_s10 }
0x1613   : > { %v2850_v62 = vpop.permute.xlu1 %2849 }
0x1614   : > { %vm2851_vm10 = vcmp.eq.s32.totalorder %v2850_v62, 1 }
0x1618   : > { %v3017_v14 = vpop.permute.xlu0 %3016 }
0x1619   : > { %vm3018_vm3 = vcmp.eq.s32.totalorder %v3017_v14, 1 }
0x1678   : > { %v2857_v12 = vpop.permute.xlu1 %2856 }
0x1679   : > { %v2859_v16 = vsel %vm2851_vm10, %v2857_v12, %v4735_v27  ;;  %v2868_v18 = vsel %vm2851_vm10, %v2857_v12, 0.0 }
0x167a   : > { %v2876_v19 = vrot.slane %v2868_v18, %v4091_v54  ;;  %3064 = vst.msk [vmem:[#allocation2] sm:$0x3] %vm3063_vm9, %v2859_v16 }
0x167c   : > { %v2877_v17 = vcombine.high %v2876_v19, %v2876_v19  ;;  %v2884_v20 = vrot.slane %v2876_v19, %v4091_v54  ;;  %v2865_v22 = vpop.permute.xlu1 %2864 }
0x167d   : > { %v2867_v21 = vsel %vm2851_vm10, %v2865_v22, %v4770_v8  ;;  %v3024_v23 = vpop.permute.xlu0 %3023 }
0x167e   : > { %v2891_v25 = vrot.slane %v2877_v17, %v4091_v54  ;;  %2894 = vst.msk [vmem:[%s3973_s20 + $0x7] sm:$0x1] %vm539_vm7, %v2884_v20  ;;  %v3026_v27 = vsel %vm3018_vm3, %v3024_v23, %v4748_v36  ;;  %v3035_v26 = vsel %vm3018_vm3, %v3024_v23, 0.0 }
0x167f   : > { %3065 = vst.msk [vmem:[#allocation3] sm:$0x3] %vm3063_vm9, %v2867_v21  ;;  %v3043_v28 = vrot.slane %v3035_v26, %v4091_v54  ;;  %3066 = vst.msk [vmem:[#allocation4] sm:$0x3] %vm3063_vm9, %v3026_v27  ;;  %3078 = sbr.rel (!%p3945_p8) target bundleno = 5769 (0x1689), region = 124 }
0x1680   : > { %2895 = vst.msk [vmem:[%s3973_s20 + $0xf] sm:$0x1] %vm539_vm7, %v2891_v25 }
0x1681   : > { %v3044_v29 = vcombine.high %v3043_v28, %v3043_v28  ;;  %v3051_v8 = vrot.slane %v3043_v28, %v4091_v54  ;;  %v3032_v30 = vpop.permute.xlu0 %3031 }
0x1682   : > { %v3034_v24 = vsel %vm3018_vm3, %v3032_v30, %v4777_v3 }
0x1683   : > { %v3058_v34 = vrot.slane %v3044_v29, %v4091_v54  ;;  %3061 = vst.msk [vmem:[%s3975_s28] sm:$0x1] %vm539_vm7, %v3051_v8 }
0x1684   : > { %3067 = vst.msk [vmem:[#allocation5] sm:$0x3] %vm3063_vm9, %v3034_v24 }
0x1685   : > { %3062 = vst.msk [vmem:[%s3975_s28 + $0x8] sm:$0x1] %vm539_vm7, %v3058_v34  ;;  %v3110_v36 = vld [vmem:[%s3973_s20] sm:$0xff] (%p3945_p8) }
0x1686   : > { %3111 = vst [vmem:[%s3080_s29] sm:$0xff] %v3110_v36 }
0x1687   : > { %v3112_v3 = vld [vmem:[%s3973_s20 + $0x8] sm:$0xff] }
0x1688   : > { %3113 = vst [vmem:[%s3080_s29 + $0x10] sm:$0xff] %v3112_v3 }
0x1689 PF: > { %3119 = sbr.rel (!%p3949_p9) target bundleno = 5777 (0x1691), region = 162  ;;  %s3122_s13 = scalar_lea.vmem (%p3949_p9), %s4870_s6, %s4053_s16 }
0x168d   : > { %v3152_v54 = vld [vmem:[%s3975_s28] sm:$0xff] (%p3949_p9) }
0x168e   : > { %3153 = vst [vmem:[%s3122_s13] sm:$0xff] (%p3949_p9), %v3152_v54 }
0x168f   : > { %v3154_v31 = vld [vmem:[%s3975_s28 + $0x8] sm:$0xff] (%p3949_p9) }
0x1690   : > { %3155 = vst [vmem:[%s3122_s13 + $0x10] sm:$0xff] %v3154_v31 }
0x1691 PF: > { %s4875_s20 = sld [smem:[#allocation10_spill]]  ;;  %p14_p1 = scmp.ge.s32.totalorder %s3915_s27, 4  }
0x1692   : > { %s4876_s21 = smov %s3827_s22  ;;  %s4877_s22 = smov %s3936_s11 }
0x1693   : > { %s4878_s23 = smov %s3835_s24  ;;  %s4880_s25 = smov %s3915_s27 }
0x1694   :  { %16 = sbr.rel (!%p14_p1) target bundleno = 3 (0x3), region = 251 }
0x1697   : > { %s4879_s24 = smov %s4875_s20 }

</bundles_post_ra>
